<compile_context>
chip_gen: v7x
topology: tpu7x:2x2x1
jax: 0.10.0
libtpu: 0.0.40
codegen_flags: <defaults>
</compile_context>

<pallas_src>
import functools

import jax
import jax.numpy as jnp
import numpy as np
from jax.experimental import pallas as pl
from jax.experimental.pallas import tpu as pltpu


# ---------------------------------------------------------------------------
# Kernel: the whole sequence in one invocation.
# ---------------------------------------------------------------------------
def encoder_seq_kernel(tok_ref,        # scalar prefetch: (SEQ,) int32 token ids (SMEM)
                       emb_ref,        # (V, 1, Hp) bf16, whole embedding table (VMEM)
                       h0_ref,         # (1, Hp)    f32, initial hidden
                       wih_ref,        # (Hp, 3Hp)  bf16, W_ih^T (gate-block padded)
                       whh_ref,        # (Hp, 3Hp)  bf16, W_hh^T (gate-block padded)
                       bih_ref,        # (1, 3Hp)   f32
                       bhh_ref,        # (1, 3Hp)   f32
                       wout_ref,       # (Hp, Op)   bf16, W_out^T
                       bout_ref,       # (1, Op)    f32
                       logp_ref,       # out: (SEQ, Op) f32 log-softmax per step
                       hout_ref,       # out: (1, Hp)   f32 final hidden
                       whh_f32,        # scratch: (Hp, 3Hp) f32 upcast W_hh^T
                       wout_f32,       # scratch: (Hp, Op)  f32 upcast W_out^T
                       *, seq_len, o_real):
    H = h0_ref.shape[1]

    # One-time f32 copies of the bf16 weights that multiply the f32 hidden state.
    whh_f32[...] = whh_ref[...].astype(jnp.float32)
    wout_f32[...] = wout_ref[...].astype(jnp.float32)

    bih = bih_ref[...]
    bhh = bhh_ref[...]
    bout = bout_ref[...]

    h = h0_ref[...]                                            # (1, Hp) f32, lives in vregs

    for t in range(seq_len):                                   # fully unrolled (SEQ static)
        tok = tok_ref[t]                                       # scalar int32 from SMEM
        x = emb_ref[tok]                                       # (1, Hp) bf16 row gather

        # Input projection: native bf16 x bf16 MXU matmul, f32 accumulate.
        gi = jnp.dot(x, wih_ref[...],
                     preferred_element_type=jnp.float32) + bih
        # Hidden projection in f32 (hidden carry keeps full precision).
        gh = jnp.dot(h, whh_f32[...],
                     preferred_element_type=jnp.float32) + bhh

        # PyTorch GRU gate equations (gate order r, z, n); lane-aligned slices.
        r = jax.nn.sigmoid(gi[:, 0:H] + gh[:, 0:H])
        z = jax.nn.sigmoid(gi[:, H:2 * H] + gh[:, H:2 * H])
        n = jnp.tanh(gi[:, 2 * H:3 * H] + r * gh[:, 2 * H:3 * H])
        h = (1.0 - z) * n + z * h                              # (1, Hp)

        # Output projection + numerically stable log-softmax; mask padded lanes.
        logits = jnp.dot(h, wout_f32[...],
                         preferred_element_type=jnp.float32) + bout
        col = jax.lax.broadcasted_iota(jnp.int32, logits.shape, 1)
        logits = jnp.where(col < o_real, logits, -1e30)
        m = jnp.max(logits, axis=-1, keepdims=True)
        lse = jnp.log(jnp.sum(jnp.exp(logits - m), axis=-1, keepdims=True)) + m

        logp_ref[pl.ds(t, 1), :] = (logits - lse).astype(logp_ref.dtype)

    hout_ref[...] = h.astype(hout_ref.dtype)


# ---------------------------------------------------------------------------
# Host-side wrappers
# ---------------------------------------------------------------------------
def init_params(key, vocab, hidden, out):
    """Raw PyTorch-layout parameters (f32, real sizes)."""
    ks = jax.random.split(key, 7)
    s = 1.0 / np.sqrt(hidden)
    return {
        "embedding": jax.random.normal(ks[0], (vocab, hidden), jnp.float32),
        "w_ih": jax.random.uniform(ks[1], (3 * hidden, hidden), jnp.float32, -s, s),
        "w_hh": jax.random.uniform(ks[2], (3 * hidden, hidden), jnp.float32, -s, s),
        "b_ih": jax.random.uniform(ks[3], (3 * hidden,), jnp.float32, -s, s),
        "b_hh": jax.random.uniform(ks[4], (3 * hidden,), jnp.float32, -s, s),
        "w_out": jax.random.uniform(ks[5], (out, hidden), jnp.float32, -s, s),
        "b_out": jax.random.uniform(ks[6], (out,), jnp.float32, -s, s),
    }


def prepare_params(p, h_pad=128, o_pad=128):
    """One-time: transpose, gate-block pad to lane multiples, cast weights to bf16."""
    V, Hr = p["embedding"].shape
    Or = p["w_out"].shape[0]

    def pad2(a, rows, cols):
        return jnp.zeros((rows, cols), a.dtype).at[:a.shape[0], :a.shape[1]].set(a)

    def pad_gru_t(w):                          # (3Hr, Hr) -> padded (Hp, 3Hp) transpose
        wt = w.T                               # (Hr, 3Hr), columns grouped [r|z|n]
        out = jnp.zeros((h_pad, 3 * h_pad), jnp.float32)
        for g in range(3):
            out = out.at[:Hr, g * h_pad:g * h_pad + Hr].set(wt[:, g * Hr:(g + 1) * Hr])
        return out.astype(jnp.bfloat16)

    def pad_gru_bias(b):                       # (3Hr,) -> (1, 3Hp), padded lanes = 0
        out = jnp.zeros((1, 3 * h_pad), jnp.float32)
        for g in range(3):
            out = out.at[0, g * h_pad:g * h_pad + Hr].set(b[g * Hr:(g + 1) * Hr])
        return out

    emb = pad2(p["embedding"], V, h_pad).astype(jnp.bfloat16).reshape(V, 1, h_pad)

    return {
        "embedding": emb,                                                   # (V, 1, Hp)
        "wih_t": pad_gru_t(p["w_ih"]),                                      # (Hp, 3Hp)
        "whh_t": pad_gru_t(p["w_hh"]),                                      # (Hp, 3Hp)
        "bih": pad_gru_bias(p["b_ih"]),                                     # (1, 3Hp)
        "bhh": pad_gru_bias(p["b_hh"]),                                     # (1, 3Hp)
        "wout_t": pad2(p["w_out"].T, h_pad, o_pad).astype(jnp.bfloat16),    # (Hp, Op)
        "bout": jnp.zeros((1, o_pad), jnp.float32).at[0, :Or].set(p["b_out"]),
        "h_real": Hr, "o_real": Or, "h_pad": h_pad, "o_pad": o_pad,
    }


def encoder_forward_seq(tokens, hidden0, pp):
    """Run SEQ GRU-encoder steps in one pallas_call / one grid step.

    tokens: (SEQ,) int32; hidden0: (1,1,H_real) f32.
    Returns (log_probs (SEQ, O_real), final hidden (1,1,H_real))."""
    SEQ = int(tokens.shape[0])
    Hp, Op = pp["h_pad"], pp["o_pad"]
    Hr, Or = pp["h_real"], pp["o_real"]
    V = pp["embedding"].shape[0]

    h0 = jnp.zeros((1, Hp), jnp.float32).at[:, :Hr].set(
        hidden0.reshape(1, Hr).astype(jnp.float32))

    kernel = functools.partial(encoder_seq_kernel, seq_len=SEQ, o_real=Or)
    r2 = lambda i, toks: (0, 0)                          # resident 2-D blocks
    r3 = lambda i, toks: (0, 0, 0)                       # resident 3-D block

    logp_pad, h_pad_out = pl.pallas_call(
        kernel,
        out_shape=(jax.ShapeDtypeStruct((SEQ, Op), jnp.float32),
                   jax.ShapeDtypeStruct((1, Hp), jnp.float32)),
        grid_spec=pltpu.PrefetchScalarGridSpec(
            num_scalar_prefetch=1,
            grid=(1,),
            in_specs=[
                pl.BlockSpec((V, 1, Hp), r3),             # embedding table (VMEM-resident)
                pl.BlockSpec((1, Hp), r2),                # h0
                pl.BlockSpec((Hp, 3 * Hp), r2),           # W_ih^T (bf16)
                pl.BlockSpec((Hp, 3 * Hp), r2),           # W_hh^T (bf16)
                pl.BlockSpec((1, 3 * Hp), r2),            # b_ih
                pl.BlockSpec((1, 3 * Hp), r2),            # b_hh
                pl.BlockSpec((Hp, Op), r2),               # W_out^T (bf16)
                pl.BlockSpec((1, Op), r2),                # b_out
            ],
            out_specs=[
                pl.BlockSpec((SEQ, Op), r2),              # log-prob slab, one writeback
                pl.BlockSpec((1, Hp), r2),                # final hidden
            ],
            scratch_shapes=[
                pltpu.VMEM((Hp, 3 * Hp), jnp.float32),    # f32 W_hh^T
                pltpu.VMEM((Hp, Op), jnp.float32),        # f32 W_out^T
            ],
        ),
        compiler_params=pltpu.CompilerParams(
            dimension_semantics=("arbitrary",)),
    )(tokens, pp["embedding"], h0, pp["wih_t"], pp["whh_t"], pp["bih"],
      pp["bhh"], pp["wout_t"], pp["bout"])

    return logp_pad[:, :Or], h_pad_out[:, :Hr].reshape(1, 1, Hr)


def encoder_forward(token, hidden, pp):
    """Single-step forward matching PyTorch Encoder.forward(input, hidden)."""
    logp, h = encoder_forward_seq(jnp.reshape(token, (1,)).astype(jnp.int32), hidden, pp)
    return logp, h


# ---------------------------------------------------------------------------
# Pure-JAX reference (PyTorch semantics, f32 math, bf16-stored weights)
# ---------------------------------------------------------------------------
def reference_forward_seq(tokens, hidden0, p):
    Hr = p["embedding"].shape[1]
    emb = p["embedding"].astype(jnp.bfloat16).astype(jnp.float32)
    wih = p["w_ih"].astype(jnp.bfloat16).astype(jnp.float32)
    whh = p["w_hh"].astype(jnp.bfloat16).astype(jnp.float32)
    wout = p["w_out"].astype(jnp.bfloat16).astype(jnp.float32)
    bih, bhh, bout = p["b_ih"], p["b_hh"], p["b_out"]

    h = hidden0.reshape(1, Hr).astype(jnp.float32)
    logps = []
    for t in range(int(tokens.shape[0])):
        x = emb[tokens[t]].reshape(1, Hr)
        gi = x @ wih.T + bih
        gh = h @ whh.T + bhh
        r = jax.nn.sigmoid(gi[:, :Hr] + gh[:, :Hr])
        z = jax.nn.sigmoid(gi[:, Hr:2 * Hr] + gh[:, Hr:2 * Hr])
        n = jnp.tanh(gi[:, 2 * Hr:] + r * gh[:, 2 * Hr:])
        h = (1.0 - z) * n + z * h
        logits = h @ wout.T + bout
        logps.append(jax.nn.log_softmax(logits, axis=1))
    return jnp.concatenate(logps, axis=0), h.reshape(1, 1, Hr)


# ---------------------------------------------------------------------------
if __name__ == "__main__":
    VOCAB, HIDDEN, OUT, SEQ = 16, 32, 10, 8

    root = jax.random.PRNGKey(0)
    k_params, k_tok = jax.random.split(root)
    raw_params = init_params(k_params, VOCAB, HIDDEN, OUT)
    pp = prepare_params(raw_params)

    tokens = jax.random.randint(k_tok, (SEQ,), 0, VOCAB, dtype=jnp.int32)
    hidden0 = jnp.zeros((1, 1, HIDDEN), jnp.float32)      # Encoder.initHidden()

    # Fused multi-step run (one pallas_call, one grid step, for the whole sequence).
    logp, h_final = encoder_forward_seq(tokens, hidden0, pp)
    jax.block_until_ready((logp, h_final))

    ref_logp, ref_h = reference_forward_seq(tokens, hidden0, raw_params)
    np.testing.assert_allclose(np.asarray(logp), np.asarray(ref_logp), rtol=5e-5, atol=5e-5)
    np.testing.assert_allclose(np.asarray(h_final), np.asarray(ref_h), rtol=5e-5, atol=5e-5)

    # Single-step call matching the original module signature.
    logp1, h1 = encoder_forward(tokens[0], hidden0, pp)
    jax.block_until_ready((logp1, h1))
    ref1, ref_h1 = reference_forward_seq(tokens[:1], hidden0, raw_params)
    np.testing.assert_allclose(np.asarray(logp1), np.asarray(ref1), rtol=5e-5, atol=5e-5)
    np.testing.assert_allclose(np.asarray(h1), np.asarray(ref_h1), rtol=5e-5, atol=5e-5)

    print("KERNEL_OK")
</pallas_src>

<mosaic_0001>
module attributes {stable_mosaic.version = 11 : i64} {
  func.func @encoder_seq_kernel(%arg0: i32, %arg1: memref<8xi32, #tpu.memory_space<smem>>, %arg2: memref<16x1x128xbf16, #tpu.memory_space<vmem>>, %arg3: memref<1x128xf32, #tpu.memory_space<vmem>>, %arg4: memref<128x384xbf16, #tpu.memory_space<vmem>>, %arg5: memref<128x384xbf16, #tpu.memory_space<vmem>>, %arg6: memref<1x384xf32, #tpu.memory_space<vmem>>, %arg7: memref<1x384xf32, #tpu.memory_space<vmem>>, %arg8: memref<128x128xbf16, #tpu.memory_space<vmem>>, %arg9: memref<1x128xf32, #tpu.memory_space<vmem>>, %arg10: memref<8x128xf32, #tpu.memory_space<vmem>>, %arg11: memref<1x128xf32, #tpu.memory_space<vmem>>, %arg12: memref<128x384xf32, #tpu.memory_space<vmem>>, %arg13: memref<128x128xf32, #tpu.memory_space<vmem>>) attributes {dimension_semantics = [#tpu.dimension_semantics<arbitrary>], iteration_bounds = array<i64: 1>, scalar_prefetch = 1 : i64, scratch_operands = 2 : i64, tpu.core_type = #tpu.core_type<tc>, window_params = [{pipeline_mode = #tpu.pipeline_mode<synchronous>, transform_indices = @transform_0, window_bounds = array<i64: 16, 1, 128>}, {pipeline_mode = #tpu.pipeline_mode<synchronous>, transform_indices = @transform_1, window_bounds = array<i64: 1, 128>}, {pipeline_mode = #tpu.pipeline_mode<synchronous>, transform_indices = @transform_2, window_bounds = array<i64: 128, 384>}, {pipeline_mode = #tpu.pipeline_mode<synchronous>, transform_indices = @transform_3, window_bounds = array<i64: 128, 384>}, {pipeline_mode = #tpu.pipeline_mode<synchronous>, transform_indices = @transform_4, window_bounds = array<i64: 1, 384>}, {pipeline_mode = #tpu.pipeline_mode<synchronous>, transform_indices = @transform_5, window_bounds = array<i64: 1, 384>}, {pipeline_mode = #tpu.pipeline_mode<synchronous>, transform_indices = @transform_6, window_bounds = array<i64: 128, 128>}, {pipeline_mode = #tpu.pipeline_mode<synchronous>, transform_indices = @transform_7, window_bounds = array<i64: 1, 128>}, {pipeline_mode = #tpu.pipeline_mode<synchronous>, transform_indices = @transform_8, window_bounds = array<i64: 8, 128>}, {pipeline_mode = #tpu.pipeline_mode<synchronous>, transform_indices = @transform_9, window_bounds = array<i64: 1, 128>}]} {
    %c0 = arith.constant 0 : index
    %c0_0 = arith.constant 0 : index
    %0 = vector.load %arg5[%c0, %c0_0] : memref<128x384xbf16, #tpu.memory_space<vmem>>, vector<128x384xbf16>
    %1 = arith.extf %0 : vector<128x384xbf16> to vector<128x384xf32>
    %c0_1 = arith.constant 0 : index
    %c0_2 = arith.constant 0 : index
    %2 = vector.load %arg12[%c0_1, %c0_2] : memref<128x384xf32, #tpu.memory_space<vmem>>, vector<128x384xf32>
    tpu.vector_store %arg12[%c0_1, %c0_2], %1 {strides = array<i32>} : memref<128x384xf32, #tpu.memory_space<vmem>>, vector<128x384xf32>,
    %c0_3 = arith.constant 0 : index
    %c0_4 = arith.constant 0 : index
    %3 = vector.load %arg8[%c0_3, %c0_4] : memref<128x128xbf16, #tpu.memory_space<vmem>>, vector<128x128xbf16>
    %4 = arith.extf %3 : vector<128x128xbf16> to vector<128x128xf32>
    %c0_5 = arith.constant 0 : index
    %c0_6 = arith.constant 0 : index
    %5 = vector.load %arg13[%c0_5, %c0_6] : memref<128x128xf32, #tpu.memory_space<vmem>>, vector<128x128xf32>
    tpu.vector_store %arg13[%c0_5, %c0_6], %4 {strides = array<i32>} : memref<128x128xf32, #tpu.memory_space<vmem>>, vector<128x128xf32>,
    %c0_7 = arith.constant 0 : index
    %c0_8 = arith.constant 0 : index
    %6 = vector.load %arg6[%c0_7, %c0_8] : memref<1x384xf32, #tpu.memory_space<vmem>>, vector<1x384xf32>
    %c0_9 = arith.constant 0 : index
    %c0_10 = arith.constant 0 : index
    %7 = vector.load %arg7[%c0_9, %c0_10] : memref<1x384xf32, #tpu.memory_space<vmem>>, vector<1x384xf32>
    %c0_11 = arith.constant 0 : index
    %c0_12 = arith.constant 0 : index
    %8 = vector.load %arg9[%c0_11, %c0_12] : memref<1x128xf32, #tpu.memory_space<vmem>>, vector<1x128xf32>
    %c0_13 = arith.constant 0 : index
    %c0_14 = arith.constant 0 : index
    %9 = vector.load %arg3[%c0_13, %c0_14] : memref<1x128xf32, #tpu.memory_space<vmem>>, vector<1x128xf32>
    %c0_15 = arith.constant 0 : index
    %10 = memref.load %arg1[%c0_15] : memref<8xi32, #tpu.memory_space<smem>>
    %11 = arith.index_cast %10 : i32 to index
    %c0_16 = arith.constant 0 : index
    %c0_17 = arith.constant 0 : index
    %12 = vector.load %arg2[%11, %c0_16, %c0_17] : memref<16x1x128xbf16, #tpu.memory_space<vmem>>, vector<1x1x128xbf16>
    %13 = vector.shape_cast %12 : vector<1x1x128xbf16> to vector<1x128xbf16>
    %c0_18 = arith.constant 0 : index
    %c0_19 = arith.constant 0 : index
    %14 = vector.load %arg4[%c0_18, %c0_19] : memref<128x384xbf16, #tpu.memory_space<vmem>>, vector<128x384xbf16>
    %cst = arith.constant dense<0.000000e+00> : vector<1x384xf32>
    %15 = tpu.matmul %13, %14, %cst {dimension_numbers = #tpu.dot_dimension_numbers<[1], [0], [0], [1], [0, 0, 1, 1], [], []>} : vector<1x128xbf16>, vector<128x384xbf16>, vector<1x384xf32> -> vector<1x384xf32>
    %16 = arith.addf %15, %6 : vector<1x384xf32>
    %c0_20 = arith.constant 0 : index
    %c0_21 = arith.constant 0 : index
    %17 = vector.load %arg12[%c0_20, %c0_21] : memref<128x384xf32, #tpu.memory_space<vmem>>, vector<128x384xf32>
    %cst_22 = arith.constant dense<0.000000e+00> : vector<1x384xf32>
    %18 = tpu.matmul %9, %17, %cst_22 {dimension_numbers = #tpu.dot_dimension_numbers<[1], [0], [0], [1], [0, 0, 1, 1], [], []>} : vector<1x128xf32>, vector<128x384xf32>, vector<1x384xf32> -> vector<1x384xf32>
    %19 = arith.addf %18, %7 : vector<1x384xf32>
    %20 = vector.extract_strided_slice %16 {offsets = [0, 0], sizes = [1, 128], strides = [1, 1]} : vector<1x384xf32> to vector<1x128xf32>
    %21 = vector.extract_strided_slice %19 {offsets = [0, 0], sizes = [1, 128], strides = [1, 1]} : vector<1x384xf32> to vector<1x128xf32>
    %22 = arith.addf %20, %21 : vector<1x128xf32>
    %23 = arith.negf %22 : vector<1x128xf32>
    %24 = math.exp %23 : vector<1x128xf32>
    %cst_23 = arith.constant 1.000000e+00 : f32
    %25 = vector.broadcast %cst_23 : f32 to vector<1x128xf32>
    %26 = arith.addf %25, %24 : vector<1x128xf32>
    %27 = arith.divf %25, %26 : vector<1x128xf32>
    %28 = vector.extract_strided_slice %16 {offsets = [0, 128], sizes = [1, 128], strides = [1, 1]} : vector<1x384xf32> to vector<1x128xf32>
    %29 = vector.extract_strided_slice %19 {offsets = [0, 128], sizes = [1, 128], strides = [1, 1]} : vector<1x384xf32> to vector<1x128xf32>
    %30 = arith.addf %28, %29 : vector<1x128xf32>
    %31 = arith.negf %30 : vector<1x128xf32>
    %32 = math.exp %31 : vector<1x128xf32>
    %cst_24 = arith.constant 1.000000e+00 : f32
    %33 = vector.broadcast %cst_24 : f32 to vector<1x128xf32>
    %34 = arith.addf %33, %32 : vector<1x128xf32>
    %35 = arith.divf %33, %34 : vector<1x128xf32>
    %36 = vector.extract_strided_slice %16 {offsets = [0, 256], sizes = [1, 128], strides = [1, 1]} : vector<1x384xf32> to vector<1x128xf32>
    %37 = vector.extract_strided_slice %19 {offsets = [0, 256], sizes = [1, 128], strides = [1, 1]} : vector<1x384xf32> to vector<1x128xf32>
    %38 = arith.mulf %27, %37 : vector<1x128xf32>
    %39 = arith.addf %36, %38 : vector<1x128xf32>
    %40 = math.tanh %39 : vector<1x128xf32>
    %cst_25 = arith.constant 1.000000e+00 : f32
    %41 = vector.broadcast %cst_25 : f32 to vector<1x128xf32>
    %42 = arith.subf %41, %35 : vector<1x128xf32>
    %43 = arith.mulf %42, %40 : vector<1x128xf32>
    %44 = arith.mulf %35, %9 : vector<1x128xf32>
    %45 = arith.addf %43, %44 : vector<1x128xf32>
    %c0_26 = arith.constant 0 : index
    %c0_27 = arith.constant 0 : index
    %46 = vector.load %arg13[%c0_26, %c0_27] : memref<128x128xf32, #tpu.memory_space<vmem>>, vector<128x128xf32>
    %cst_28 = arith.constant dense<0.000000e+00> : vector<1x128xf32>
    %47 = tpu.matmul %45, %46, %cst_28 {dimension_numbers = #tpu.dot_dimension_numbers<[1], [0], [0], [1], [0, 0, 1, 1], [], []>} : vector<1x128xf32>, vector<128x128xf32>, vector<1x128xf32> -> vector<1x128xf32>
    %48 = arith.addf %47, %8 : vector<1x128xf32>
    %49 = tpu.iota {dimensions = array<i32: 1>} : vector<1x128xi32>
    %c10_i32 = arith.constant 10 : i32
    %50 = vector.broadcast %c10_i32 : i32 to vector<1x128xi32>
    %51 = arith.cmpi slt, %49, %50 : vector<1x128xi32>
    %cst_29 = arith.constant -1.000000e+30 : f32
    %52 = vector.broadcast %cst_29 : f32 to vector<1x128xf32>
    %53 = arith.select %51, %48, %52 : vector<1x128xi1>, vector<1x128xf32>
    %cst_30 = arith.constant dense<0xFF800000> : vector<1xf32>
    %54 = vector.multi_reduction <maximumf>, %53, %cst_30 [1] : vector<1x128xf32> to vector<1xf32>
    %55 = vector.shape_cast %54 : vector<1xf32> to vector<1x1xf32>
    %56 = vector.broadcast %55 : vector<1x1xf32> to vector<1x128xf32>
    %57 = arith.subf %53, %56 : vector<1x128xf32>
    %58 = math.exp %57 : vector<1x128xf32>
    %cst_31 = arith.constant dense<0.000000e+00> : vector<1xf32>
    %59 = vector.multi_reduction <add>, %58, %cst_31 [1] : vector<1x128xf32> to vector<1xf32>
    %60 = vector.shape_cast %59 : vector<1xf32> to vector<1x1xf32>
    %61 = math.log %60 : vector<1x1xf32>
    %62 = arith.addf %61, %55 : vector<1x1xf32>
    %63 = vector.broadcast %62 : vector<1x1xf32> to vector<1x128xf32>
    %64 = arith.subf %53, %63 : vector<1x128xf32>
    %c0_32 = arith.constant 0 : index
    %c0_33 = arith.constant 0 : index
    %65 = vector.load %arg10[%c0_32, %c0_33] : memref<8x128xf32, #tpu.memory_space<vmem>>, vector<1x128xf32>
    tpu.vector_store %arg10[%c0_32, %c0_33], %64 {strides = array<i32>} : memref<8x128xf32, #tpu.memory_space<vmem>>, vector<1x128xf32>,
    %c1 = arith.constant 1 : index
    %66 = memref.load %arg1[%c1] : memref<8xi32, #tpu.memory_space<smem>>
    %67 = arith.index_cast %66 : i32 to index
    %c0_34 = arith.constant 0 : index
    %c0_35 = arith.constant 0 : index
    %68 = vector.load %arg2[%67, %c0_34, %c0_35] : memref<16x1x128xbf16, #tpu.memory_space<vmem>>, vector<1x1x128xbf16>
    %69 = vector.shape_cast %68 : vector<1x1x128xbf16> to vector<1x128xbf16>
    %c0_36 = arith.constant 0 : index
    %c0_37 = arith.constant 0 : index
    %70 = vector.load %arg4[%c0_36, %c0_37] : memref<128x384xbf16, #tpu.memory_space<vmem>>, vector<128x384xbf16>
    %cst_38 = arith.constant dense<0.000000e+00> : vector<1x384xf32>
    %71 = tpu.matmul %69, %70, %cst_38 {dimension_numbers = #tpu.dot_dimension_numbers<[1], [0], [0], [1], [0, 0, 1, 1], [], []>} : vector<1x128xbf16>, vector<128x384xbf16>, vector<1x384xf32> -> vector<1x384xf32>
    %72 = arith.addf %71, %6 : vector<1x384xf32>
    %c0_39 = arith.constant 0 : index
    %c0_40 = arith.constant 0 : index
    %73 = vector.load %arg12[%c0_39, %c0_40] : memref<128x384xf32, #tpu.memory_space<vmem>>, vector<128x384xf32>
    %cst_41 = arith.constant dense<0.000000e+00> : vector<1x384xf32>
    %74 = tpu.matmul %45, %73, %cst_41 {dimension_numbers = #tpu.dot_dimension_numbers<[1], [0], [0], [1], [0, 0, 1, 1], [], []>} : vector<1x128xf32>, vector<128x384xf32>, vector<1x384xf32> -> vector<1x384xf32>
    %75 = arith.addf %74, %7 : vector<1x384xf32>
    %76 = vector.extract_strided_slice %72 {offsets = [0, 0], sizes = [1, 128], strides = [1, 1]} : vector<1x384xf32> to vector<1x128xf32>
    %77 = vector.extract_strided_slice %75 {offsets = [0, 0], sizes = [1, 128], strides = [1, 1]} : vector<1x384xf32> to vector<1x128xf32>
    %78 = arith.addf %76, %77 : vector<1x128xf32>
    %79 = arith.negf %78 : vector<1x128xf32>
    %80 = math.exp %79 : vector<1x128xf32>
    %cst_42 = arith.constant 1.000000e+00 : f32
    %81 = vector.broadcast %cst_42 : f32 to vector<1x128xf32>
    %82 = arith.addf %81, %80 : vector<1x128xf32>
    %83 = arith.divf %81, %82 : vector<1x128xf32>
    %84 = vector.extract_strided_slice %72 {offsets = [0, 128], sizes = [1, 128], strides = [1, 1]} : vector<1x384xf32> to vector<1x128xf32>
    %85 = vector.extract_strided_slice %75 {offsets = [0, 128], sizes = [1, 128], strides = [1, 1]} : vector<1x384xf32> to vector<1x128xf32>
    %86 = arith.addf %84, %85 : vector<1x128xf32>
    %87 = arith.negf %86 : vector<1x128xf32>
    %88 = math.exp %87 : vector<1x128xf32>
    %cst_43 = arith.constant 1.000000e+00 : f32
    %89 = vector.broadcast %cst_43 : f32 to vector<1x128xf32>
    %90 = arith.addf %89, %88 : vector<1x128xf32>
    %91 = arith.divf %89, %90 : vector<1x128xf32>
    %92 = vector.extract_strided_slice %72 {offsets = [0, 256], sizes = [1, 128], strides = [1, 1]} : vector<1x384xf32> to vector<1x128xf32>
    %93 = vector.extract_strided_slice %75 {offsets = [0, 256], sizes = [1, 128], strides = [1, 1]} : vector<1x384xf32> to vector<1x128xf32>
    %94 = arith.mulf %83, %93 : vector<1x128xf32>
    %95 = arith.addf %92, %94 : vector<1x128xf32>
    %96 = math.tanh %95 : vector<1x128xf32>
    %cst_44 = arith.constant 1.000000e+00 : f32
    %97 = vector.broadcast %cst_44 : f32 to vector<1x128xf32>
    %98 = arith.subf %97, %91 : vector<1x128xf32>
    %99 = arith.mulf %98, %96 : vector<1x128xf32>
    %100 = arith.mulf %91, %45 : vector<1x128xf32>
    %101 = arith.addf %99, %100 : vector<1x128xf32>
    %c0_45 = arith.constant 0 : index
    %c0_46 = arith.constant 0 : index
    %102 = vector.load %arg13[%c0_45, %c0_46] : memref<128x128xf32, #tpu.memory_space<vmem>>, vector<128x128xf32>
    %cst_47 = arith.constant dense<0.000000e+00> : vector<1x128xf32>
    %103 = tpu.matmul %101, %102, %cst_47 {dimension_numbers = #tpu.dot_dimension_numbers<[1], [0], [0], [1], [0, 0, 1, 1], [], []>} : vector<1x128xf32>, vector<128x128xf32>, vector<1x128xf32> -> vector<1x128xf32>
    %104 = arith.addf %103, %8 : vector<1x128xf32>
    %105 = tpu.iota {dimensions = array<i32: 1>} : vector<1x128xi32>
    %c10_i32_48 = arith.constant 10 : i32
    %106 = vector.broadcast %c10_i32_48 : i32 to vector<1x128xi32>
    %107 = arith.cmpi slt, %105, %106 : vector<1x128xi32>
    %cst_49 = arith.constant -1.000000e+30 : f32
    %108 = vector.broadcast %cst_49 : f32 to vector<1x128xf32>
    %109 = arith.select %107, %104, %108 : vector<1x128xi1>, vector<1x128xf32>
    %cst_50 = arith.constant dense<0xFF800000> : vector<1xf32>
    %110 = vector.multi_reduction <maximumf>, %109, %cst_50 [1] : vector<1x128xf32> to vector<1xf32>
    %111 = vector.shape_cast %110 : vector<1xf32> to vector<1x1xf32>
    %112 = vector.broadcast %111 : vector<1x1xf32> to vector<1x128xf32>
    %113 = arith.subf %109, %112 : vector<1x128xf32>
    %114 = math.exp %113 : vector<1x128xf32>
    %cst_51 = arith.constant dense<0.000000e+00> : vector<1xf32>
    %115 = vector.multi_reduction <add>, %114, %cst_51 [1] : vector<1x128xf32> to vector<1xf32>
    %116 = vector.shape_cast %115 : vector<1xf32> to vector<1x1xf32>
    %117 = math.log %116 : vector<1x1xf32>
    %118 = arith.addf %117, %111 : vector<1x1xf32>
    %119 = vector.broadcast %118 : vector<1x1xf32> to vector<1x128xf32>
    %120 = arith.subf %109, %119 : vector<1x128xf32>
    %c1_52 = arith.constant 1 : index
    %c0_53 = arith.constant 0 : index
    %121 = vector.load %arg10[%c1_52, %c0_53] : memref<8x128xf32, #tpu.memory_space<vmem>>, vector<1x128xf32>
    tpu.vector_store %arg10[%c1_52, %c0_53], %120 {strides = array<i32>} : memref<8x128xf32, #tpu.memory_space<vmem>>, vector<1x128xf32>,
    %c2 = arith.constant 2 : index
    %122 = memref.load %arg1[%c2] : memref<8xi32, #tpu.memory_space<smem>>
    %123 = arith.index_cast %122 : i32 to index
    %c0_54 = arith.constant 0 : index
    %c0_55 = arith.constant 0 : index
    %124 = vector.load %arg2[%123, %c0_54, %c0_55] : memref<16x1x128xbf16, #tpu.memory_space<vmem>>, vector<1x1x128xbf16>
    %125 = vector.shape_cast %124 : vector<1x1x128xbf16> to vector<1x128xbf16>
    %c0_56 = arith.constant 0 : index
    %c0_57 = arith.constant 0 : index
    %126 = vector.load %arg4[%c0_56, %c0_57] : memref<128x384xbf16, #tpu.memory_space<vmem>>, vector<128x384xbf16>
    %cst_58 = arith.constant dense<0.000000e+00> : vector<1x384xf32>
    %127 = tpu.matmul %125, %126, %cst_58 {dimension_numbers = #tpu.dot_dimension_numbers<[1], [0], [0], [1], [0, 0, 1, 1], [], []>} : vector<1x128xbf16>, vector<128x384xbf16>, vector<1x384xf32> -> vector<1x384xf32>
    %128 = arith.addf %127, %6 : vector<1x384xf32>
    %c0_59 = arith.constant 0 : index
    %c0_60 = arith.constant 0 : index
    %129 = vector.load %arg12[%c0_59, %c0_60] : memref<128x384xf32, #tpu.memory_space<vmem>>, vector<128x384xf32>
    %cst_61 = arith.constant dense<0.000000e+00> : vector<1x384xf32>
    %130 = tpu.matmul %101, %129, %cst_61 {dimension_numbers = #tpu.dot_dimension_numbers<[1], [0], [0], [1], [0, 0, 1, 1], [], []>} : vector<1x128xf32>, vector<128x384xf32>, vector<1x384xf32> -> vector<1x384xf32>
    %131 = arith.addf %130, %7 : vector<1x384xf32>
    %132 = vector.extract_strided_slice %128 {offsets = [0, 0], sizes = [1, 128], strides = [1, 1]} : vector<1x384xf32> to vector<1x128xf32>
    %133 = vector.extract_strided_slice %131 {offsets = [0, 0], sizes = [1, 128], strides = [1, 1]} : vector<1x384xf32> to vector<1x128xf32>
    %134 = arith.addf %132, %133 : vector<1x128xf32>
    %135 = arith.negf %134 : vector<1x128xf32>
    %136 = math.exp %135 : vector<1x128xf32>
    %cst_62 = arith.constant 1.000000e+00 : f32
    %137 = vector.broadcast %cst_62 : f32 to vector<1x128xf32>
    %138 = arith.addf %137, %136 : vector<1x128xf32>
    %139 = arith.divf %137, %138 : vector<1x128xf32>
    %140 = vector.extract_strided_slice %128 {offsets = [0, 128], sizes = [1, 128], strides = [1, 1]} : vector<1x384xf32> to vector<1x128xf32>
    %141 = vector.extract_strided_slice %131 {offsets = [0, 128], sizes = [1, 128], strides = [1, 1]} : vector<1x384xf32> to vector<1x128xf32>
    %142 = arith.addf %140, %141 : vector<1x128xf32>
    %143 = arith.negf %142 : vector<1x128xf32>
    %144 = math.exp %143 : vector<1x128xf32>
    %cst_63 = arith.constant 1.000000e+00 : f32
    %145 = vector.broadcast %cst_63 : f32 to vector<1x128xf32>
    %146 = arith.addf %145, %144 : vector<1x128xf32>
    %147 = arith.divf %145, %146 : vector<1x128xf32>
    %148 = vector.extract_strided_slice %128 {offsets = [0, 256], sizes = [1, 128], strides = [1, 1]} : vector<1x384xf32> to vector<1x128xf32>
    %149 = vector.extract_strided_slice %131 {offsets = [0, 256], sizes = [1, 128], strides = [1, 1]} : vector<1x384xf32> to vector<1x128xf32>
    %150 = arith.mulf %139, %149 : vector<1x128xf32>
    %151 = arith.addf %148, %150 : vector<1x128xf32>
    %152 = math.tanh %151 : vector<1x128xf32>
    %cst_64 = arith.constant 1.000000e+00 : f32
    %153 = vector.broadcast %cst_64 : f32 to vector<1x128xf32>
    %154 = arith.subf %153, %147 : vector<1x128xf32>
    %155 = arith.mulf %154, %152 : vector<1x128xf32>
    %156 = arith.mulf %147, %101 : vector<1x128xf32>
    %157 = arith.addf %155, %156 : vector<1x128xf32>
    %c0_65 = arith.constant 0 : index
    %c0_66 = arith.constant 0 : index
    %158 = vector.load %arg13[%c0_65, %c0_66] : memref<128x128xf32, #tpu.memory_space<vmem>>, vector<128x128xf32>
    %cst_67 = arith.constant dense<0.000000e+00> : vector<1x128xf32>
    %159 = tpu.matmul %157, %158, %cst_67 {dimension_numbers = #tpu.dot_dimension_numbers<[1], [0], [0], [1], [0, 0, 1, 1], [], []>} : vector<1x128xf32>, vector<128x128xf32>, vector<1x128xf32> -> vector<1x128xf32>
    %160 = arith.addf %159, %8 : vector<1x128xf32>
    %161 = tpu.iota {dimensions = array<i32: 1>} : vector<1x128xi32>
    %c10_i32_68 = arith.constant 10 : i32
    %162 = vector.broadcast %c10_i32_68 : i32 to vector<1x128xi32>
    %163 = arith.cmpi slt, %161, %162 : vector<1x128xi32>
    %cst_69 = arith.constant -1.000000e+30 : f32
    %164 = vector.broadcast %cst_69 : f32 to vector<1x128xf32>
    %165 = arith.select %163, %160, %164 : vector<1x128xi1>, vector<1x128xf32>
    %cst_70 = arith.constant dense<0xFF800000> : vector<1xf32>
    %166 = vector.multi_reduction <maximumf>, %165, %cst_70 [1] : vector<1x128xf32> to vector<1xf32>
    %167 = vector.shape_cast %166 : vector<1xf32> to vector<1x1xf32>
    %168 = vector.broadcast %167 : vector<1x1xf32> to vector<1x128xf32>
    %169 = arith.subf %165, %168 : vector<1x128xf32>
    %170 = math.exp %169 : vector<1x128xf32>
    %cst_71 = arith.constant dense<0.000000e+00> : vector<1xf32>
    %171 = vector.multi_reduction <add>, %170, %cst_71 [1] : vector<1x128xf32> to vector<1xf32>
    %172 = vector.shape_cast %171 : vector<1xf32> to vector<1x1xf32>
    %173 = math.log %172 : vector<1x1xf32>
    %174 = arith.addf %173, %167 : vector<1x1xf32>
    %175 = vector.broadcast %174 : vector<1x1xf32> to vector<1x128xf32>
    %176 = arith.subf %165, %175 : vector<1x128xf32>
    %c2_72 = arith.constant 2 : index
    %c0_73 = arith.constant 0 : index
    %177 = vector.load %arg10[%c2_72, %c0_73] : memref<8x128xf32, #tpu.memory_space<vmem>>, vector<1x128xf32>
    tpu.vector_store %arg10[%c2_72, %c0_73], %176 {strides = array<i32>} : memref<8x128xf32, #tpu.memory_space<vmem>>, vector<1x128xf32>,
    %c3 = arith.constant 3 : index
    %178 = memref.load %arg1[%c3] : memref<8xi32, #tpu.memory_space<smem>>
    %179 = arith.index_cast %178 : i32 to index
    %c0_74 = arith.constant 0 : index
    %c0_75 = arith.constant 0 : index
    %180 = vector.load %arg2[%179, %c0_74, %c0_75] : memref<16x1x128xbf16, #tpu.memory_space<vmem>>, vector<1x1x128xbf16>
    %181 = vector.shape_cast %180 : vector<1x1x128xbf16> to vector<1x128xbf16>
    %c0_76 = arith.constant 0 : index
    %c0_77 = arith.constant 0 : index
    %182 = vector.load %arg4[%c0_76, %c0_77] : memref<128x384xbf16, #tpu.memory_space<vmem>>, vector<128x384xbf16>
    %cst_78 = arith.constant dense<0.000000e+00> : vector<1x384xf32>
    %183 = tpu.matmul %181, %182, %cst_78 {dimension_numbers = #tpu.dot_dimension_numbers<[1], [0], [0], [1], [0, 0, 1, 1], [], []>} : vector<1x128xbf16>, vector<128x384xbf16>, vector<1x384xf32> -> vector<1x384xf32>
    %184 = arith.addf %183, %6 : vector<1x384xf32>
    %c0_79 = arith.constant 0 : index
    %c0_80 = arith.constant 0 : index
    %185 = vector.load %arg12[%c0_79, %c0_80] : memref<128x384xf32, #tpu.memory_space<vmem>>, vector<128x384xf32>
    %cst_81 = arith.constant dense<0.000000e+00> : vector<1x384xf32>
    %186 = tpu.matmul %157, %185, %cst_81 {dimension_numbers = #tpu.dot_dimension_numbers<[1], [0], [0], [1], [0, 0, 1, 1], [], []>} : vector<1x128xf32>, vector<128x384xf32>, vector<1x384xf32> -> vector<1x384xf32>
    %187 = arith.addf %186, %7 : vector<1x384xf32>
    %188 = vector.extract_strided_slice %184 {offsets = [0, 0], sizes = [1, 128], strides = [1, 1]} : vector<1x384xf32> to vector<1x128xf32>
    %189 = vector.extract_strided_slice %187 {offsets = [0, 0], sizes = [1, 128], strides = [1, 1]} : vector<1x384xf32> to vector<1x128xf32>
    %190 = arith.addf %188, %189 : vector<1x128xf32>
    %191 = arith.negf %190 : vector<1x128xf32>
    %192 = math.exp %191 : vector<1x128xf32>
    %cst_82 = arith.constant 1.000000e+00 : f32
    %193 = vector.broadcast %cst_82 : f32 to vector<1x128xf32>
    %194 = arith.addf %193, %192 : vector<1x128xf32>
    %195 = arith.divf %193, %194 : vector<1x128xf32>
    %196 = vector.extract_strided_slice %184 {offsets = [0, 128], sizes = [1, 128], strides = [1, 1]} : vector<1x384xf32> to vector<1x128xf32>
    %197 = vector.extract_strided_slice %187 {offsets = [0, 128], sizes = [1, 128], strides = [1, 1]} : vector<1x384xf32> to vector<1x128xf32>
    %198 = arith.addf %196, %197 : vector<1x128xf32>
    %199 = arith.negf %198 : vector<1x128xf32>
    %200 = math.exp %199 : vector<1x128xf32>
    %cst_83 = arith.constant 1.000000e+00 : f32
    %201 = vector.broadcast %cst_83 : f32 to vector<1x128xf32>
    %202 = arith.addf %201, %200 : vector<1x128xf32>
    %203 = arith.divf %201, %202 : vector<1x128xf32>
    %204 = vector.extract_strided_slice %184 {offsets = [0, 256], sizes = [1, 128], strides = [1, 1]} : vector<1x384xf32> to vector<1x128xf32>
    %205 = vector.extract_strided_slice %187 {offsets = [0, 256], sizes = [1, 128], strides = [1, 1]} : vector<1x384xf32> to vector<1x128xf32>
    %206 = arith.mulf %195, %205 : vector<1x128xf32>
    %207 = arith.addf %204, %206 : vector<1x128xf32>
    %208 = math.tanh %207 : vector<1x128xf32>
    %cst_84 = arith.constant 1.000000e+00 : f32
    %209 = vector.broadcast %cst_84 : f32 to vector<1x128xf32>
    %210 = arith.subf %209, %203 : vector<1x128xf32>
    %211 = arith.mulf %210, %208 : vector<1x128xf32>
    %212 = arith.mulf %203, %157 : vector<1x128xf32>
    %213 = arith.addf %211, %212 : vector<1x128xf32>
    %c0_85 = arith.constant 0 : index
    %c0_86 = arith.constant 0 : index
    %214 = vector.load %arg13[%c0_85, %c0_86] : memref<128x128xf32, #tpu.memory_space<vmem>>, vector<128x128xf32>
    %cst_87 = arith.constant dense<0.000000e+00> : vector<1x128xf32>
    %215 = tpu.matmul %213, %214, %cst_87 {dimension_numbers = #tpu.dot_dimension_numbers<[1], [0], [0], [1], [0, 0, 1, 1], [], []>} : vector<1x128xf32>, vector<128x128xf32>, vector<1x128xf32> -> vector<1x128xf32>
    %216 = arith.addf %215, %8 : vector<1x128xf32>
    %217 = tpu.iota {dimensions = array<i32: 1>} : vector<1x128xi32>
    %c10_i32_88 = arith.constant 10 : i32
    %218 = vector.broadcast %c10_i32_88 : i32 to vector<1x128xi32>
    %219 = arith.cmpi slt, %217, %218 : vector<1x128xi32>
    %cst_89 = arith.constant -1.000000e+30 : f32
    %220 = vector.broadcast %cst_89 : f32 to vector<1x128xf32>
    %221 = arith.select %219, %216, %220 : vector<1x128xi1>, vector<1x128xf32>
    %cst_90 = arith.constant dense<0xFF800000> : vector<1xf32>
    %222 = vector.multi_reduction <maximumf>, %221, %cst_90 [1] : vector<1x128xf32> to vector<1xf32>
    %223 = vector.shape_cast %222 : vector<1xf32> to vector<1x1xf32>
    %224 = vector.broadcast %223 : vector<1x1xf32> to vector<1x128xf32>
    %225 = arith.subf %221, %224 : vector<1x128xf32>
    %226 = math.exp %225 : vector<1x128xf32>
    %cst_91 = arith.constant dense<0.000000e+00> : vector<1xf32>
    %227 = vector.multi_reduction <add>, %226, %cst_91 [1] : vector<1x128xf32> to vector<1xf32>
    %228 = vector.shape_cast %227 : vector<1xf32> to vector<1x1xf32>
    %229 = math.log %228 : vector<1x1xf32>
    %230 = arith.addf %229, %223 : vector<1x1xf32>
    %231 = vector.broadcast %230 : vector<1x1xf32> to vector<1x128xf32>
    %232 = arith.subf %221, %231 : vector<1x128xf32>
    %c3_92 = arith.constant 3 : index
    %c0_93 = arith.constant 0 : index
    %233 = vector.load %arg10[%c3_92, %c0_93] : memref<8x128xf32, #tpu.memory_space<vmem>>, vector<1x128xf32>
    tpu.vector_store %arg10[%c3_92, %c0_93], %232 {strides = array<i32>} : memref<8x128xf32, #tpu.memory_space<vmem>>, vector<1x128xf32>,
    %c4 = arith.constant 4 : index
    %234 = memref.load %arg1[%c4] : memref<8xi32, #tpu.memory_space<smem>>
    %235 = arith.index_cast %234 : i32 to index
    %c0_94 = arith.constant 0 : index
    %c0_95 = arith.constant 0 : index
    %236 = vector.load %arg2[%235, %c0_94, %c0_95] : memref<16x1x128xbf16, #tpu.memory_space<vmem>>, vector<1x1x128xbf16>
    %237 = vector.shape_cast %236 : vector<1x1x128xbf16> to vector<1x128xbf16>
    %c0_96 = arith.constant 0 : index
    %c0_97 = arith.constant 0 : index
    %238 = vector.load %arg4[%c0_96, %c0_97] : memref<128x384xbf16, #tpu.memory_space<vmem>>, vector<128x384xbf16>
    %cst_98 = arith.constant dense<0.000000e+00> : vector<1x384xf32>
    %239 = tpu.matmul %237, %238, %cst_98 {dimension_numbers = #tpu.dot_dimension_numbers<[1], [0], [0], [1], [0, 0, 1, 1], [], []>} : vector<1x128xbf16>, vector<128x384xbf16>, vector<1x384xf32> -> vector<1x384xf32>
    %240 = arith.addf %239, %6 : vector<1x384xf32>
    %c0_99 = arith.constant 0 : index
    %c0_100 = arith.constant 0 : index
    %241 = vector.load %arg12[%c0_99, %c0_100] : memref<128x384xf32, #tpu.memory_space<vmem>>, vector<128x384xf32>
    %cst_101 = arith.constant dense<0.000000e+00> : vector<1x384xf32>
    %242 = tpu.matmul %213, %241, %cst_101 {dimension_numbers = #tpu.dot_dimension_numbers<[1], [0], [0], [1], [0, 0, 1, 1], [], []>} : vector<1x128xf32>, vector<128x384xf32>, vector<1x384xf32> -> vector<1x384xf32>
    %243 = arith.addf %242, %7 : vector<1x384xf32>
    %244 = vector.extract_strided_slice %240 {offsets = [0, 0], sizes = [1, 128], strides = [1, 1]} : vector<1x384xf32> to vector<1x128xf32>
    %245 = vector.extract_strided_slice %243 {offsets = [0, 0], sizes = [1, 128], strides = [1, 1]} : vector<1x384xf32> to vector<1x128xf32>
    %246 = arith.addf %244, %245 : vector<1x128xf32>
    %247 = arith.negf %246 : vector<1x128xf32>
    %248 = math.exp %247 : vector<1x128xf32>
    %cst_102 = arith.constant 1.000000e+00 : f32
    %249 = vector.broadcast %cst_102 : f32 to vector<1x128xf32>
    %250 = arith.addf %249, %248 : vector<1x128xf32>
    %251 = arith.divf %249, %250 : vector<1x128xf32>
    %252 = vector.extract_strided_slice %240 {offsets = [0, 128], sizes = [1, 128], strides = [1, 1]} : vector<1x384xf32> to vector<1x128xf32>
    %253 = vector.extract_strided_slice %243 {offsets = [0, 128], sizes = [1, 128], strides = [1, 1]} : vector<1x384xf32> to vector<1x128xf32>
    %254 = arith.addf %252, %253 : vector<1x128xf32>
    %255 = arith.negf %254 : vector<1x128xf32>
    %256 = math.exp %255 : vector<1x128xf32>
    %cst_103 = arith.constant 1.000000e+00 : f32
    %257 = vector.broadcast %cst_103 : f32 to vector<1x128xf32>
    %258 = arith.addf %257, %256 : vector<1x128xf32>
    %259 = arith.divf %257, %258 : vector<1x128xf32>
    %260 = vector.extract_strided_slice %240 {offsets = [0, 256], sizes = [1, 128], strides = [1, 1]} : vector<1x384xf32> to vector<1x128xf32>
    %261 = vector.extract_strided_slice %243 {offsets = [0, 256], sizes = [1, 128], strides = [1, 1]} : vector<1x384xf32> to vector<1x128xf32>
    %262 = arith.mulf %251, %261 : vector<1x128xf32>
    %263 = arith.addf %260, %262 : vector<1x128xf32>
    %264 = math.tanh %263 : vector<1x128xf32>
    %cst_104 = arith.constant 1.000000e+00 : f32
    %265 = vector.broadcast %cst_104 : f32 to vector<1x128xf32>
    %266 = arith.subf %265, %259 : vector<1x128xf32>
    %267 = arith.mulf %266, %264 : vector<1x128xf32>
    %268 = arith.mulf %259, %213 : vector<1x128xf32>
    %269 = arith.addf %267, %268 : vector<1x128xf32>
    %c0_105 = arith.constant 0 : index
    %c0_106 = arith.constant 0 : index
    %270 = vector.load %arg13[%c0_105, %c0_106] : memref<128x128xf32, #tpu.memory_space<vmem>>, vector<128x128xf32>
    %cst_107 = arith.constant dense<0.000000e+00> : vector<1x128xf32>
    %271 = tpu.matmul %269, %270, %cst_107 {dimension_numbers = #tpu.dot_dimension_numbers<[1], [0], [0], [1], [0, 0, 1, 1], [], []>} : vector<1x128xf32>, vector<128x128xf32>, vector<1x128xf32> -> vector<1x128xf32>
    %272 = arith.addf %271, %8 : vector<1x128xf32>
    %273 = tpu.iota {dimensions = array<i32: 1>} : vector<1x128xi32>
    %c10_i32_108 = arith.constant 10 : i32
    %274 = vector.broadcast %c10_i32_108 : i32 to vector<1x128xi32>
    %275 = arith.cmpi slt, %273, %274 : vector<1x128xi32>
    %cst_109 = arith.constant -1.000000e+30 : f32
    %276 = vector.broadcast %cst_109 : f32 to vector<1x128xf32>
    %277 = arith.select %275, %272, %276 : vector<1x128xi1>, vector<1x128xf32>
    %cst_110 = arith.constant dense<0xFF800000> : vector<1xf32>
    %278 = vector.multi_reduction <maximumf>, %277, %cst_110 [1] : vector<1x128xf32> to vector<1xf32>
    %279 = vector.shape_cast %278 : vector<1xf32> to vector<1x1xf32>
    %280 = vector.broadcast %279 : vector<1x1xf32> to vector<1x128xf32>
    %281 = arith.subf %277, %280 : vector<1x128xf32>
    %282 = math.exp %281 : vector<1x128xf32>
    %cst_111 = arith.constant dense<0.000000e+00> : vector<1xf32>
    %283 = vector.multi_reduction <add>, %282, %cst_111 [1] : vector<1x128xf32> to vector<1xf32>
    %284 = vector.shape_cast %283 : vector<1xf32> to vector<1x1xf32>
    %285 = math.log %284 : vector<1x1xf32>
    %286 = arith.addf %285, %279 : vector<1x1xf32>
    %287 = vector.broadcast %286 : vector<1x1xf32> to vector<1x128xf32>
    %288 = arith.subf %277, %287 : vector<1x128xf32>
    %c4_112 = arith.constant 4 : index
    %c0_113 = arith.constant 0 : index
    %289 = vector.load %arg10[%c4_112, %c0_113] : memref<8x128xf32, #tpu.memory_space<vmem>>, vector<1x128xf32>
    tpu.vector_store %arg10[%c4_112, %c0_113], %288 {strides = array<i32>} : memref<8x128xf32, #tpu.memory_space<vmem>>, vector<1x128xf32>,
    %c5 = arith.constant 5 : index
    %290 = memref.load %arg1[%c5] : memref<8xi32, #tpu.memory_space<smem>>
    %291 = arith.index_cast %290 : i32 to index
    %c0_114 = arith.constant 0 : index
    %c0_115 = arith.constant 0 : index
    %292 = vector.load %arg2[%291, %c0_114, %c0_115] : memref<16x1x128xbf16, #tpu.memory_space<vmem>>, vector<1x1x128xbf16>
    %293 = vector.shape_cast %292 : vector<1x1x128xbf16> to vector<1x128xbf16>
    %c0_116 = arith.constant 0 : index
    %c0_117 = arith.constant 0 : index
    %294 = vector.load %arg4[%c0_116, %c0_117] : memref<128x384xbf16, #tpu.memory_space<vmem>>, vector<128x384xbf16>
    %cst_118 = arith.constant dense<0.000000e+00> : vector<1x384xf32>
    %295 = tpu.matmul %293, %294, %cst_118 {dimension_numbers = #tpu.dot_dimension_numbers<[1], [0], [0], [1], [0, 0, 1, 1], [], []>} : vector<1x128xbf16>, vector<128x384xbf16>, vector<1x384xf32> -> vector<1x384xf32>
    %296 = arith.addf %295, %6 : vector<1x384xf32>
    %c0_119 = arith.constant 0 : index
    %c0_120 = arith.constant 0 : index
    %297 = vector.load %arg12[%c0_119, %c0_120] : memref<128x384xf32, #tpu.memory_space<vmem>>, vector<128x384xf32>
    %cst_121 = arith.constant dense<0.000000e+00> : vector<1x384xf32>
    %298 = tpu.matmul %269, %297, %cst_121 {dimension_numbers = #tpu.dot_dimension_numbers<[1], [0], [0], [1], [0, 0, 1, 1], [], []>} : vector<1x128xf32>, vector<128x384xf32>, vector<1x384xf32> -> vector<1x384xf32>
    %299 = arith.addf %298, %7 : vector<1x384xf32>
    %300 = vector.extract_strided_slice %296 {offsets = [0, 0], sizes = [1, 128], strides = [1, 1]} : vector<1x384xf32> to vector<1x128xf32>
    %301 = vector.extract_strided_slice %299 {offsets = [0, 0], sizes = [1, 128], strides = [1, 1]} : vector<1x384xf32> to vector<1x128xf32>
    %302 = arith.addf %300, %301 : vector<1x128xf32>
    %303 = arith.negf %302 : vector<1x128xf32>
    %304 = math.exp %303 : vector<1x128xf32>
    %cst_122 = arith.constant 1.000000e+00 : f32
    %305 = vector.broadcast %cst_122 : f32 to vector<1x128xf32>
    %306 = arith.addf %305, %304 : vector<1x128xf32>
    %307 = arith.divf %305, %306 : vector<1x128xf32>
    %308 = vector.extract_strided_slice %296 {offsets = [0, 128], sizes = [1, 128], strides = [1, 1]} : vector<1x384xf32> to vector<1x128xf32>
    %309 = vector.extract_strided_slice %299 {offsets = [0, 128], sizes = [1, 128], strides = [1, 1]} : vector<1x384xf32> to vector<1x128xf32>
    %310 = arith.addf %308, %309 : vector<1x128xf32>
    %311 = arith.negf %310 : vector<1x128xf32>
    %312 = math.exp %311 : vector<1x128xf32>
    %cst_123 = arith.constant 1.000000e+00 : f32
    %313 = vector.broadcast %cst_123 : f32 to vector<1x128xf32>
    %314 = arith.addf %313, %312 : vector<1x128xf32>
    %315 = arith.divf %313, %314 : vector<1x128xf32>
    %316 = vector.extract_strided_slice %296 {offsets = [0, 256], sizes = [1, 128], strides = [1, 1]} : vector<1x384xf32> to vector<1x128xf32>
    %317 = vector.extract_strided_slice %299 {offsets = [0, 256], sizes = [1, 128], strides = [1, 1]} : vector<1x384xf32> to vector<1x128xf32>
    %318 = arith.mulf %307, %317 : vector<1x128xf32>
    %319 = arith.addf %316, %318 : vector<1x128xf32>
    %320 = math.tanh %319 : vector<1x128xf32>
    %cst_124 = arith.constant 1.000000e+00 : f32
    %321 = vector.broadcast %cst_124 : f32 to vector<1x128xf32>
    %322 = arith.subf %321, %315 : vector<1x128xf32>
    %323 = arith.mulf %322, %320 : vector<1x128xf32>
    %324 = arith.mulf %315, %269 : vector<1x128xf32>
    %325 = arith.addf %323, %324 : vector<1x128xf32>
    %c0_125 = arith.constant 0 : index
    %c0_126 = arith.constant 0 : index
    %326 = vector.load %arg13[%c0_125, %c0_126] : memref<128x128xf32, #tpu.memory_space<vmem>>, vector<128x128xf32>
    %cst_127 = arith.constant dense<0.000000e+00> : vector<1x128xf32>
    %327 = tpu.matmul %325, %326, %cst_127 {dimension_numbers = #tpu.dot_dimension_numbers<[1], [0], [0], [1], [0, 0, 1, 1], [], []>} : vector<1x128xf32>, vector<128x128xf32>, vector<1x128xf32> -> vector<1x128xf32>
    %328 = arith.addf %327, %8 : vector<1x128xf32>
    %329 = tpu.iota {dimensions = array<i32: 1>} : vector<1x128xi32>
    %c10_i32_128 = arith.constant 10 : i32
    %330 = vector.broadcast %c10_i32_128 : i32 to vector<1x128xi32>
    %331 = arith.cmpi slt, %329, %330 : vector<1x128xi32>
    %cst_129 = arith.constant -1.000000e+30 : f32
    %332 = vector.broadcast %cst_129 : f32 to vector<1x128xf32>
    %333 = arith.select %331, %328, %332 : vector<1x128xi1>, vector<1x128xf32>
    %cst_130 = arith.constant dense<0xFF800000> : vector<1xf32>
    %334 = vector.multi_reduction <maximumf>, %333, %cst_130 [1] : vector<1x128xf32> to vector<1xf32>
    %335 = vector.shape_cast %334 : vector<1xf32> to vector<1x1xf32>
    %336 = vector.broadcast %335 : vector<1x1xf32> to vector<1x128xf32>
    %337 = arith.subf %333, %336 : vector<1x128xf32>
    %338 = math.exp %337 : vector<1x128xf32>
    %cst_131 = arith.constant dense<0.000000e+00> : vector<1xf32>
    %339 = vector.multi_reduction <add>, %338, %cst_131 [1] : vector<1x128xf32> to vector<1xf32>
    %340 = vector.shape_cast %339 : vector<1xf32> to vector<1x1xf32>
    %341 = math.log %340 : vector<1x1xf32>
    %342 = arith.addf %341, %335 : vector<1x1xf32>
    %343 = vector.broadcast %342 : vector<1x1xf32> to vector<1x128xf32>
    %344 = arith.subf %333, %343 : vector<1x128xf32>
    %c5_132 = arith.constant 5 : index
    %c0_133 = arith.constant 0 : index
    %345 = vector.load %arg10[%c5_132, %c0_133] : memref<8x128xf32, #tpu.memory_space<vmem>>, vector<1x128xf32>
    tpu.vector_store %arg10[%c5_132, %c0_133], %344 {strides = array<i32>} : memref<8x128xf32, #tpu.memory_space<vmem>>, vector<1x128xf32>,
    %c6 = arith.constant 6 : index
    %346 = memref.load %arg1[%c6] : memref<8xi32, #tpu.memory_space<smem>>
    %347 = arith.index_cast %346 : i32 to index
    %c0_134 = arith.constant 0 : index
    %c0_135 = arith.constant 0 : index
    %348 = vector.load %arg2[%347, %c0_134, %c0_135] : memref<16x1x128xbf16, #tpu.memory_space<vmem>>, vector<1x1x128xbf16>
    %349 = vector.shape_cast %348 : vector<1x1x128xbf16> to vector<1x128xbf16>
    %c0_136 = arith.constant 0 : index
    %c0_137 = arith.constant 0 : index
    %350 = vector.load %arg4[%c0_136, %c0_137] : memref<128x384xbf16, #tpu.memory_space<vmem>>, vector<128x384xbf16>
    %cst_138 = arith.constant dense<0.000000e+00> : vector<1x384xf32>
    %351 = tpu.matmul %349, %350, %cst_138 {dimension_numbers = #tpu.dot_dimension_numbers<[1], [0], [0], [1], [0, 0, 1, 1], [], []>} : vector<1x128xbf16>, vector<128x384xbf16>, vector<1x384xf32> -> vector<1x384xf32>
    %352 = arith.addf %351, %6 : vector<1x384xf32>
    %c0_139 = arith.constant 0 : index
    %c0_140 = arith.constant 0 : index
    %353 = vector.load %arg12[%c0_139, %c0_140] : memref<128x384xf32, #tpu.memory_space<vmem>>, vector<128x384xf32>
    %cst_141 = arith.constant dense<0.000000e+00> : vector<1x384xf32>
    %354 = tpu.matmul %325, %353, %cst_141 {dimension_numbers = #tpu.dot_dimension_numbers<[1], [0], [0], [1], [0, 0, 1, 1], [], []>} : vector<1x128xf32>, vector<128x384xf32>, vector<1x384xf32> -> vector<1x384xf32>
    %355 = arith.addf %354, %7 : vector<1x384xf32>
    %356 = vector.extract_strided_slice %352 {offsets = [0, 0], sizes = [1, 128], strides = [1, 1]} : vector<1x384xf32> to vector<1x128xf32>
    %357 = vector.extract_strided_slice %355 {offsets = [0, 0], sizes = [1, 128], strides = [1, 1]} : vector<1x384xf32> to vector<1x128xf32>
    %358 = arith.addf %356, %357 : vector<1x128xf32>
    %359 = arith.negf %358 : vector<1x128xf32>
    %360 = math.exp %359 : vector<1x128xf32>
    %cst_142 = arith.constant 1.000000e+00 : f32
    %361 = vector.broadcast %cst_142 : f32 to vector<1x128xf32>
    %362 = arith.addf %361, %360 : vector<1x128xf32>
    %363 = arith.divf %361, %362 : vector<1x128xf32>
    %364 = vector.extract_strided_slice %352 {offsets = [0, 128], sizes = [1, 128], strides = [1, 1]} : vector<1x384xf32> to vector<1x128xf32>
    %365 = vector.extract_strided_slice %355 {offsets = [0, 128], sizes = [1, 128], strides = [1, 1]} : vector<1x384xf32> to vector<1x128xf32>
    %366 = arith.addf %364, %365 : vector<1x128xf32>
    %367 = arith.negf %366 : vector<1x128xf32>
    %368 = math.exp %367 : vector<1x128xf32>
    %cst_143 = arith.constant 1.000000e+00 : f32
    %369 = vector.broadcast %cst_143 : f32 to vector<1x128xf32>
    %370 = arith.addf %369, %368 : vector<1x128xf32>
    %371 = arith.divf %369, %370 : vector<1x128xf32>
    %372 = vector.extract_strided_slice %352 {offsets = [0, 256], sizes = [1, 128], strides = [1, 1]} : vector<1x384xf32> to vector<1x128xf32>
    %373 = vector.extract_strided_slice %355 {offsets = [0, 256], sizes = [1, 128], strides = [1, 1]} : vector<1x384xf32> to vector<1x128xf32>
    %374 = arith.mulf %363, %373 : vector<1x128xf32>
    %375 = arith.addf %372, %374 : vector<1x128xf32>
    %376 = math.tanh %375 : vector<1x128xf32>
    %cst_144 = arith.constant 1.000000e+00 : f32
    %377 = vector.broadcast %cst_144 : f32 to vector<1x128xf32>
    %378 = arith.subf %377, %371 : vector<1x128xf32>
    %379 = arith.mulf %378, %376 : vector<1x128xf32>
    %380 = arith.mulf %371, %325 : vector<1x128xf32>
    %381 = arith.addf %379, %380 : vector<1x128xf32>
    %c0_145 = arith.constant 0 : index
    %c0_146 = arith.constant 0 : index
    %382 = vector.load %arg13[%c0_145, %c0_146] : memref<128x128xf32, #tpu.memory_space<vmem>>, vector<128x128xf32>
    %cst_147 = arith.constant dense<0.000000e+00> : vector<1x128xf32>
    %383 = tpu.matmul %381, %382, %cst_147 {dimension_numbers = #tpu.dot_dimension_numbers<[1], [0], [0], [1], [0, 0, 1, 1], [], []>} : vector<1x128xf32>, vector<128x128xf32>, vector<1x128xf32> -> vector<1x128xf32>
    %384 = arith.addf %383, %8 : vector<1x128xf32>
    %385 = tpu.iota {dimensions = array<i32: 1>} : vector<1x128xi32>
    %c10_i32_148 = arith.constant 10 : i32
    %386 = vector.broadcast %c10_i32_148 : i32 to vector<1x128xi32>
    %387 = arith.cmpi slt, %385, %386 : vector<1x128xi32>
    %cst_149 = arith.constant -1.000000e+30 : f32
    %388 = vector.broadcast %cst_149 : f32 to vector<1x128xf32>
    %389 = arith.select %387, %384, %388 : vector<1x128xi1>, vector<1x128xf32>
    %cst_150 = arith.constant dense<0xFF800000> : vector<1xf32>
    %390 = vector.multi_reduction <maximumf>, %389, %cst_150 [1] : vector<1x128xf32> to vector<1xf32>
    %391 = vector.shape_cast %390 : vector<1xf32> to vector<1x1xf32>
    %392 = vector.broadcast %391 : vector<1x1xf32> to vector<1x128xf32>
    %393 = arith.subf %389, %392 : vector<1x128xf32>
    %394 = math.exp %393 : vector<1x128xf32>
    %cst_151 = arith.constant dense<0.000000e+00> : vector<1xf32>
    %395 = vector.multi_reduction <add>, %394, %cst_151 [1] : vector<1x128xf32> to vector<1xf32>
    %396 = vector.shape_cast %395 : vector<1xf32> to vector<1x1xf32>
    %397 = math.log %396 : vector<1x1xf32>
    %398 = arith.addf %397, %391 : vector<1x1xf32>
    %399 = vector.broadcast %398 : vector<1x1xf32> to vector<1x128xf32>
    %400 = arith.subf %389, %399 : vector<1x128xf32>
    %c6_152 = arith.constant 6 : index
    %c0_153 = arith.constant 0 : index
    %401 = vector.load %arg10[%c6_152, %c0_153] : memref<8x128xf32, #tpu.memory_space<vmem>>, vector<1x128xf32>
    tpu.vector_store %arg10[%c6_152, %c0_153], %400 {strides = array<i32>} : memref<8x128xf32, #tpu.memory_space<vmem>>, vector<1x128xf32>,
    %c7 = arith.constant 7 : index
    %402 = memref.load %arg1[%c7] : memref<8xi32, #tpu.memory_space<smem>>
    %403 = arith.index_cast %402 : i32 to index
    %c0_154 = arith.constant 0 : index
    %c0_155 = arith.constant 0 : index
    %404 = vector.load %arg2[%403, %c0_154, %c0_155] : memref<16x1x128xbf16, #tpu.memory_space<vmem>>, vector<1x1x128xbf16>
    %405 = vector.shape_cast %404 : vector<1x1x128xbf16> to vector<1x128xbf16>
    %c0_156 = arith.constant 0 : index
    %c0_157 = arith.constant 0 : index
    %406 = vector.load %arg4[%c0_156, %c0_157] : memref<128x384xbf16, #tpu.memory_space<vmem>>, vector<128x384xbf16>
    %cst_158 = arith.constant dense<0.000000e+00> : vector<1x384xf32>
    %407 = tpu.matmul %405, %406, %cst_158 {dimension_numbers = #tpu.dot_dimension_numbers<[1], [0], [0], [1], [0, 0, 1, 1], [], []>} : vector<1x128xbf16>, vector<128x384xbf16>, vector<1x384xf32> -> vector<1x384xf32>
    %408 = arith.addf %407, %6 : vector<1x384xf32>
    %c0_159 = arith.constant 0 : index
    %c0_160 = arith.constant 0 : index
    %409 = vector.load %arg12[%c0_159, %c0_160] : memref<128x384xf32, #tpu.memory_space<vmem>>, vector<128x384xf32>
    %cst_161 = arith.constant dense<0.000000e+00> : vector<1x384xf32>
    %410 = tpu.matmul %381, %409, %cst_161 {dimension_numbers = #tpu.dot_dimension_numbers<[1], [0], [0], [1], [0, 0, 1, 1], [], []>} : vector<1x128xf32>, vector<128x384xf32>, vector<1x384xf32> -> vector<1x384xf32>
    %411 = arith.addf %410, %7 : vector<1x384xf32>
    %412 = vector.extract_strided_slice %408 {offsets = [0, 0], sizes = [1, 128], strides = [1, 1]} : vector<1x384xf32> to vector<1x128xf32>
    %413 = vector.extract_strided_slice %411 {offsets = [0, 0], sizes = [1, 128], strides = [1, 1]} : vector<1x384xf32> to vector<1x128xf32>
    %414 = arith.addf %412, %413 : vector<1x128xf32>
    %415 = arith.negf %414 : vector<1x128xf32>
    %416 = math.exp %415 : vector<1x128xf32>
    %cst_162 = arith.constant 1.000000e+00 : f32
    %417 = vector.broadcast %cst_162 : f32 to vector<1x128xf32>
    %418 = arith.addf %417, %416 : vector<1x128xf32>
    %419 = arith.divf %417, %418 : vector<1x128xf32>
    %420 = vector.extract_strided_slice %408 {offsets = [0, 128], sizes = [1, 128], strides = [1, 1]} : vector<1x384xf32> to vector<1x128xf32>
    %421 = vector.extract_strided_slice %411 {offsets = [0, 128], sizes = [1, 128], strides = [1, 1]} : vector<1x384xf32> to vector<1x128xf32>
    %422 = arith.addf %420, %421 : vector<1x128xf32>
    %423 = arith.negf %422 : vector<1x128xf32>
    %424 = math.exp %423 : vector<1x128xf32>
    %cst_163 = arith.constant 1.000000e+00 : f32
    %425 = vector.broadcast %cst_163 : f32 to vector<1x128xf32>
    %426 = arith.addf %425, %424 : vector<1x128xf32>
    %427 = arith.divf %425, %426 : vector<1x128xf32>
    %428 = vector.extract_strided_slice %408 {offsets = [0, 256], sizes = [1, 128], strides = [1, 1]} : vector<1x384xf32> to vector<1x128xf32>
    %429 = vector.extract_strided_slice %411 {offsets = [0, 256], sizes = [1, 128], strides = [1, 1]} : vector<1x384xf32> to vector<1x128xf32>
    %430 = arith.mulf %419, %429 : vector<1x128xf32>
    %431 = arith.addf %428, %430 : vector<1x128xf32>
    %432 = math.tanh %431 : vector<1x128xf32>
    %cst_164 = arith.constant 1.000000e+00 : f32
    %433 = vector.broadcast %cst_164 : f32 to vector<1x128xf32>
    %434 = arith.subf %433, %427 : vector<1x128xf32>
    %435 = arith.mulf %434, %432 : vector<1x128xf32>
    %436 = arith.mulf %427, %381 : vector<1x128xf32>
    %437 = arith.addf %435, %436 : vector<1x128xf32>
    %c0_165 = arith.constant 0 : index
    %c0_166 = arith.constant 0 : index
    %438 = vector.load %arg13[%c0_165, %c0_166] : memref<128x128xf32, #tpu.memory_space<vmem>>, vector<128x128xf32>
    %cst_167 = arith.constant dense<0.000000e+00> : vector<1x128xf32>
    %439 = tpu.matmul %437, %438, %cst_167 {dimension_numbers = #tpu.dot_dimension_numbers<[1], [0], [0], [1], [0, 0, 1, 1], [], []>} : vector<1x128xf32>, vector<128x128xf32>, vector<1x128xf32> -> vector<1x128xf32>
    %440 = arith.addf %439, %8 : vector<1x128xf32>
    %441 = tpu.iota {dimensions = array<i32: 1>} : vector<1x128xi32>
    %c10_i32_168 = arith.constant 10 : i32
    %442 = vector.broadcast %c10_i32_168 : i32 to vector<1x128xi32>
    %443 = arith.cmpi slt, %441, %442 : vector<1x128xi32>
    %cst_169 = arith.constant -1.000000e+30 : f32
    %444 = vector.broadcast %cst_169 : f32 to vector<1x128xf32>
    %445 = arith.select %443, %440, %444 : vector<1x128xi1>, vector<1x128xf32>
    %cst_170 = arith.constant dense<0xFF800000> : vector<1xf32>
    %446 = vector.multi_reduction <maximumf>, %445, %cst_170 [1] : vector<1x128xf32> to vector<1xf32>
    %447 = vector.shape_cast %446 : vector<1xf32> to vector<1x1xf32>
    %448 = vector.broadcast %447 : vector<1x1xf32> to vector<1x128xf32>
    %449 = arith.subf %445, %448 : vector<1x128xf32>
    %450 = math.exp %449 : vector<1x128xf32>
    %cst_171 = arith.constant dense<0.000000e+00> : vector<1xf32>
    %451 = vector.multi_reduction <add>, %450, %cst_171 [1] : vector<1x128xf32> to vector<1xf32>
    %452 = vector.shape_cast %451 : vector<1xf32> to vector<1x1xf32>
    %453 = math.log %452 : vector<1x1xf32>
    %454 = arith.addf %453, %447 : vector<1x1xf32>
    %455 = vector.broadcast %454 : vector<1x1xf32> to vector<1x128xf32>
    %456 = arith.subf %445, %455 : vector<1x128xf32>
    %c7_172 = arith.constant 7 : index
    %c0_173 = arith.constant 0 : index
    %457 = vector.load %arg10[%c7_172, %c0_173] : memref<8x128xf32, #tpu.memory_space<vmem>>, vector<1x128xf32>
    tpu.vector_store %arg10[%c7_172, %c0_173], %456 {strides = array<i32>} : memref<8x128xf32, #tpu.memory_space<vmem>>, vector<1x128xf32>,
    %c0_174 = arith.constant 0 : index
    %c0_175 = arith.constant 0 : index
    %458 = vector.load %arg11[%c0_174, %c0_175] : memref<1x128xf32, #tpu.memory_space<vmem>>, vector<1x128xf32>
    tpu.vector_store %arg11[%c0_174, %c0_175], %437 {strides = array<i32>} : memref<1x128xf32, #tpu.memory_space<vmem>>, vector<1x128xf32>,
    return
  }
  func.func @transform_0(%arg0: i32, %arg1: memref<8xi32, #tpu.memory_space<smem>>) -> (i32, i32, i32) {
    %c0_i32 = arith.constant 0 : i32
    %c0_i32_0 = arith.constant 0 : i32
    %c0_i32_1 = arith.constant 0 : i32
    %c0_i32_2 = arith.constant 0 : i32
    return %c0_i32, %c0_i32_0, %c0_i32_1 : i32, i32, i32
  }
  func.func @transform_1(%arg0: i32, %arg1: memref<8xi32, #tpu.memory_space<smem>>) -> (i32, i32) {
    %c0_i32 = arith.constant 0 : i32
    %c0_i32_0 = arith.constant 0 : i32
    %c0_i32_1 = arith.constant 0 : i32
    return %c0_i32, %c0_i32_0 : i32, i32
  }
  func.func @transform_2(%arg0: i32, %arg1: memref<8xi32, #tpu.memory_space<smem>>) -> (i32, i32) {
    %c0_i32 = arith.constant 0 : i32
    %c0_i32_0 = arith.constant 0 : i32
    %c0_i32_1 = arith.constant 0 : i32
    return %c0_i32, %c0_i32_0 : i32, i32
  }
  func.func @transform_3(%arg0: i32, %arg1: memref<8xi32, #tpu.memory_space<smem>>) -> (i32, i32) {
    %c0_i32 = arith.constant 0 : i32
    %c0_i32_0 = arith.constant 0 : i32
    %c0_i32_1 = arith.constant 0 : i32
    return %c0_i32, %c0_i32_0 : i32, i32
  }
  func.func @transform_4(%arg0: i32, %arg1: memref<8xi32, #tpu.memory_space<smem>>) -> (i32, i32) {
    %c0_i32 = arith.constant 0 : i32
    %c0_i32_0 = arith.constant 0 : i32
    %c0_i32_1 = arith.constant 0 : i32
    return %c0_i32, %c0_i32_0 : i32, i32
  }
  func.func @transform_5(%arg0: i32, %arg1: memref<8xi32, #tpu.memory_space<smem>>) -> (i32, i32) {
    %c0_i32 = arith.constant 0 : i32
    %c0_i32_0 = arith.constant 0 : i32
    %c0_i32_1 = arith.constant 0 : i32
    return %c0_i32, %c0_i32_0 : i32, i32
  }
  func.func @transform_6(%arg0: i32, %arg1: memref<8xi32, #tpu.memory_space<smem>>) -> (i32, i32) {
    %c0_i32 = arith.constant 0 : i32
    %c0_i32_0 = arith.constant 0 : i32
    %c0_i32_1 = arith.constant 0 : i32
    return %c0_i32, %c0_i32_0 : i32, i32
  }
  func.func @transform_7(%arg0: i32, %arg1: memref<8xi32, #tpu.memory_space<smem>>) -> (i32, i32) {
    %c0_i32 = arith.constant 0 : i32
    %c0_i32_0 = arith.constant 0 : i32
    %c0_i32_1 = arith.constant 0 : i32
    return %c0_i32, %c0_i32_0 : i32, i32
  }
  func.func @transform_8(%arg0: i32, %arg1: memref<8xi32, #tpu.memory_space<smem>>) -> (i32, i32) {
    %c0_i32 = arith.constant 0 : i32
    %c0_i32_0 = arith.constant 0 : i32
    %c0_i32_1 = arith.constant 0 : i32
    return %c0_i32, %c0_i32_0 : i32, i32
  }
  func.func @transform_9(%arg0: i32, %arg1: memref<8xi32, #tpu.memory_space<smem>>) -> (i32, i32) {
    %c0_i32 = arith.constant 0 : i32
    %c0_i32_0 = arith.constant 0 : i32
    %c0_i32_1 = arith.constant 0 : i32
    return %c0_i32, %c0_i32_0 : i32, i32
  }
}

</mosaic_0001>

<bundles_post_ra>
// kernel: tpu_custom_call.1
= control target key start
LH: loop header
LB: loop body
LE: loop exit
PB: predicated region body
PF: predicated region fallthrough
CT: control target
= control target key end

     0   :  { %s8680_s0 = inlined_call_operand.vmem [shape: s32[8], index: 0, kind: input, shape index: {}]   ;;  %s8681_s1 = inlined_call_operand.vmem [shape: bf16[16,1,128], index: 1, kind: input, shape index: {}]   ;;  %s8682_s2 = inlined_call_operand.vmem [shape: f32[1,128], index: 2, kind: input, shape index: {}]   ;;  %s8683_s3 = inlined_call_operand.hbm [shape: bf16[128,384], index: 3, kind: input, shape index: {}]   ;;  %s8684_s4 = inlined_call_operand.hbm [shape: bf16[128,384], index: 4, kind: input, shape index: {}]   ;;  %s8685_s5 = inlined_call_operand.vmem [shape: f32[1,384], index: 5, kind: input, shape index: {}]   ;;  %s8686_s6 = inlined_call_operand.vmem [shape: f32[1,384], index: 6, kind: input, shape index: {}]   ;;  %s8687_s7 = inlined_call_operand.hbm [shape: bf16[128,128], index: 7, kind: input, shape index: {}]   ;;  %s8688_s8 = inlined_call_operand.vmem [shape: f32[1,128], index: 8, kind: input, shape index: {}]   ;;  %s8689_s9 = inlined_call_operand.hbm [shape: f32[8,128], index: 9, kind: output, shape index: {0}]   ;;  %s8690_s10 = inlined_call_operand.hbm [shape: f32[1,128], index: 10, kind: output, shape index: {1}]  }
   0x1   :  { %s16_s15 = sshll.u32 %s8680_s0, 4  ;;  %s17_s15 = int_to_ptr.vmem [resolvable:$true] %s16_s15 }
   0x2   :  { %s7276_s16 = scalar_lea.vmem %s17_s15, 16  ;;  %p7281_p1 = scmp.lt.s32.totalorder %s17_s15, %s17_s15 }
   0x3   :  { %p7277_p0 = scmp.ne.s32.totalorder %s17_s15, %s7276_s16  ;;  %p7282_p2 = scmp.lt.s32.totalorder %s7276_s16, %s7276_s16 }
   0x5   :  { %p7283_p3 = por %p7282_p2, %p7281_p1 }
   0x7   :  { %p7284_p4 = pnand %p7283_p3, %p7277_p0 }
   0x9   :  { %7287 = shalt.err (!%p7284_p4)  }
   0xa   :  { %s7408_s17 = smov [#allocation5]  }
   0xb   :  { %19 = dma.vmem_to_smem %s17_s15, 16, %s7408_s17, [#allocation4] }
   0xc   :  { %7398 = dma.done.wait [#allocation4], 16 }
   0xd   :  { %7399 = vsyncadd [#allocation4], 4294967280 }
   0xe   :  { %21 = sfence }
   0xf   :  { %22 = vsyncpa [#allocation7], 0 }
  0x10   :  { %23 = vsyncpa [#allocation10], 0 }
  0x11   :  { %24 = vsyncpa [#allocation8], 0 }
  0x12   :  { %25 = vsyncpa [#allocation14], 0  ;;  %s7409_s18 = smov [#allocation9]   ;;  %s7410_s0 = smov [#allocation6]  }
  0x13   :  { %s47_s19 = sshll.u32 %s7409_s18, 4  ;;  %s35_s20 = sshll.u32 %s7410_s0, 4  ;;  %s48_s19 = int_to_ptr.vmem [resolvable:$true] %s47_s19  ;;  %s7480_s20 = int_to_ptr.vmem [resolvable:$true] %s35_s20 }
  0x14   :  { %s7288_s23 = scalar_lea.hbm %s8684_s4, 3072 }
  0x15   :  { %p7289_p5 = scmp.ne.s32.totalorder %s8684_s4, %s7288_s23  ;;  %p7292_p6 = scmp.lt.u32.totalorder %s7288_s23, %s8684_s4 }
  0x17   :  { %p7294_p7 = pnand %p7292_p6, %p7289_p5 }
  0x19   :  { %7297 = shalt.err (!%p7294_p7)
}
  0x1a   :  { %s7298_s28 = scalar_lea.vmem %s48_s19, 3072  ;;  %p7303_p9 = scmp.lt.s32.totalorder %s48_s19, %s48_s19 }
  0x1b   :  { %p7299_p8 = scmp.ne.s32.totalorder %s48_s19, %s7298_s28  ;;  %p7304_p10 = scmp.lt.s32.totalorder %s7298_s28, %s7298_s28 }
  0x1d   :  { %p7305_p11 = por %p7304_p10, %p7303_p9 }
  0x1f   :  { %p7306_p12 = pnand %p7305_p11, %p7299_p8 }
  0x21   :  { %7309 = shalt.err (!%p7306_p12)
}
  0x22   :  { %s7411_s29 = smov 192   ;;  %s7412_s30 = smov 12  }
  0x23   :  { %53 = dma.hbm_to_vmem [thread:$0]  %s8684_s4, 3072, %s48_s19, [#allocation10], %s7411_s29, %s7411_s29, %s7412_s30  }
  0x24   :  { %s7310_s15 = scalar_lea.hbm %s8683_s3, 3072 }
  0x25   :  { %p7311_p13 = scmp.ne.s32.totalorder %s8683_s3, %s7310_s15  ;;  %p7314_p0 = scmp.lt.u32.totalorder %s7310_s15, %s8683_s3 }
  0x27   :  { %p7316_p1 = pnand %p7314_p0, %p7311_p13 }
  0x29   :  { %7319 = shalt.err (!%p7316_p1)
}
  0x2a   :  { %s7320_s21 = scalar_lea.vmem %s7480_s20, 3072  ;;  %p7325_p3 = scmp.lt.s32.totalorder %s7480_s20, %s7480_s20 }
  0x2b   :  { %p7321_p2 = scmp.ne.s32.totalorder %s7480_s20, %s7320_s21  ;;  %p7326_p4 = scmp.lt.s32.totalorder %s7320_s21, %s7320_s21 }
  0x2d   :  { %p7327_p5 = por %p7326_p4, %p7325_p3 }
  0x2f   :  { %p7328_p6 = pnand %p7327_p5, %p7321_p2 }
  0x31   :  { %7331 = shalt.err (!%p7328_p6)
}
  0x32   :  { %41 = dma.hbm_to_vmem [thread:$0]  %s8683_s3, 3072, %s7480_s20, [#allocation7], %s7411_s29, %s7411_s29, %s7412_s30  }
  0x33   :  { %s7413_s22 = smov [#allocation11]   ;;  %s7332_s26 = scalar_lea.hbm %s8687_s7, 1024 }
  0x34   :  { %s63_s23 = sshll.u32 %s7413_s22, 4  ;;  %p7333_p7 = scmp.ne.s32.totalorder %s8687_s7, %s7332_s26  ;;  %s64_s23 = int_to_ptr.vmem [resolvable:$true] %s63_s23 }
  0x35   :  { %p7336_p8 = scmp.lt.u32.totalorder %s7332_s26, %s8687_s7 }
  0x37   :  { %p7338_p9 = pnand %p7336_p8, %p7333_p7 }
  0x39   :  { %7341 = shalt.err (!%p7338_p9)
}
  0x3a   :  { %s7342_s13 = scalar_lea.vmem %s64_s23, 1024  ;;  %p7347_p11 = scmp.lt.s32.totalorder %s64_s23, %s64_s23 }
  0x3b   :  { %p7343_p10 = scmp.ne.s32.totalorder %s64_s23, %s7342_s13  ;;  %p7348_p12 = scmp.lt.s32.totalorder %s7342_s13, %s7342_s13 }
  0x3d   :  { %p7349_p13 = por %p7348_p12, %p7347_p11 }
  0x3f   :  { %p7350_p0 = pnand %p7349_p13, %p7343_p10 }
  0x41   :  { %7353 = shalt.err (!%p7350_p0)
}
  0x42   :  { %s7414_s3 = smov 64   ;;  %s7415_s20 = smov 4  }
  0x43   :  { %69 = dma.hbm_to_vmem [thread:$0]  %s8687_s7, 1024, %s64_s23, [#allocation10], %s7414_s3, %s7414_s3, %s7415_s20  }
  0x44   :  { %7400 = dma.done.wait [#allocation7], 3072  }
  0x45   :  { %7401 = vsyncadd [#allocation7], 4294964224 }
  0x46   :  { %7402 = dma.done.wait [#allocation10], 4096  }
  0x47   :  { %7403 = vsyncadd [#allocation10], 4294963200  ;;  %v8695_v0 = vmov 0.0   ;;  %v8691_v1 = vmov 0   ;;  %vm7418_vm0 = vmmov 0   ;;  %s262_s7 = sld [smem:[#allocation5]] }
  0x48   :  { %5375 = vmatprep.subr.bf16.mxu1 %v8695_v0  ;;  %473 = vmatprep.mubr.bf16.mxu0 %v8691_v1  ;;  %v7527_v2 = vld [vmem:[#allocation6 + $0x4] ss:$12 sps:$4 sm:$0xff]   ;;  %v7529_v3 = vld [vmem:[#allocation6] ss:$12 sps:$4 sm:$0xff]   ;;  %v7532_v4 = vld [vmem:[#allocation6 + $0x1c] ss:$12 sps:$4 sm:$0xff]  }
  0x49   :  { %5391 = vmatprep.mubr.msk.bf16.mxu1 %vm7418_vm0, %v8695_v0  ;;  %441 = vmatprep.subr.bf16.mxu0 %v7527_v2  ;;  %v7535_v5 = vld [vmem:[#allocation6 + $0x18] ss:$12 sps:$4 sm:$0xff]   ;;  %v7538_v6 = vld [vmem:[#allocation6 + $0x34] ss:$12 sps:$4 sm:$0xff]   ;;  %v7541_v7 = vld [vmem:[#allocation6 + $0x30] ss:$12 sps:$4 sm:$0xff]  }
  0x4a   :  { %442 = vmatpush1.bf16.msra.mxu0 %v7529_v3  ;;  %v7544_v8 = vld [vmem:[#allocation6 + $0x4c] ss:$12 sps:$4 sm:$0xff]   ;;  %v6962_v9 = vld [vmem:[#allocation6 + $0x8] ss:$12 sps:$4 sm:$0xff]   ;;  %v7550_v11 = vld [vmem:[#allocation6 + $0x64] ss:$12 sps:$4 sm:$0xff]  }
  0x4b   :  { %443 = vmatprep.subr.bf16.mxu0 %v7532_v4  ;;  %v7547_v10 = vld [vmem:[#allocation6 + $0x48] ss:$12 sps:$4 sm:$0xff]   ;;  %5376 = vmatpush3.bf16.msra.mxu1 %v6962_v9  ;;  %v6966_v12 = vld [vmem:[#allocation6 + $0x20] ss:$12 sps:$4 sm:$0xff]   ;;  %v6970_v15 = vld [vmem:[#allocation6 + $0x38] ss:$12 sps:$4 sm:$0xff]  }
  0x4c   :  { %5377 = vmatprep.subr.bf16.mxu1 %v8695_v0  ;;  %v7554_v13 = vld [vmem:[#allocation6 + $0x60] ss:$12 sps:$4 sm:$0xff]   ;;  %v7557_v14 = vld [vmem:[#allocation6 + $0x7c] ss:$12 sps:$4 sm:$0xff]   ;;  %v7560_v16 = vld [vmem:[#allocation6 + $0x78] ss:$12 sps:$4 sm:$0xff]  }
  0x4d   :  { %v7563_v17 = vld [vmem:[#allocation6 + $0x94] ss:$12 sps:$4 sm:$0xff]   ;;  %v6974_v18 = vld [vmem:[#allocation6 + $0x50] ss:$12 sps:$4 sm:$0xff]   ;;  %v7570_v20 = vld [vmem:[#allocation6 + $0xac] ss:$12 sps:$4 sm:$0xff]   ;;  %s263_s16 = scalar_lea.vmem %s8681_s1, %s262_s7 }
  0x4e   :  { %444 = vmatpush1.bf16.msra.mxu0 %v7535_v5  ;;  %v7568_v19 = vld [vmem:[#allocation6 + $0x90] ss:$12 sps:$4 sm:$0xff]   ;;  %v6978_v21 = vld [vmem:[#allocation6 + $0x68] ss:$12 sps:$4 sm:$0xff]   ;;  %v6982_v24 = vld [vmem:[#allocation6 + $0x80] ss:$12 sps:$4 sm:$0xff]  }
  0x4f   :  { %445 = vmatprep.subr.bf16.mxu0 %v7538_v6  ;;  %5378 = vmatpush3.bf16.msra.mxu1 %v6966_v12  ;;  %v7574_v22 = vld [vmem:[#allocation6 + $0xa8] ss:$12 sps:$4 sm:$0xff]   ;;  %v7580_v23 = vld [vmem:[#allocation9 + $0x4] ss:$12 sps:$4 sm:$0xff]   ;;  %v264_v25 = vld [vmem:[%s263_s16] sm:$0x1] }
  0x50   :  { %5379 = vmatprep.subr.bf16.mxu1 %v8695_v0  ;;  %v7584_v26 = vld [vmem:[#allocation9] ss:$12 sps:$4 sm:$0xff]   ;;  %v7587_v27 = vld [vmem:[#allocation9 + $0x1c] ss:$12 sps:$4 sm:$0xff]   ;;  %v6986_v28 = vld [vmem:[#allocation6 + $0x98] ss:$12 sps:$4 sm:$0xff]  }
  0x51   :  { %v7591_v29 = vld [vmem:[#allocation9 + $0x18] ss:$12 sps:$4 sm:$0xff]   ;;  %v7594_v30 = vld [vmem:[#allocation9 + $0x34] ss:$12 sps:$4 sm:$0xff]   ;;  %v6990_v31 = vld [vmem:[#allocation6 + $0xb0] ss:$12 sps:$4 sm:$0xff]  }
  0x52   :  { %446 = vmatpush1.bf16.msra.mxu0 %v7541_v7  ;;  %v7598_v32 = vld [vmem:[#allocation9 + $0x30] ss:$12 sps:$4 sm:$0xff]   ;;  %v7601_v33 = vld [vmem:[#allocation9 + $0x4c] ss:$12 sps:$4 sm:$0xff]   ;;  %v7603_v34 = vld [vmem:[#allocation9 + $0x8] ss:$12 sps:$4 sm:$0xff]  }
  0x53   :  { %447 = vmatprep.subr.bf16.mxu0 %v7544_v8  ;;  %5380 = vmatpush3.bf16.msra.mxu1 %v6970_v15  ;;  %8741 = vst [vmem:[#allocation20_spill] sm:$0xff] %v7601_v33  ;;  %v7607_v35 = vld [vmem:[#allocation9 + $0x48] ss:$12 sps:$4 sm:$0xff]   ;;  %v8693_v36 = vmov 0.0|0.0   ;;  %v7610_v37 = vld [vmem:[#allocation9 + $0x64] ss:$12 sps:$4 sm:$0xff]  }
  0x54   :  { %5381 = vmatprep.subr.bf16.mxu1 %v8695_v0  ;;  %8742 = vst [vmem:[#allocation21_spill] sm:$0xff] %v7607_v35  ;;  %8743 = vst [vmem:[#allocation22_spill] sm:$0xff] %v7610_v37  ;;  %v7612_v38 = vld [vmem:[#allocation9 + $0x20] ss:$12 sps:$4 sm:$0xff]   ;;  %v7622_v40 = vld [vmem:[#allocation9 + $0x7c] ss:$12 sps:$4 sm:$0xff]  }
  0x55   :  { %v7617_v39 = vld [vmem:[#allocation9 + $0x60] ss:$12 sps:$4 sm:$0xff]   ;;  %8745 = vst [vmem:[#allocation24_spill] sm:$0xff] %v7622_v40  ;;  %v7624_v41 = vld [vmem:[#allocation9 + $0x38] ss:$12 sps:$4 sm:$0xff]   ;;  %v7713_v56 = vld [vmem:[#allocation11 + $0x10] sm:$0xff]  }
  0x56   :  { %448 = vmatpush1.bf16.msra.mxu0 %v7547_v10  ;;  %8744 = vst [vmem:[#allocation23_spill] sm:$0xff] %v7617_v39  ;;  %v7629_v42 = vld [vmem:[#allocation9 + $0x78] ss:$12 sps:$4 sm:$0xff]   ;;  %v7632_v43 = vld [vmem:[#allocation9 + $0x94] ss:$12 sps:$4 sm:$0xff]   ;;  %v7708_v55 = vld [vmem:[#allocation11 + $0x8] sm:$0xff]  }
  0x57   :  { %449 = vmatprep.subr.bf16.mxu0 %v7550_v11  ;;  %5382 = vmatpush3.bf16.msra.mxu1 %v6974_v18  ;;  %8746 = vst [vmem:[#allocation25_spill] sm:$0xff] %v7629_v42  ;;  %8747 = vst [vmem:[#allocation26_spill] sm:$0xff] %v7632_v43  ;;  %v7634_v44 = vld [vmem:[#allocation9 + $0x50] ss:$12 sps:$4 sm:$0xff]   ;;  %v7642_v46 = vld [vmem:[#allocation9 + $0xac] ss:$12 sps:$4 sm:$0xff]  }
  0x58   :  { %5383 = vmatprep.subr.bf16.mxu1 %v8695_v0  ;;  %v7639_v45 = vld [vmem:[#allocation9 + $0x90] ss:$12 sps:$4 sm:$0xff]   ;;  %8749 = vst [vmem:[#allocation28_spill] sm:$0xff] %v7642_v46  ;;  %v7644_v47 = vld [vmem:[#allocation9 + $0x68] ss:$12 sps:$4 sm:$0xff]   ;;  %v7696_v53 = vld [vmem:[#allocation11] sm:$0xff]  }
  0x59   :  { %8748 = vst [vmem:[#allocation27_spill] sm:$0xff] %v7639_v45  ;;  %v7649_v48 = vld [vmem:[#allocation9 + $0xa8] ss:$12 sps:$4 sm:$0xff]   ;;  %v7652_v49 = vld [vmem:[#allocation9 + $0x80] ss:$12 sps:$4 sm:$0xff]   ;;  %v7720_v57 = vld [vmem:[#allocation11 + $0x18] sm:$0xff]  }
  0x5a   :  { %450 = vmatpush1.bf16.msra.mxu0 %v7554_v13  ;;  %8750 = vst [vmem:[#allocation29_spill] sm:$0xff] %v7649_v48  ;;  %v7660_v50 = vld [vmem:[%s8682_s2] sm:$0x1]  ;;  %v7663_v51 = vld [vmem:[#allocation9 + $0x98] ss:$12 sps:$4 sm:$0xff]   ;;  %s4803_s2 = sld [smem:[#allocation5 + $0x1]] }
  0x5b   :  { %451 = vmatprep.subr.bf16.mxu0 %v7557_v14  ;;  %5384 = vmatpush3.bf16.msra.mxu1 %v6978_v21  ;;  %v7670_v52 = vld [vmem:[#allocation9 + $0xb0] ss:$12 sps:$4 sm:$0xff]   ;;  %v7726_v58 = vld [vmem:[#allocation11 + $0x20] sm:$0xff]   ;;  %v7731_v59 = vld [vmem:[#allocation11 + $0x28] sm:$0xff]   ;;  %vm838_vm2 = vcmask 1040384   ;;  %s4857_s11 = sld [smem:[#allocation5 + $0x3]] }
  0x5c   :  { %5385 = vmatprep.subr.bf16.mxu1 %v8695_v0  ;;  %v7737_v60 = vld [vmem:[#allocation11 + $0x30] sm:$0xff]   ;;  %v7743_v61 = vld [vmem:[#allocation11 + $0x38] sm:$0xff]   ;;  %s4884_s20 = sld [smem:[#allocation5 + $0x4]]  ;;  %s4911_s14 = sld [smem:[#allocation5 + $0x5]] }
  0x5d   :  { %s4938_s18 = sld [smem:[#allocation5 + $0x6]] }
  0x5e   :  { %452 = vmatpush1.bf16.msra.mxu0 %v7560_v16 }
  0x5f   :  { %453 = vmatprep.subr.bf16.mxu0 %v7563_v17  ;;  %5386 = vmatpush3.bf16.msra.mxu1 %v6982_v24  ;;  %v8697_v24 = vlaneseq }
  0x60   :  { %5387 = vmatprep.subr.bf16.mxu1 %v8695_v0  ;;  %s854_s4 = scalar_lea.vmem %s8681_s1, %s4803_s2 }
  0x61   :  { %v7702_v54 = vld [vmem:[%s854_s4] sm:$0x1]  ;;  %s1964_s3 = scalar_lea.vmem %s8681_s1, %s4857_s11 }
  0x62   :  { %454 = vmatpush1.bf16.msra.mxu0 %v7568_v19  ;;  %s2519_s7 = scalar_lea.vmem %s8681_s1, %s4884_s20  ;;  %s3074_s17 = scalar_lea.vmem %s8681_s1, %s4911_s14 }
  0x63   :  { %455 = vmatprep.subr.bf16.mxu0 %v7570_v20  ;;  %5388 = vmatpush3.bf16.msra.mxu1 %v6986_v28  ;;  %s3629_s21 = scalar_lea.vmem %s8681_s1, %s4938_s18 }
  0x64   :  { %5389 = vmatprep.subr.bf16.mxu1 %v8695_v0 }
  0x66   :  { %456 = vmatpush1.bf16.msra.mxu0 %v7574_v22 }
  0x67   :  { %6096 = vmatprep.subr.bf16.mxu0 %v7580_v23  ;;  %5390 = vmatpush3.bf16.msra.mxu1 %v6990_v31  ;;  %v258_v31 = vld [vmem:[%s8685_s5] sm:$0x7]  ;;  %s4830_s5 = sld [smem:[#allocation5 + $0x2]] }
  0x68   :  { %6127 = vmatprep.subr.bf16.mxu1 %v8693_v36 }
  0x69   :  { %474 = vmatmul.mubr.bf16.vlgmr.msra.gmra.mrb[0].mxu0 %v264_v25 }
  0x6a   :  { %6098 = vmatpush1.bf16.msra.mxu0 %v7584_v26  ;;  %650 = vmatprep.mubr.f32.mxu0 %v8695_v0 }
  0x6b   :  { %6100 = vmatprep.subr.bf16.mxu0 %v7587_v27  ;;  %5392 = vmatmul.mubr.bf16.vlgmr.msra.gmra.mrb[0].mxu1 %v264_v25  ;;  %v427_v25 = vshrl.u32 %v8697_v24, 7 }
  0x6c   :  { %6129 = vmatpush3.bf16.msra.mxu1 %v7603_v34  ;;  %5427 = vmatprep.mubr.msk.f32.mxu1 %vm7418_vm0, %v8695_v0 }
  0x6d   :  { %6130 = vmatprep.subr.bf16.mxu1 %v8693_v36  ;;  %v428_v28 = vsub.s32 0, %v427_v25  ;;  %s1409_s26 = scalar_lea.vmem %s8681_s1, %s4830_s5 }
  0x6e   :  { %6102 = vmatpush1.bf16.msra.mxu0 %v7591_v29 }
  0x6f   :  { %6104 = vmatprep.subr.bf16.mxu0 %v7594_v30 }
  0x70   :  { %6132 = vmatpush3.bf16.msra.mxu1 %v7612_v38 }
  0x71   :  { %6133 = vmatprep.subr.bf16.mxu1 %v8693_v36 }
  0x72   :  { %6106 = vmatpush1.bf16.msra.mxu0 %v7598_v32 }
  0x73   :  { %6108 = vmatprep.subr.bf16.mxu0 %v7601_v33 }
  0x74   :  { %6135 = vmatpush3.bf16.msra.mxu1 %v7624_v41 }
  0x75   :  { %6136 = vmatprep.subr.bf16.mxu1 %v8693_v36 }
  0x76   :  { %6110 = vmatpush1.bf16.msra.mxu0 %v7607_v35 }
  0x77   :  { %6112 = vmatprep.subr.bf16.mxu0 %v7610_v37 }
  0x78   :  { %6138 = vmatpush3.bf16.msra.mxu1 %v7634_v44 }
  0x79   :  { %6139 = vmatprep.subr.bf16.mxu1 %v8693_v36 }
  0x7a   :  { %6114 = vmatpush1.bf16.msra.mxu0 %v7617_v39 }
  0x7b   :  { %6116 = vmatprep.subr.bf16.mxu0 %v7622_v40 }
  0x7c   :  { %6141 = vmatpush3.bf16.msra.mxu1 %v7644_v47 }
  0x7d   :  { %6142 = vmatprep.subr.bf16.mxu1 %v8693_v36 }
  0x7e   :  { %6118 = vmatpush1.bf16.msra.mxu0 %v7629_v42 }
  0x7f   :  { %6120 = vmatprep.subr.bf16.mxu0 %v7632_v43 }
  0x80   :  { %6144 = vmatpush3.bf16.msra.mxu1 %v7652_v49 }
  0x81   :  { %6145 = vmatprep.subr.bf16.mxu1 %v8693_v36 }
  0x82   :  { %6122 = vmatpush1.bf16.msra.mxu0 %v7639_v45 }
  0x83   :  { %6124 = vmatprep.subr.bf16.mxu0 %v7642_v46 }
  0x84   :  { %6147 = vmatpush3.bf16.msra.mxu1 %v7663_v51 }
  0x85   :  { %6148 = vmatprep.subr.bf16.mxu1 %v8693_v36 }
  0x86   :  { %6126 = vmatpush1.bf16.msra.mxu0 %v7649_v48 }
  0x87   :  { %6151 = vmatprep.subr.bf16.mxu0 %v8693_v36 }
  0x88   :  { %6150 = vmatpush3.bf16.msra.mxu1 %v7670_v52 }
  0x89   :  { %651 = vmatmul.mubr.f32.vlgmr.msra.gmra.mrb[4].mxu0 %v7660_v50  ;;  %1016 = vmatprep.subr.bf16.mxu1 %v7527_v2 }
  0x8a   :  { %5462 = vmatprep.mubr.msk.f32.mxu0 %vm7418_vm0, %v8695_v0  ;;  %6153 = vmatpush3.bf16.msra.mxu0 %v7696_v53 }
  0x8b   :  { %5428 = vmatmul.mubr.f32.vlgmr.msra.gmra.mrb[4].mxu1 %v7660_v50  ;;  %6154 = vmatprep.subr.bf16.mxu0 %v8693_v36 }
  0x8c   :  { %1017 = vmatpush1.bf16.msra.mxu1 %v7529_v3  ;;  %1048 = vmatprep.mubr.bf16.mxu1 %v8691_v1  ;;  %v432_v1 = vsub.s32 1, %v427_v25 }
  0x8d   :  { %1018 = vmatprep.subr.bf16.mxu1 %v7532_v4 }
  0x8e   :  { %6156 = vmatpush3.bf16.msra.mxu0 %v7708_v55 }
  0x8f   :  { %6157 = vmatprep.subr.bf16.mxu0 %v8693_v36 }
  0x90   :  { %1019 = vmatpush1.bf16.msra.mxu1 %v7535_v5 }
  0x91   :  { %1020 = vmatprep.subr.bf16.mxu1 %v7538_v6 }
  0x92   :  { %6159 = vmatpush3.bf16.msra.mxu0 %v7713_v56 }
  0x93   :  { %6160 = vmatprep.subr.bf16.mxu0 %v8693_v36 }
  0x94   :  { %1021 = vmatpush1.bf16.msra.mxu1 %v7541_v7 }
  0x95   :  { %1022 = vmatprep.subr.bf16.mxu1 %v7544_v8 }
  0x96   :  { %6162 = vmatpush3.bf16.msra.mxu0 %v7720_v57 }
  0x97   :  { %6163 = vmatprep.subr.bf16.mxu0 %v8693_v36 }
  0x98   :  { %1023 = vmatpush1.bf16.msra.mxu1 %v7547_v10 }
  0x99   :  { %1024 = vmatprep.subr.bf16.mxu1 %v7550_v11 }
  0x9a   :  { %6165 = vmatpush3.bf16.msra.mxu0 %v7726_v58 }
  0x9b   :  { %6166 = vmatprep.subr.bf16.mxu0 %v8693_v36 }
  0x9c   :  { %1025 = vmatpush1.bf16.msra.mxu1 %v7554_v13 }
  0x9d   :  { %1026 = vmatprep.subr.bf16.mxu1 %v7557_v14 }
  0x9e   :  { %6168 = vmatpush3.bf16.msra.mxu0 %v7731_v59 }
  0x9f   :  { %6169 = vmatprep.subr.bf16.mxu0 %v8693_v36 }
  0xa0   :  { %1027 = vmatpush1.bf16.msra.mxu1 %v7560_v16 }
  0xa1   :  { %1028 = vmatprep.subr.bf16.mxu1 %v7563_v17 }
  0xa2   :  { %6171 = vmatpush3.bf16.msra.mxu0 %v7737_v60 }
  0xa3   :  { %6172 = vmatprep.subr.bf16.mxu0 %v8693_v36 }
  0xa4   :  { %1029 = vmatpush1.bf16.msra.mxu1 %v7568_v19 }
  0xa5   :  { %1030 = vmatprep.subr.bf16.mxu1 %v7570_v20 }
  0xa6   :  { %6174 = vmatpush3.bf16.msra.mxu0 %v7743_v61 }
  0xa7   :  { %5465 = vmatprep.subr.bf16.mxu0 %v8695_v0 }
  0xa8   :  { %1031 = vmatpush1.bf16.msra.mxu1 %v7574_v22 }
  0xa9   :  { %6176 = vmatprep.subr.bf16.mxu1 %v7580_v23 }
  0xab   :  { %1049 = vmatmul.mubr.bf16.vlgmr.msra.gmra.mrb[8].mxu1 %v7702_v54 }
  0xac   :  { %6178 = vmatpush1.bf16.msra.mxu1 %v7584_v26  ;;  %1209 = vmatprep.mubr.f32.mxu1 %v8695_v0  ;;  %v7758_v0 = vrot.slane %v258_v31, %v428_v28 }
  0xad   :  { %6180 = vmatprep.subr.bf16.mxu1 %v7587_v27 }
  0xae   :  { %8751 = vst [vmem:[#allocation30_spill] sm:$0xff] %v7758_v0 }
  0xb0   :  { %6182 = vmatpush1.bf16.msra.mxu1 %v7591_v29 }
  0xb1   :  { %6184 = vmatprep.subr.bf16.mxu1 %v7594_v30 }
  0xb4   :  { %6186 = vmatpush1.bf16.msra.mxu1 %v7598_v32 }
  0xb5   :  { %6188 = vmatprep.subr.bf16.mxu1 %v7601_v33  ;;  %v436_v33 = vsub.s32 2, %v427_v25 }
  0xb8   :  { %6190 = vmatpush1.bf16.msra.mxu1 %v7607_v35 }
  0xb9   :  { %6192 = vmatprep.subr.bf16.mxu1 %v7610_v37 }
  0xbc   :  { %6194 = vmatpush1.bf16.msra.mxu1 %v7617_v39 }
  0xbd   :  { %6196 = vmatprep.subr.bf16.mxu1 %v7622_v40 }
  0xc0   :  { %6198 = vmatpush1.bf16.msra.mxu1 %v7629_v42 }
  0xc1   :  { %6200 = vmatprep.subr.bf16.mxu1 %v7632_v43 }
  0xc4   :  { %6202 = vmatpush1.bf16.msra.mxu1 %v7639_v45 }
  0xc5   :  { %6204 = vmatprep.subr.bf16.mxu1 %v7642_v46 }
  0xc8   :  { %6206 = vmatpush1.bf16.msra.mxu1 %v7649_v48 }
  0xc9   :  { %6231 = vmatprep.subr.bf16.mxu1 %v8693_v36  ;;  %v259_v36 = vld [vmem:[%s8686_s6] sm:$0x7] }
 0x13c   :  { %v475_v62 = vpop.f32.mrb[0].mxu0 }
 0x13d   :  { %v477_v63 = vpop.f32.mrb[1].mxu0 }
 0x13e   :  { %v479_v3 = vpop.f32.mrb[2].mxu0  ;;  %v516_v12 = vpop.f32.mrb[0].mxu1 }
 0x13f   :  { %v480_v9 = vpop.f32.mrb[3].mxu0  ;;  %v5393_v15 = vpop.f32.mrb[1].mxu1  ;;  %v7760_v3 = vrot.slane %v259_v36, %v428_v28 }
 0x140   :  { %v519_v18 = vpop.f32.mrb[2].mxu1  ;;  %v7762_v9 = vrot.slane %v258_v31, %v432_v1  ;;  %v7764_v15 = vrot.slane %v259_v36, %v432_v1 }
 0x141   :  { %v5394_v21 = vpop.f32.mrb[3].mxu1  ;;  %8752 = vst [vmem:[#allocation31_spill] sm:$0xff] %v7760_v3 }
 0x142   :  { %8753 = vst [vmem:[#allocation32_spill] sm:$0xff] %v7762_v9  ;;  %8754 = vst [vmem:[#allocation33_spill] sm:$0xff] %v7764_v15  ;;  %v476_v21 = vadd.f32 %v475_v62, %v7758_v0  ;;  %v478_v46 = vadd.f32 %v477_v63, %v7762_v9  ;;  %v7770_v62 = vrot.slane %v259_v36, %v436_v33 }
 0x15c   :  { %v652_v18 = vpop.f32.mrb[4].mxu0 }
 0x15d   :  { %v653_v24 = vadd.f32 %v652_v18, %v7760_v3  ;;  %v654_v48 = vpop.f32.mrb[5].mxu0  ;;  %v7772_v3 = vrot.slane %v258_v31, %v436_v33  ;;  %v7006_v33 = vld [vmem:[#allocation6 + $0x20] ss:$12 sps:$4 sm:$0xff]   ;;  %v8756_v31 = vmov 0.0|0.0  }
 0x15e   :  { %v655_v45 = vadd.f32 %v654_v48, %v7764_v15  ;;  %v723_v28 = vpop.f32.mrb[4].mxu1 }
 0x15f   :  { %v727_v43 = vadd.f32 %v653_v24, %v476_v21  ;;  %v5429_v37 = vpop.f32.mrb[5].mxu1  ;;  %v724_v48 = vadd.f32 %v723_v28, %v7770_v62  ;;  %v7008_v21 = vld [vmem:[#allocation6 + $0x50] ss:$12 sps:$4 sm:$0xff]   ;;  %v7009_v28 = vld [vmem:[#allocation6 + $0x68] ss:$12 sps:$4 sm:$0xff]  }
 0x160   :  { %v734_v42 = vadd.f32 %v655_v45, %v478_v46  ;;  %v7005_v46 = vld [vmem:[#allocation6 + $0x8] ss:$12 sps:$4 sm:$0xff]  }
 0x161   :  { %v4801_v40 = vmul.f32 -1.442695, %v727_v43  ;;  %v517_v43 = vadd.f32 %v516_v12, %v7772_v3  ;;  %v8755_v12 = vmov 0.0  }
 0x162   :  { %v4802_v39 = vmul.f32 -1.442695, %v734_v42 }
 0x163   :  { %7109 = vpow2.f32 %v4801_v40 }
 0x164   :  { %7111 = vpow2.f32 %v4802_v39 }
 0x16d   :  { %v7110_v1 = vpop.eup %7109 }
 0x16e   :  { %v731_v35 = vadd.f32 1.0, %v7110_v1  ;;  %v7112_v18 = vpop.eup %7111  ;;  %v7010_v1 = vld [vmem:[#allocation6 + $0x80] ss:$12 sps:$4 sm:$0xff]  }
 0x16f   :  { %v738_v63 = vadd.f32 1.0, %v7112_v18  ;;  %v7011_v18 = vld [vmem:[#allocation6 + $0x98] ss:$12 sps:$4 sm:$0xff]  }
 0x170   :  { %7113 = vrcp.f32 %v731_v35 }
 0x171   :  { %7115 = vrcp.f32 %v738_v63  ;;  %v7012_v63 = vld [vmem:[#allocation6 + $0xb0] ss:$12 sps:$4 sm:$0xff]  }
 0x17a   :  { %v7114_v24 = vpop.eup %7113 }
 0x17b   :  { %v741_v40 = vmul.f32 %v7114_v24, %v724_v48  ;;  %v7116_v37 = vpop.eup %7115 }
 0x17c   :  { %v744_v39 = vsub.f32 1.0, %v7116_v37  ;;  %v746_v36 = vmul.f32 %v7116_v37, %v7660_v50  ;;  %v7007_v50 = vld [vmem:[#allocation6 + $0x38] ss:$12 sps:$4 sm:$0xff]  }
 0x17d   :  { %v742_v42 = vadd.f32 %v741_v40, %v517_v43  ;;  %v7221_v40 = vld [vmem:[#allocation6] ss:$12 sps:$4 sm:$0xff]  }
 0x17f   :  { %7117 = vtanh.f32 %v742_v42  ;;  %v8757_v42 = vmov 0  }
 0x189   :  { %v7118_v45 = vpop.eup %7117 }
 0x18a   :  { %v745_v35 = vmul.f32 %v7118_v45, %v744_v39 }
 0x18c   :  { %v7777_v25 = vadd.f32 %v746_v36, %v745_v35 }
 0x18e   :  { %5463 = vmatmul.mubr.f32.vlgmr.msra.gmra.mrb[6].mxu0 %v7777_v25  ;;  %1210 = vmatmul.mubr.f32.vlgmr.msra.gmra.mrb[6].mxu1 %v7777_v25 }
 0x18f   :  { %5466 = vmatpush3.bf16.msra.mxu0 %v7005_v46  ;;  %5481 = vmatprep.mubr.msk.bf16.mxu0 %vm7418_vm0, %v8755_v12 }
 0x190   :  { %5467 = vmatprep.subr.bf16.mxu0 %v8755_v12  ;;  %6233 = vmatpush3.bf16.msra.mxu1 %v7696_v53 }
 0x191   :  { %6234 = vmatprep.subr.bf16.mxu1 %v8756_v31  ;;  %5552 = vmatprep.mubr.msk.f32.mxu1 %vm7418_vm0, %v8755_v12 }
 0x193   :  { %5468 = vmatpush3.bf16.msra.mxu0 %v7006_v33 }
 0x194   :  { %5469 = vmatprep.subr.bf16.mxu0 %v8755_v12  ;;  %6236 = vmatpush3.bf16.msra.mxu1 %v7708_v55 }
 0x195   :  { %6237 = vmatprep.subr.bf16.mxu1 %v8756_v31 }
 0x197   :  { %5470 = vmatpush3.bf16.msra.mxu0 %v7007_v50 }
 0x198   :  { %5471 = vmatprep.subr.bf16.mxu0 %v8755_v12  ;;  %6239 = vmatpush3.bf16.msra.mxu1 %v7713_v56 }
 0x199   :  { %6240 = vmatprep.subr.bf16.mxu1 %v8756_v31 }
 0x19b   :  { %5472 = vmatpush3.bf16.msra.mxu0 %v7008_v21 }
 0x19c   :  { %5473 = vmatprep.subr.bf16.mxu0 %v8755_v12  ;;  %6242 = vmatpush3.bf16.msra.mxu1 %v7720_v57 }
 0x19d   :  { %6243 = vmatprep.subr.bf16.mxu1 %v8756_v31 }
 0x19f   :  { %5474 = vmatpush3.bf16.msra.mxu0 %v7009_v28 }
 0x1a0   :  { %5475 = vmatprep.subr.bf16.mxu0 %v8755_v12  ;;  %6245 = vmatpush3.bf16.msra.mxu1 %v7726_v58 }
 0x1a1   :  { %6246 = vmatprep.subr.bf16.mxu1 %v8756_v31 }
 0x1a3   :  { %5476 = vmatpush3.bf16.msra.mxu0 %v7010_v1 }
 0x1a4   :  { %5477 = vmatprep.subr.bf16.mxu0 %v8755_v12  ;;  %6248 = vmatpush3.bf16.msra.mxu1 %v7731_v59 }
 0x1a5   :  { %6249 = vmatprep.subr.bf16.mxu1 %v8756_v31 }
 0x1a7   :  { %5478 = vmatpush3.bf16.msra.mxu0 %v7011_v18 }
 0x1a8   :  { %5479 = vmatprep.subr.bf16.mxu0 %v8755_v12  ;;  %6251 = vmatpush3.bf16.msra.mxu1 %v7737_v60 }
 0x1a9   :  { %6252 = vmatprep.subr.bf16.mxu1 %v8756_v31 }
 0x1ab   :  { %5480 = vmatpush3.bf16.msra.mxu0 %v7012_v63 }
 0x1ac   :  { %6207 = vmatprep.subr.bf16.mxu0 %v8756_v31  ;;  %6254 = vmatpush3.bf16.msra.mxu1 %v7743_v61 }
 0x1ad   :  { %5555 = vmatprep.subr.bf16.mxu1 %v8755_v12 }
 0x1ae   :  { %5482 = vmatmul.mubr.bf16.vlgmr.msra.gmra.mrb[8].mxu0 %v7702_v54  ;;  %v1050_v54 = vpop.f32.mrb[8].mxu1 }
 0x1af   :  { %6209 = vmatpush3.bf16.msra.mxu0 %v7603_v34  ;;  %5517 = vmatprep.mubr.msk.f32.mxu0 %vm7418_vm0, %v8755_v12  ;;  %v1052_v48 = vpop.f32.mrb[9].mxu1 }
 0x1b0   :  { %6210 = vmatprep.subr.bf16.mxu0 %v8756_v31  ;;  %v1054_v24 = vpop.f32.mrb[10].mxu1 }
 0x1b1   :  { %v1055_v43 = vpop.f32.mrb[11].mxu1 }
 0x1b3   :  { %6212 = vmatpush3.bf16.msra.mxu0 %v7612_v38 }
 0x1b4   :  { %6213 = vmatprep.subr.bf16.mxu0 %v8756_v31 }
 0x1b7   :  { %6215 = vmatpush3.bf16.msra.mxu0 %v7624_v41 }
 0x1b8   :  { %6216 = vmatprep.subr.bf16.mxu0 %v8756_v31 }
 0x1bb   :  { %6218 = vmatpush3.bf16.msra.mxu0 %v7634_v44 }
 0x1bc   :  { %6219 = vmatprep.subr.bf16.mxu0 %v8756_v31 }
 0x1bf   :  { %6221 = vmatpush3.bf16.msra.mxu0 %v7644_v47 }
 0x1c0   :  { %6222 = vmatprep.subr.bf16.mxu0 %v8756_v31 }
 0x1c3   :  { %6224 = vmatpush3.bf16.msra.mxu0 %v7652_v49 }
 0x1c4   :  { %6225 = vmatprep.subr.bf16.mxu0 %v8756_v31 }
 0x1c7   :  { %6227 = vmatpush3.bf16.msra.mxu0 %v7663_v51 }
 0x1c8   :  { %6228 = vmatprep.subr.bf16.mxu0 %v8756_v31 }
 0x1cb   :  { %6230 = vmatpush3.bf16.msra.mxu0 %v7670_v52 }
 0x1cc   :  { %1571 = vmatprep.subr.bf16.mxu0 %v7527_v2  ;;  %v7848_v2 = vld [vmem:[%s1409_s26] sm:$0x1] }
 0x1ce   :  { %5518 = vmatmul.mubr.f32.vlgmr.msra.gmra.mrb[12].mxu0 %v7777_v25 }
 0x1cf   :  { %1572 = vmatpush1.bf16.msra.mxu0 %v7221_v40  ;;  %1603 = vmatprep.mubr.bf16.mxu0 %v8757_v42 }
 0x1d0   :  { %1573 = vmatprep.subr.bf16.mxu0 %v7532_v4  ;;  %v8758_v4 = vld [vmem:[#allocation20_spill] sm:$0xff] }
 0x1d3   :  { %1574 = vmatpush1.bf16.msra.mxu0 %v7535_v5  ;;  %v8759_v5 = vld [vmem:[#allocation21_spill] sm:$0xff] }
 0x1d4   :  { %1575 = vmatprep.subr.bf16.mxu0 %v7538_v6  ;;  %v8760_v6 = vld [vmem:[#allocation22_spill] sm:$0xff] }
 0x1d7   :  { %1576 = vmatpush1.bf16.msra.mxu0 %v7541_v7  ;;  %v8761_v7 = vld [vmem:[#allocation23_spill] sm:$0xff] }
 0x1d8   :  { %1577 = vmatprep.subr.bf16.mxu0 %v7544_v8  ;;  %v8762_v8 = vld [vmem:[#allocation24_spill] sm:$0xff] }
 0x1db   :  { %1578 = vmatpush1.bf16.msra.mxu0 %v7547_v10  ;;  %v8763_v10 = vld [vmem:[#allocation25_spill] sm:$0xff] }
 0x1dc   :  { %1579 = vmatprep.subr.bf16.mxu0 %v7550_v11  ;;  %v8764_v11 = vld [vmem:[#allocation26_spill] sm:$0xff] }
 0x1df   :  { %1580 = vmatpush1.bf16.msra.mxu0 %v7554_v13  ;;  %v8765_v13 = vld [vmem:[#allocation27_spill] sm:$0xff] }
 0x1e0   :  { %1581 = vmatprep.subr.bf16.mxu0 %v7557_v14  ;;  %v8766_v14 = vld [vmem:[#allocation28_spill] sm:$0xff] }
 0x1e3   :  { %1582 = vmatpush1.bf16.msra.mxu0 %v7560_v16  ;;  %v8767_v16 = vld [vmem:[#allocation29_spill] sm:$0xff] }
 0x1e4   :  { %1583 = vmatprep.subr.bf16.mxu0 %v7563_v17  ;;  %v8768_v17 = vlaneseq }
 0x1e7   :  { %1584 = vmatpush1.bf16.msra.mxu0 %v7568_v19  ;;  %v7869_v19 = vand.u32 127, %v8768_v17 }
 0x1e8   :  { %1585 = vmatprep.subr.bf16.mxu0 %v7570_v20  ;;  %v7874_v20 = vld [vmem:[%s8688_s8] sm:$0x1] }
 0x1e9   :  { %8769 = vst [vmem:[#allocation20_spill] sm:$0xff] %v7869_v19  ;;  %8770 = vst [vmem:[#allocation21_spill] sm:$0xff] %v7874_v20  ;;  %vm836_vm1 = vcmp.lt.s32.totalorder %v7869_v19, 10 }
 0x1eb   :  { %1586 = vmatpush1.bf16.msra.mxu0 %v7574_v22  ;;  %v1051_v22 = vadd.f32 %v1050_v54, %v7758_v0 }
 0x1ec   :  { %6256 = vmatprep.subr.bf16.mxu0 %v7580_v23  ;;  %v1053_v23 = vadd.f32 %v1052_v48, %v7762_v9 }
 0x1ee   :  { %1604 = vmatmul.mubr.bf16.vlgmr.msra.gmra.mrb[16].mxu0 %v7848_v2 }
 0x1ef   :  { %6258 = vmatpush1.bf16.msra.mxu0 %v7584_v26  ;;  %1764 = vmatprep.mubr.f32.mxu0 %v8755_v12 }
 0x1f0   :  { %6260 = vmatprep.subr.bf16.mxu0 %v7587_v27 }
 0x1f3   :  { %6262 = vmatpush1.bf16.msra.mxu0 %v7591_v29 }
 0x1f4   :  { %6264 = vmatprep.subr.bf16.mxu0 %v7594_v30  ;;  %v8771_v30 = vld [vmem:[#allocation31_spill] sm:$0xff] }
 0x1f7   :  { %6266 = vmatpush1.bf16.msra.mxu0 %v7598_v32 }
 0x1f8   :  { %6268 = vmatprep.subr.bf16.mxu0 %v8758_v4 }
 0x1fb   :  { %6270 = vmatpush1.bf16.msra.mxu0 %v8759_v5 }
 0x1fc   :  { %6272 = vmatprep.subr.bf16.mxu0 %v8760_v6 }
 0x1ff   :  { %6274 = vmatpush1.bf16.msra.mxu0 %v8761_v7 }
 0x200   :  { %6276 = vmatprep.subr.bf16.mxu0 %v8762_v8 }
 0x203   :  { %6278 = vmatpush1.bf16.msra.mxu0 %v8763_v10 }
 0x204   :  { %6280 = vmatprep.subr.bf16.mxu0 %v8764_v11 }
 0x207   :  { %6282 = vmatpush1.bf16.msra.mxu0 %v8765_v13 }
 0x208   :  { %6284 = vmatprep.subr.bf16.mxu0 %v8766_v14 }
 0x20b   :  { %6286 = vmatpush1.bf16.msra.mxu0 %v8767_v16 }
 0x20c   :  { %6311 = vmatprep.subr.bf16.mxu0 %v8756_v31 }
 0x261   :  { %v830_v26 = vpop.f32.mrb[6].mxu0  ;;  %v1211_v27 = vpop.f32.mrb[6].mxu1 }
 0x262   :  { %v831_v29 = vadd.f32 %v830_v26, %v7874_v20  ;;  %v1212_v32 = vadd.f32 %v1211_v27, %v8771_v30  ;;  %v5464_v37 = vpop.f32.mrb[7].mxu0  ;;  %v1213_v39 = vpop.f32.mrb[7].mxu1  ;;  %v7013_v27 = vld [vmem:[#allocation6 + $0x8] ss:$12 sps:$4 sm:$0xff]  }
 0x263   :  { %v1214_v45 = vadd.f32 %v1213_v39, %v7764_v15  ;;  %v7016_v37 = vld [vmem:[#allocation6 + $0x50] ss:$12 sps:$4 sm:$0xff]   ;;  %v7017_v39 = vld [vmem:[#allocation6 + $0x68] ss:$12 sps:$4 sm:$0xff]  }
 0x264   :  { %v1286_v35 = vadd.f32 %v1212_v32, %v1051_v22  ;;  %v7884_v36 = vsel %vm836_vm1, %v831_v29, -1e+30  ;;  %v7014_v32 = vld [vmem:[#allocation6 + $0x20] ss:$12 sps:$4 sm:$0xff]  }
 0x265   :  { %8772 = vst [vmem:[#allocation22_spill] sm:$0xff] %v7884_v36  ;;  %v1293_v46 = vadd.f32 %v1214_v45, %v1053_v23  ;;  %v839_v33 = vsel %vm838_vm2, %v7884_v36, -inf  ;;  %v7018_v45 = vld [vmem:[#allocation6 + $0x80] ss:$12 sps:$4 sm:$0xff]  }
 0x266   :  { %840 = vmax.xlane.f32.xlu0 %v839_v33  ;;  %v4828_v1 = vmul.f32 -1.442695, %v1286_v35  ;;  %v7019_v35 = vld [vmem:[#allocation6 + $0x98] ss:$12 sps:$4 sm:$0xff]  }
 0x267   :  { %v4829_v63 = vmul.f32 -1.442695, %v1293_v46  ;;  %v7020_v46 = vld [vmem:[#allocation6 + $0xb0] ss:$12 sps:$4 sm:$0xff]  }
 0x268   :  { %7119 = vpow2.f32 %v4828_v1  ;;  %v7973_v1 = vld [vmem:[#allocation6 + $0x64] ss:$12 sps:$4 sm:$0xff]  }
 0x269   :  { %7121 = vpow2.f32 %v4829_v63  ;;  %v7979_v63 = vld [vmem:[#allocation6 + $0x78] ss:$12 sps:$4 sm:$0xff]  }
 0x272   :  { %v7120_v54 = vpop.eup %7119 }
 0x273   :  { %v1290_v48 = vadd.f32 1.0, %v7120_v54  ;;  %v7122_v24 = vpop.eup %7121  ;;  %v7982_v54 = vld [vmem:[#allocation6 + $0x94] ss:$12 sps:$4 sm:$0xff]  }
 0x274   :  { %v1297_v43 = vadd.f32 1.0, %v7122_v24  ;;  %v7988_v24 = vld [vmem:[#allocation6 + $0xac] ss:$12 sps:$4 sm:$0xff]  }
 0x275   :  { %7123 = vrcp.f32 %v1290_v48  ;;  %v7985_v48 = vld [vmem:[#allocation6 + $0x90] ss:$12 sps:$4 sm:$0xff]  }
 0x276   :  { %7125 = vrcp.f32 %v1297_v43  ;;  %v7991_v43 = vld [vmem:[#allocation6 + $0xa8] ss:$12 sps:$4 sm:$0xff]  }
 0x27f   :  { %v7124_v6 = vpop.eup %7123 }
 0x280   :  { %v7126_v11 = vpop.eup %7125 }
 0x281   :  { %v1091_v50 = vpop.f32.mrb[8].mxu0  ;;  %v1303_v17 = vsub.f32 1.0, %v7126_v11  ;;  %v1305_v26 = vmul.f32 %v7126_v11, %v7777_v25  ;;  %v7015_v25 = vld [vmem:[#allocation6 + $0x38] ss:$12 sps:$4 sm:$0xff]  }
 0x282   :  { %v5483_v21 = vpop.f32.mrb[9].mxu0  ;;  %v1092_v7 = vadd.f32 %v1091_v50, %v7772_v3  ;;  %v8020_v11 = vld [vmem:[#allocation9 + $0x4c] ss:$12 sps:$4 sm:$0xff]  }
 0x283   :  { %v1094_v28 = vpop.f32.mrb[10].mxu0 }
 0x284   :  { %v5484_v18 = vpop.f32.mrb[11].mxu0  ;;  %v7971_v28 = vld [vmem:[#allocation6 + $0x60] ss:$12 sps:$4 sm:$0xff]  }
 0x285   :  { %v7975_v18 = vld [vmem:[#allocation6 + $0x7c] ss:$12 sps:$4 sm:$0xff]  }
 0x2a1   :  { %v1282_v40 = vpop.f32.mrb[12].mxu0 }
 0x2a2   :  { %v1283_v4 = vadd.f32 %v1282_v40, %v7770_v62  ;;  %v5519_v5 = vpop.f32.mrb[13].mxu0  ;;  %v7998_v40 = vld [vmem:[%s1964_s3] sm:$0x1] }
 0x2a3   :  { %v8004_v5 = vld [vmem:[#allocation9] ss:$12 sps:$4 sm:$0xff]  }
 0x2a4   :  { %v1300_v8 = vmul.f32 %v7124_v6, %v1283_v4  ;;  %v8000_v4 = vld [vmem:[#allocation9 + $0x4] ss:$12 sps:$4 sm:$0xff]   ;;  %v8008_v6 = vld [vmem:[#allocation9 + $0x1c] ss:$12 sps:$4 sm:$0xff]  }
 0x2a6   :  { %v1301_v10 = vadd.f32 %v1300_v8, %v1092_v7  ;;  %v8011_v7 = vld [vmem:[#allocation9 + $0x18] ss:$12 sps:$4 sm:$0xff]   ;;  %v8014_v8 = vld [vmem:[#allocation9 + $0x34] ss:$12 sps:$4 sm:$0xff]  }
 0x2a8   :  { %7127 = vtanh.f32 %v1301_v10  ;;  %v8017_v10 = vld [vmem:[#allocation9 + $0x30] ss:$12 sps:$4 sm:$0xff]  }
 0x2b2   :  { %v7128_v22 = vpop.eup %7127 }
 0x2b3   :  { %v1304_v23 = vmul.f32 %v7128_v22, %v1303_v17  ;;  %v8023_v17 = vld [vmem:[#allocation9 + $0x48] ss:$12 sps:$4 sm:$0xff]   ;;  %v8026_v22 = vld [vmem:[#allocation9 + $0x64] ss:$12 sps:$4 sm:$0xff]  }
 0x2b5   :  { %v7891_v29 = vadd.f32 %v1305_v26, %v1304_v23  ;;  %v8029_v23 = vld [vmem:[#allocation9 + $0x60] ss:$12 sps:$4 sm:$0xff]   ;;  %v8032_v26 = vld [vmem:[#allocation9 + $0x7c] ss:$12 sps:$4 sm:$0xff]  }
 0x2b7   :  { %5553 = vmatmul.mubr.f32.vlgmr.msra.gmra.mrb[12].mxu1 %v7891_v29  ;;  %1765 = vmatmul.mubr.f32.vlgmr.msra.gmra.mrb[14].mxu0 %v7891_v29 }
 0x2b8   :  { %5556 = vmatpush3.bf16.msra.mxu1 %v7013_v27  ;;  %5571 = vmatprep.mubr.msk.bf16.mxu1 %vm7418_vm0, %v8755_v12  ;;  %v8035_v27 = vld [vmem:[#allocation9 + $0x78] ss:$12 sps:$4 sm:$0xff]  }
 0x2b9   :  { %5557 = vmatprep.subr.bf16.mxu1 %v8755_v12  ;;  %6313 = vmatpush3.bf16.msra.mxu0 %v7696_v53 }
 0x2ba   :  { %6314 = vmatprep.subr.bf16.mxu0 %v8756_v31  ;;  %5642 = vmatprep.mubr.msk.f32.mxu0 %vm7418_vm0, %v8755_v12 }
 0x2bc   :  { %5558 = vmatpush3.bf16.msra.mxu1 %v7014_v32  ;;  %v8038_v32 = vld [vmem:[#allocation9 + $0x94] ss:$12 sps:$4 sm:$0xff]  }
 0x2bd   :  { %5559 = vmatprep.subr.bf16.mxu1 %v8755_v12  ;;  %6316 = vmatpush3.bf16.msra.mxu0 %v7708_v55 }
 0x2be   :  { %6317 = vmatprep.subr.bf16.mxu0 %v8756_v31 }
 0x2c0   :  { %5560 = vmatpush3.bf16.msra.mxu1 %v7015_v25 }
 0x2c1   :  { %5561 = vmatprep.subr.bf16.mxu1 %v8755_v12  ;;  %6319 = vmatpush3.bf16.msra.mxu0 %v7713_v56  ;;  %v7930_v33 = vpop.f32.mrb[16].mxu0 }
 0x2c2   :  { %6320 = vmatprep.subr.bf16.mxu0 %v8756_v31  ;;  %v7933_v50 = vpop.f32.mrb[17].mxu0  ;;  %v1606_v25 = vadd.f32 %v7930_v33, %v7758_v0 }
 0x2c4   :  { %5562 = vmatpush3.bf16.msra.mxu1 %v7016_v37  ;;  %v1608_v37 = vadd.f32 %v7933_v50, %v7762_v9 }
 0x2c5   :  { %5563 = vmatprep.subr.bf16.mxu1 %v8755_v12  ;;  %6322 = vmatpush3.bf16.msra.mxu0 %v7720_v57 }
 0x2c6   :  { %6323 = vmatprep.subr.bf16.mxu0 %v8756_v31 }
 0x2c8   :  { %5564 = vmatpush3.bf16.msra.mxu1 %v7017_v39 }
 0x2c9   :  { %5565 = vmatprep.subr.bf16.mxu1 %v8755_v12  ;;  %6325 = vmatpush3.bf16.msra.mxu0 %v7726_v58 }
 0x2ca   :  { %6326 = vmatprep.subr.bf16.mxu0 %v8756_v31 }
 0x2cc   :  { %5566 = vmatpush3.bf16.msra.mxu1 %v7018_v45 }
 0x2cd   :  { %5567 = vmatprep.subr.bf16.mxu1 %v8755_v12  ;;  %6328 = vmatpush3.bf16.msra.mxu0 %v7731_v59 }
 0x2ce   :  { %6329 = vmatprep.subr.bf16.mxu0 %v8756_v31 }
 0x2d0   :  { %5568 = vmatpush3.bf16.msra.mxu1 %v7019_v35 }
 0x2d1   :  { %5569 = vmatprep.subr.bf16.mxu1 %v8755_v12  ;;  %6331 = vmatpush3.bf16.msra.mxu0 %v7737_v60 }
 0x2d2   :  { %6332 = vmatprep.subr.bf16.mxu0 %v8756_v31 }
 0x2d4   :  { %5570 = vmatpush3.bf16.msra.mxu1 %v7020_v46 }
 0x2d5   :  { %6287 = vmatprep.subr.bf16.mxu1 %v8756_v31  ;;  %6334 = vmatpush3.bf16.msra.mxu0 %v7743_v61 }
 0x2d6   :  { %5645 = vmatprep.subr.bf16.mxu0 %v8755_v12 }
 0x2d7   :  { %5572 = vmatmul.mubr.bf16.vlgmr.msra.gmra.mrb[16].mxu1 %v7848_v2  ;;  %v1609_v2 = vpop.f32.mrb[18].mxu0 }
 0x2d8   :  { %6289 = vmatpush3.bf16.msra.mxu1 %v7603_v34  ;;  %5607 = vmatprep.mubr.msk.f32.mxu1 %vm7418_vm0, %v8755_v12  ;;  %v1610_v21 = vpop.f32.mrb[19].mxu0  ;;  %v7947_v34 = vld [vmem:[#allocation6 + $0x4] ss:$12 sps:$4 sm:$0xff]  }
 0x2d9   :  { %6290 = vmatprep.subr.bf16.mxu1 %v8756_v31 }
 0x2dc   :  { %6292 = vmatpush3.bf16.msra.mxu1 %v7612_v38  ;;  %v7949_v38 = vld [vmem:[#allocation6] ss:$12 sps:$4 sm:$0xff]  }
 0x2dd   :  { %6293 = vmatprep.subr.bf16.mxu1 %v8756_v31 }
 0x2e0   :  { %6295 = vmatpush3.bf16.msra.mxu1 %v7624_v41  ;;  %v7951_v41 = vld [vmem:[#allocation6 + $0x1c] ss:$12 sps:$4 sm:$0xff]  }
 0x2e1   :  { %6296 = vmatprep.subr.bf16.mxu1 %v8756_v31 }
 0x2e4   :  { %6298 = vmatpush3.bf16.msra.mxu1 %v7634_v44  ;;  %v7955_v44 = vld [vmem:[#allocation6 + $0x18] ss:$12 sps:$4 sm:$0xff]  }
 0x2e5   :  { %6299 = vmatprep.subr.bf16.mxu1 %v8756_v31 }
 0x2e8   :  { %6301 = vmatpush3.bf16.msra.mxu1 %v7644_v47  ;;  %v7958_v47 = vld [vmem:[#allocation6 + $0x34] ss:$12 sps:$4 sm:$0xff]  }
 0x2e9   :  { %6302 = vmatprep.subr.bf16.mxu1 %v8756_v31 }
 0x2ec   :  { %6304 = vmatpush3.bf16.msra.mxu1 %v7652_v49  ;;  %v7961_v49 = vld [vmem:[#allocation6 + $0x30] ss:$12 sps:$4 sm:$0xff]  }
 0x2ed   :  { %6305 = vmatprep.subr.bf16.mxu1 %v8756_v31 }
 0x2f0   :  { %6307 = vmatpush3.bf16.msra.mxu1 %v7663_v51  ;;  %v7965_v51 = vld [vmem:[#allocation6 + $0x4c] ss:$12 sps:$4 sm:$0xff]  }
 0x2f1   :  { %6308 = vmatprep.subr.bf16.mxu1 %v8756_v31 }
 0x2f4   :  { %6310 = vmatpush3.bf16.msra.mxu1 %v7670_v52  ;;  %v7967_v52 = vld [vmem:[#allocation6 + $0x48] ss:$12 sps:$4 sm:$0xff]  }
 0x2f5   :  { %2126 = vmatprep.subr.bf16.mxu1 %v7947_v34 }
 0x2f7   :  { %5608 = vmatmul.mubr.f32.vlgmr.msra.gmra.mrb[14].mxu1 %v7891_v29 }
 0x2f8   :  { %2158 = vmatprep.mubr.bf16.mxu1 %v8757_v42  ;;  %2127 = vmatpush1.bf16.msra.mxu1 %v7949_v38 }
 0x2f9   :  { %2128 = vmatprep.subr.bf16.mxu1 %v7951_v41 }
 0x2fc   :  { %2129 = vmatpush1.bf16.msra.mxu1 %v7955_v44 }
 0x2fd   :  { %2130 = vmatprep.subr.bf16.mxu1 %v7958_v47 }
 0x300   :  { %2131 = vmatpush1.bf16.msra.mxu1 %v7961_v49 }
 0x301   :  { %2132 = vmatprep.subr.bf16.mxu1 %v7965_v51 }
 0x304   :  { %2133 = vmatpush1.bf16.msra.mxu1 %v7967_v52 }
 0x305   :  { %2134 = vmatprep.subr.bf16.mxu1 %v7973_v1 }
 0x308   :  { %2135 = vmatpush1.bf16.msra.mxu1 %v7971_v28 }
 0x309   :  { %2136 = vmatprep.subr.bf16.mxu1 %v7975_v18 }
 0x30c   :  { %2137 = vmatpush1.bf16.msra.mxu1 %v7979_v63 }
 0x30d   :  { %2138 = vmatprep.subr.bf16.mxu1 %v7982_v54 }
 0x310   :  { %2139 = vmatpush1.bf16.msra.mxu1 %v7985_v48 }
 0x311   :  { %2140 = vmatprep.subr.bf16.mxu1 %v7988_v24 }
 0x314   :  { %2141 = vmatpush1.bf16.msra.mxu1 %v7991_v43 }
 0x315   :  { %6336 = vmatprep.subr.bf16.mxu1 %v8000_v4 }
 0x317   :  { %2159 = vmatmul.mubr.bf16.vlgmr.msra.gmra.mrb[20].mxu1 %v7998_v40 }
 0x318   :  { %6338 = vmatpush1.bf16.msra.mxu1 %v8004_v5  ;;  %2319 = vmatprep.mubr.f32.mxu1 %v8755_v12 }
 0x319   :  { %6340 = vmatprep.subr.bf16.mxu1 %v8008_v6 }
 0x31c   :  { %6342 = vmatpush1.bf16.msra.mxu1 %v8011_v7 }
 0x31d   :  { %6344 = vmatprep.subr.bf16.mxu1 %v8014_v8 }
 0x320   :  { %6346 = vmatpush1.bf16.msra.mxu1 %v8017_v10 }
 0x321   :  { %6348 = vmatprep.subr.bf16.mxu1 %v8020_v11 }
 0x324   :  { %6350 = vmatpush1.bf16.msra.mxu1 %v8023_v17 }
 0x325   :  { %6352 = vmatprep.subr.bf16.mxu1 %v8026_v22 }
 0x328   :  { %6354 = vmatpush1.bf16.msra.mxu1 %v8029_v23 }
 0x329   :  { %6356 = vmatprep.subr.bf16.mxu1 %v8032_v26 }
 0x32c   :  { %6358 = vmatpush1.bf16.msra.mxu1 %v8035_v27 }
 0x32d   :  { %6360 = vmatprep.subr.bf16.mxu1 %v8038_v32 }
 0x330   :  { %6362 = vmatpush1.bf16.msra.mxu1 %v8765_v13 }
 0x331   :  { %6364 = vmatprep.subr.bf16.mxu1 %v8766_v14 }
 0x334   :  { %6366 = vmatpush1.bf16.msra.mxu1 %v8767_v16 }
 0x335   :  { %6391 = vmatprep.subr.bf16.mxu1 %v8756_v31 }
 0x38a   :  { %v1389_v39 = vpop.f32.mrb[12].mxu1  ;;  %v1766_v45 = vpop.f32.mrb[14].mxu0 }
 0x38b   :  { %v1390_v35 = vadd.f32 %v1389_v39, %v7874_v20  ;;  %v1767_v46 = vadd.f32 %v1766_v45, %v8771_v30  ;;  %v5554_v2 = vpop.f32.mrb[13].mxu1  ;;  %v1768_v13 = vpop.f32.mrb[15].mxu0 }
 0x38c   :  { %v1769_v14 = vadd.f32 %v1768_v13, %v7764_v15 }
 0x38d   :  { %v8054_v16 = vsel %vm836_vm1, %v1390_v35, -1e+30  ;;  %v1841_v21 = vadd.f32 %v1767_v46, %v1606_v25 }
 0x38e   :  { %8773 = vst [vmem:[#allocation23_spill] sm:$0xff] %v8054_v16  ;;  %v1848_v36 = vadd.f32 %v1769_v14, %v1608_v37  ;;  %v1394_v33 = vsel %vm838_vm2, %v8054_v16, -inf }
 0x38f   :  { %1395 = vmax.xlane.f32.xlu0 %v1394_v33  ;;  %v4855_v39 = vmul.f32 -1.442695, %v1841_v21 }
 0x390   :  { %v4856_v45 = vmul.f32 -1.442695, %v1848_v36 }
 0x391   :  { %7129 = vpow2.f32 %v4855_v39 }
 0x392   :  { %7131 = vpow2.f32 %v4856_v45  ;;  %v7045_v45 = vld [vmem:[#allocation6 + $0x8] ss:$12 sps:$4 sm:$0xff]  }
 0x39b   :  { %v7130_v2 = vpop.eup %7129 }
 0x39c   :  { %v1845_v13 = vadd.f32 1.0, %v7130_v2  ;;  %v7132_v19 = vpop.eup %7131 }
 0x39d   :  { %v1852_v35 = vadd.f32 1.0, %v7132_v19  ;;  %v7047_v19 = vld [vmem:[#allocation6 + $0x38] ss:$12 sps:$4 sm:$0xff]  }
 0x39e   :  { %7133 = vrcp.f32 %v1845_v13 }
 0x39f   :  { %7135 = vrcp.f32 %v1852_v35  ;;  %v8116_v35 = vld [vmem:[#allocation9 + $0x80] ss:$12 sps:$4 sm:$0xff]  }
 0x3a8   :  { %v7134_v46 = vpop.eup %7133 }
 0x3aa   :  { %v1646_v50 = vpop.f32.mrb[16].mxu1 }
 0x3ab   :  { %v5573_v9 = vpop.f32.mrb[17].mxu1  ;;  %v1647_v14 = vadd.f32 %v1646_v50, %v7772_v3 }
 0x3ac   :  { %v1649_v0 = vpop.f32.mrb[18].mxu1 }
 0x3ad   :  { %v5574_v20 = vpop.f32.mrb[19].mxu1 }
 0x3ae   :  { %v7136_v20 = vpop.eup %7135 }
 0x3af   :  { %v1858_v21 = vsub.f32 1.0, %v7136_v20  ;;  %v1860_v39 = vmul.f32 %v7136_v20, %v7891_v29  ;;  %v7048_v29 = vld [vmem:[#allocation6 + $0x50] ss:$12 sps:$4 sm:$0xff]   ;;  %v8168_v20 = vld [vmem:[#allocation9 + $0xac] ss:$12 sps:$4 sm:$0xff]  }
 0x3b0   :  { %8775 = vst [vmem:[#allocation25_spill] sm:$0xff] %v8168_v20 }
 0x3ca   :  { %v1837_v15 = vpop.f32.mrb[14].mxu1 }
 0x3cb   :  { %v1838_v25 = vadd.f32 %v1837_v15, %v7770_v62  ;;  %v5609_v37 = vpop.f32.mrb[15].mxu1  ;;  %v7046_v15 = vld [vmem:[#allocation6 + $0x20] ss:$12 sps:$4 sm:$0xff]  }
 0x3cd   :  { %v1855_v9 = vmul.f32 %v7134_v46, %v1838_v25  ;;  %v8120_v46 = vld [vmem:[#allocation9 + $0x98] ss:$12 sps:$4 sm:$0xff]  }
 0x3cf   :  { %v1856_v0 = vadd.f32 %v1855_v9, %v1647_v14  ;;  %v8124_v14 = vld [vmem:[#allocation9 + $0xb0] ss:$12 sps:$4 sm:$0xff]   ;;  %v8149_v9 = vld [vmem:[%s2519_s7] sm:$0x1] }
 0x3d1   :  { %7137 = vtanh.f32 %v1856_v0  ;;  %v8165_v0 = vld [vmem:[#allocation9 + $0x90] ss:$12 sps:$4 sm:$0xff]  }
 0x3d2   :  { %8774 = vst [vmem:[#allocation24_spill] sm:$0xff] %v8165_v0 }
 0x3db   :  { %v7138_v36 = vpop.eup %7137 }
 0x3dc   :  { %v1859_v33 = vmul.f32 %v7138_v36, %v1858_v21  ;;  %v8171_v21 = vld [vmem:[#allocation9 + $0xa8] ss:$12 sps:$4 sm:$0xff]   ;;  %v8777_v36 = vld [vmem:[#allocation30_spill] sm:$0xff] }
 0x3dd   :  { %8776 = vst [vmem:[#allocation26_spill] sm:$0xff] %v8171_v21 }
 0x3de   :  { %v8061_v2 = vadd.f32 %v1860_v39, %v1859_v33  ;;  %v8778_v39 = vld [vmem:[#allocation32_spill] sm:$0xff] }
 0x3e0   :  { %5643 = vmatmul.mubr.f32.vlgmr.msra.gmra.mrb[20].mxu0 %v8061_v2  ;;  %2320 = vmatmul.mubr.f32.vlgmr.msra.gmra.mrb[24].mxu1 %v8061_v2 }
 0x3e1   :  { %5646 = vmatpush3.bf16.msra.mxu0 %v7045_v45  ;;  %5661 = vmatprep.mubr.msk.bf16.mxu0 %vm7418_vm0, %v8755_v12 }
 0x3e2   :  { %5647 = vmatprep.subr.bf16.mxu0 %v8755_v12  ;;  %6393 = vmatpush3.bf16.msra.mxu1 %v7696_v53  ;;  %v7049_v53 = vld [vmem:[#allocation6 + $0x68] ss:$12 sps:$4 sm:$0xff]  }
 0x3e3   :  { %6394 = vmatprep.subr.bf16.mxu1 %v8756_v31  ;;  %5732 = vmatprep.mubr.msk.f32.mxu1 %vm7418_vm0, %v8755_v12 }
 0x3e5   :  { %5648 = vmatpush3.bf16.msra.mxu0 %v7046_v15 }
 0x3e6   :  { %5649 = vmatprep.subr.bf16.mxu0 %v8755_v12  ;;  %6396 = vmatpush3.bf16.msra.mxu1 %v7708_v55  ;;  %v7050_v55 = vld [vmem:[#allocation6 + $0x80] ss:$12 sps:$4 sm:$0xff]  }
 0x3e7   :  { %6397 = vmatprep.subr.bf16.mxu1 %v8756_v31 }
 0x3e9   :  { %5650 = vmatpush3.bf16.msra.mxu0 %v7047_v19 }
 0x3ea   :  { %5651 = vmatprep.subr.bf16.mxu0 %v8755_v12  ;;  %6399 = vmatpush3.bf16.msra.mxu1 %v7713_v56  ;;  %v7051_v56 = vld [vmem:[#allocation6 + $0x98] ss:$12 sps:$4 sm:$0xff]   ;;  %v2160_v50 = vpop.f32.mrb[20].mxu1 }
 0x3eb   :  { %6400 = vmatprep.subr.bf16.mxu1 %v8756_v31  ;;  %v2162_v13 = vpop.f32.mrb[21].mxu1  ;;  %v2161_v33 = vadd.f32 %v2160_v50, %v8777_v36 }
 0x3ec   :  { %v2164_v25 = vpop.f32.mrb[22].mxu1  ;;  %v2163_v45 = vadd.f32 %v2162_v13, %v8778_v39 }
 0x3ed   :  { %5652 = vmatpush3.bf16.msra.mxu0 %v7048_v29  ;;  %v2165_v37 = vpop.f32.mrb[23].mxu1  ;;  %v8779_v29 = vld [vmem:[#allocation21_spill] sm:$0xff] }
 0x3ee   :  { %5653 = vmatprep.subr.bf16.mxu0 %v8755_v12  ;;  %6402 = vmatpush3.bf16.msra.mxu1 %v7720_v57  ;;  %v7052_v57 = vld [vmem:[#allocation6 + $0xb0] ss:$12 sps:$4 sm:$0xff]  }
 0x3ef   :  { %6403 = vmatprep.subr.bf16.mxu1 %v8756_v31  ;;  %v8780_v25 = vld [vmem:[#allocation33_spill] sm:$0xff] }
 0x3f1   :  { %5654 = vmatpush3.bf16.msra.mxu0 %v7049_v53 }
 0x3f2   :  { %5655 = vmatprep.subr.bf16.mxu0 %v8755_v12  ;;  %6405 = vmatpush3.bf16.msra.mxu1 %v7726_v58  ;;  %v8094_v58 = vld [vmem:[#allocation9 + $0x8] ss:$12 sps:$4 sm:$0xff]  }
 0x3f3   :  { %6406 = vmatprep.subr.bf16.mxu1 %v8756_v31 }
 0x3f5   :  { %5656 = vmatpush3.bf16.msra.mxu0 %v7050_v55 }
 0x3f6   :  { %5657 = vmatprep.subr.bf16.mxu0 %v8755_v12  ;;  %6408 = vmatpush3.bf16.msra.mxu1 %v7731_v59  ;;  %v8100_v59 = vld [vmem:[#allocation9 + $0x20] ss:$12 sps:$4 sm:$0xff]  }
 0x3f7   :  { %6409 = vmatprep.subr.bf16.mxu1 %v8756_v31 }
 0x3f9   :  { %5658 = vmatpush3.bf16.msra.mxu0 %v7051_v56 }
 0x3fa   :  { %5659 = vmatprep.subr.bf16.mxu0 %v8755_v12  ;;  %6411 = vmatpush3.bf16.msra.mxu1 %v7737_v60  ;;  %v8104_v60 = vld [vmem:[#allocation9 + $0x38] ss:$12 sps:$4 sm:$0xff]  }
 0x3fb   :  { %6412 = vmatprep.subr.bf16.mxu1 %v8756_v31 }
 0x3fd   :  { %5660 = vmatpush3.bf16.msra.mxu0 %v7052_v57 }
 0x3fe   :  { %6367 = vmatprep.subr.bf16.mxu0 %v8756_v31  ;;  %6414 = vmatpush3.bf16.msra.mxu1 %v7743_v61  ;;  %v8108_v61 = vld [vmem:[#allocation9 + $0x50] ss:$12 sps:$4 sm:$0xff]  }
 0x3ff   :  { %5735 = vmatprep.subr.bf16.mxu1 %v8755_v12 }
 0x400   :  { %5662 = vmatmul.mubr.bf16.vlgmr.msra.gmra.mrb[24].mxu0 %v7998_v40  ;;  %v8112_v40 = vld [vmem:[#allocation9 + $0x68] ss:$12 sps:$4 sm:$0xff]  }
 0x401   :  { %6369 = vmatpush3.bf16.msra.mxu0 %v8094_v58  ;;  %5697 = vmatprep.mubr.msk.f32.mxu0 %vm7418_vm0, %v8755_v12 }
 0x402   :  { %6370 = vmatprep.subr.bf16.mxu0 %v8756_v31 }
 0x405   :  { %6372 = vmatpush3.bf16.msra.mxu0 %v8100_v59 }
 0x406   :  { %6373 = vmatprep.subr.bf16.mxu0 %v8756_v31 }
 0x409   :  { %6375 = vmatpush3.bf16.msra.mxu0 %v8104_v60 }
 0x40a   :  { %6376 = vmatprep.subr.bf16.mxu0 %v8756_v31 }
 0x40d   :  { %6378 = vmatpush3.bf16.msra.mxu0 %v8108_v61 }
 0x40e   :  { %6379 = vmatprep.subr.bf16.mxu0 %v8756_v31 }
 0x411   :  { %6381 = vmatpush3.bf16.msra.mxu0 %v8112_v40 }
 0x412   :  { %6382 = vmatprep.subr.bf16.mxu0 %v8756_v31 }
 0x415   :  { %6384 = vmatpush3.bf16.msra.mxu0 %v8116_v35 }
 0x416   :  { %6385 = vmatprep.subr.bf16.mxu0 %v8756_v31 }
 0x419   :  { %6387 = vmatpush3.bf16.msra.mxu0 %v8120_v46 }
 0x41a   :  { %6388 = vmatprep.subr.bf16.mxu0 %v8756_v31 }
 0x41d   :  { %6390 = vmatpush3.bf16.msra.mxu0 %v8124_v14 }
 0x41e   :  { %2681 = vmatprep.subr.bf16.mxu0 %v7947_v34 }
 0x420   :  { %5698 = vmatmul.mubr.f32.vlgmr.msra.gmra.mrb[22].mxu0 %v8061_v2 }
 0x421   :  { %2682 = vmatpush1.bf16.msra.mxu0 %v7949_v38  ;;  %2713 = vmatprep.mubr.bf16.mxu0 %v8757_v42 }
 0x422   :  { %2683 = vmatprep.subr.bf16.mxu0 %v7951_v41 }
 0x425   :  { %2684 = vmatpush1.bf16.msra.mxu0 %v7955_v44 }
 0x426   :  { %2685 = vmatprep.subr.bf16.mxu0 %v7958_v47 }
 0x429   :  { %2686 = vmatpush1.bf16.msra.mxu0 %v7961_v49 }
 0x42a   :  { %2687 = vmatprep.subr.bf16.mxu0 %v7965_v51 }
 0x42d   :  { %2688 = vmatpush1.bf16.msra.mxu0 %v7967_v52 }
 0x42e   :  { %2689 = vmatprep.subr.bf16.mxu0 %v7973_v1 }
 0x431   :  { %2690 = vmatpush1.bf16.msra.mxu0 %v7971_v28 }
 0x432   :  { %2691 = vmatprep.subr.bf16.mxu0 %v7975_v18 }
 0x435   :  { %2692 = vmatpush1.bf16.msra.mxu0 %v7979_v63 }
 0x436   :  { %2693 = vmatprep.subr.bf16.mxu0 %v7982_v54 }
 0x439   :  { %2694 = vmatpush1.bf16.msra.mxu0 %v7985_v48 }
 0x43a   :  { %2695 = vmatprep.subr.bf16.mxu0 %v7988_v24 }
 0x43d   :  { %2696 = vmatpush1.bf16.msra.mxu0 %v7991_v43 }
 0x43e   :  { %6416 = vmatprep.subr.bf16.mxu0 %v8000_v4 }
 0x440   :  { %2714 = vmatmul.mubr.bf16.vlgmr.msra.gmra.mrb[28].mxu0 %v8149_v9 }
 0x441   :  { %6418 = vmatpush1.bf16.msra.mxu0 %v8004_v5  ;;  %2874 = vmatprep.mubr.f32.mxu0 %v8755_v12 }
 0x442   :  { %6420 = vmatprep.subr.bf16.mxu0 %v8008_v6 }
 0x445   :  { %6422 = vmatpush1.bf16.msra.mxu0 %v8011_v7 }
 0x446   :  { %6424 = vmatprep.subr.bf16.mxu0 %v8014_v8 }
 0x449   :  { %6426 = vmatpush1.bf16.msra.mxu0 %v8017_v10 }
 0x44a   :  { %6428 = vmatprep.subr.bf16.mxu0 %v8020_v11 }
 0x44d   :  { %6430 = vmatpush1.bf16.msra.mxu0 %v8023_v17 }
 0x44e   :  { %6432 = vmatprep.subr.bf16.mxu0 %v8026_v22 }
 0x451   :  { %6434 = vmatpush1.bf16.msra.mxu0 %v8029_v23 }
 0x452   :  { %6436 = vmatprep.subr.bf16.mxu0 %v8032_v26 }
 0x455   :  { %6438 = vmatpush1.bf16.msra.mxu0 %v8035_v27 }
 0x456   :  { %6440 = vmatprep.subr.bf16.mxu0 %v8038_v32 }
 0x459   :  { %6442 = vmatpush1.bf16.msra.mxu0 %v8165_v0 }
 0x45a   :  { %6444 = vmatprep.subr.bf16.mxu0 %v8168_v20 }
 0x45d   :  { %6446 = vmatpush1.bf16.msra.mxu0 %v8171_v21 }
 0x45e   :  { %6471 = vmatprep.subr.bf16.mxu0 %v8756_v31 }
 0x4b3   :  { %v1944_v15 = vpop.f32.mrb[20].mxu0  ;;  %v2321_v19 = vpop.f32.mrb[24].mxu1 }
 0x4b4   :  { %v1945_v53 = vadd.f32 %v1944_v15, %v8779_v29  ;;  %v2322_v55 = vadd.f32 %v2321_v19, %v8771_v30  ;;  %v5644_v56 = vpop.f32.mrb[21].mxu0  ;;  %v2323_v57 = vpop.f32.mrb[25].mxu1 }
 0x4b5   :  { %v2324_v37 = vadd.f32 %v2323_v57, %v8780_v25 }
 0x4b6   :  { %v2396_v16 = vadd.f32 %v2322_v55, %v2161_v33  ;;  %v8182_v21 = vsel %vm836_vm1, %v1945_v53, -1e+30 }
 0x4b7   :  { %8782 = vst [vmem:[#allocation27_spill] sm:$0xff] %v8182_v21  ;;  %v2403_v0 = vadd.f32 %v2324_v37, %v2163_v45  ;;  %v1949_v50 = vsel %vm838_vm2, %v8182_v21, -inf }
 0x4b8   :  { %1950 = vmax.xlane.f32.xlu1 %v1949_v50  ;;  %v4882_v15 = vmul.f32 -1.442695, %v2396_v16 }
 0x4b9   :  { %v4883_v19 = vmul.f32 -1.442695, %v2403_v0 }
 0x4ba   :  { %7139 = vpow2.f32 %v4882_v15 }
 0x4bb   :  { %7141 = vpow2.f32 %v4883_v19 }
 0x4c4   :  { %v7140_v56 = vpop.eup %7139 }
 0x4c5   :  { %v2400_v57 = vadd.f32 1.0, %v7140_v56  ;;  %v7142_v33 = vpop.eup %7141  ;;  %v7053_v56 = vld [vmem:[#allocation6 + $0x8] ss:$12 sps:$4 sm:$0xff]  }
 0x4c6   :  { %v2407_v55 = vadd.f32 1.0, %v7142_v33  ;;  %v7054_v33 = vld [vmem:[#allocation6 + $0x20] ss:$12 sps:$4 sm:$0xff]  }
 0x4c7   :  { %7143 = vrcp.f32 %v2400_v57 }
 0x4c8   :  { %7145 = vrcp.f32 %v2407_v55  ;;  %v7056_v55 = vld [vmem:[#allocation6 + $0x50] ss:$12 sps:$4 sm:$0xff]  }
 0x4d1   :  { %v7144_v20 = vpop.eup %7143 }
 0x4d2   :  { %v7146_v16 = vpop.eup %7145 }
 0x4d3   :  { %v2201_v13 = vpop.f32.mrb[24].mxu0  ;;  %v2415_v19 = vmul.f32 %v7146_v16, %v8061_v2  ;;  %v7055_v2 = vld [vmem:[#allocation6 + $0x38] ss:$12 sps:$4 sm:$0xff]  }
 0x4d4   :  { %v5663_v39 = vpop.f32.mrb[25].mxu0  ;;  %v2202_v50 = vadd.f32 %v2201_v13, %v7772_v3  ;;  %v8203_v13 = vld [vmem:[#allocation11 + $0x8] sm:$0xff]  }
 0x4d5   :  { %v2204_v36 = vpop.f32.mrb[26].mxu0 }
 0x4d6   :  { %v5664_v29 = vpop.f32.mrb[27].mxu0 }
 0x4d7   :  { %v2413_v29 = vsub.f32 1.0, %v7146_v16  ;;  %v8223_v16 = vld [vmem:[#allocation11 + $0x28] sm:$0xff]  }
 0x4f3   :  { %v2392_v53 = vpop.f32.mrb[22].mxu0 }
 0x4f4   :  { %v2393_v45 = vadd.f32 %v2392_v53, %v7770_v62  ;;  %v5699_v37 = vpop.f32.mrb[23].mxu0  ;;  %v8208_v53 = vld [vmem:[#allocation11 + $0x10] sm:$0xff]  }
 0x4f5   :  { %v8213_v37 = vld [vmem:[#allocation11 + $0x18] sm:$0xff]  }
 0x4f6   :  { %v2410_v39 = vmul.f32 %v7144_v20, %v2393_v45  ;;  %v8196_v20 = vld [vmem:[#allocation11] sm:$0xff]   ;;  %v7057_v45 = vld [vmem:[#allocation6 + $0x68] ss:$12 sps:$4 sm:$0xff]  }
 0x4f8   :  { %v2411_v36 = vadd.f32 %v2410_v39, %v2202_v50  ;;  %v7058_v50 = vld [vmem:[#allocation6 + $0x80] ss:$12 sps:$4 sm:$0xff]  }
 0x4f9   :  { %v8218_v39 = vld [vmem:[#allocation11 + $0x20] sm:$0xff]  }
 0x4fa   :  { %7147 = vtanh.f32 %v2411_v36  ;;  %v7059_v36 = vld [vmem:[#allocation6 + $0x98] ss:$12 sps:$4 sm:$0xff]  }
 0x504   :  { %v7148_v0 = vpop.eup %7147 }
 0x505   :  { %v2414_v15 = vmul.f32 %v7148_v0, %v2413_v29  ;;  %v7060_v29 = vld [vmem:[#allocation6 + $0xb0] ss:$12 sps:$4 sm:$0xff]  }
 0x506   :  { %v8228_v0 = vld [vmem:[#allocation11 + $0x30] sm:$0xff]  }
 0x507   :  { %v8189_v57 = vadd.f32 %v2415_v19, %v2414_v15  ;;  %v8233_v15 = vld [vmem:[#allocation11 + $0x38] sm:$0xff]  }
 0x509   :  { %5733 = vmatmul.mubr.f32.vlgmr.msra.gmra.mrb[26].mxu1 %v8189_v57  ;;  %2875 = vmatmul.mubr.f32.vlgmr.msra.gmra.mrb[32].mxu0 %v8189_v57 }
 0x50a   :  { %5736 = vmatpush3.bf16.msra.mxu1 %v7053_v56  ;;  %5751 = vmatprep.mubr.msk.bf16.mxu1 %vm7418_vm0, %v8755_v12 }
 0x50b   :  { %5737 = vmatprep.subr.bf16.mxu1 %v8755_v12  ;;  %6473 = vmatpush3.bf16.msra.mxu0 %v8196_v20 }
 0x50c   :  { %6474 = vmatprep.subr.bf16.mxu0 %v8756_v31  ;;  %5822 = vmatprep.mubr.msk.f32.mxu0 %vm7418_vm0, %v8755_v12 }
 0x50e   :  { %5738 = vmatpush3.bf16.msra.mxu1 %v7054_v33 }
 0x50f   :  { %5739 = vmatprep.subr.bf16.mxu1 %v8755_v12  ;;  %6476 = vmatpush3.bf16.msra.mxu0 %v8203_v13 }
 0x510   :  { %6477 = vmatprep.subr.bf16.mxu0 %v8756_v31 }
 0x512   :  { %5740 = vmatpush3.bf16.msra.mxu1 %v7055_v2 }
 0x513   :  { %5741 = vmatprep.subr.bf16.mxu1 %v8755_v12  ;;  %6479 = vmatpush3.bf16.msra.mxu0 %v8208_v53  ;;  %v2715_v19 = vpop.f32.mrb[28].mxu0 }
 0x514   :  { %6480 = vmatprep.subr.bf16.mxu0 %v8756_v31  ;;  %v2717_v56 = vpop.f32.mrb[29].mxu0 }
 0x515   :  { %v2719_v33 = vpop.f32.mrb[30].mxu0 }
 0x516   :  { %5742 = vmatpush3.bf16.msra.mxu1 %v7056_v55  ;;  %v2720_v2 = vpop.f32.mrb[31].mxu0 }
 0x517   :  { %5743 = vmatprep.subr.bf16.mxu1 %v8755_v12  ;;  %6482 = vmatpush3.bf16.msra.mxu0 %v8213_v37 }
 0x518   :  { %6483 = vmatprep.subr.bf16.mxu0 %v8756_v31 }
 0x51a   :  { %5744 = vmatpush3.bf16.msra.mxu1 %v7057_v45 }
 0x51b   :  { %5745 = vmatprep.subr.bf16.mxu1 %v8755_v12  ;;  %6485 = vmatpush3.bf16.msra.mxu0 %v8218_v39 }
 0x51c   :  { %6486 = vmatprep.subr.bf16.mxu0 %v8756_v31 }
 0x51e   :  { %5746 = vmatpush3.bf16.msra.mxu1 %v7058_v50 }
 0x51f   :  { %5747 = vmatprep.subr.bf16.mxu1 %v8755_v12  ;;  %6488 = vmatpush3.bf16.msra.mxu0 %v8223_v16 }
 0x520   :  { %6489 = vmatprep.subr.bf16.mxu0 %v8756_v31 }
 0x522   :  { %5748 = vmatpush3.bf16.msra.mxu1 %v7059_v36 }
 0x523   :  { %5749 = vmatprep.subr.bf16.mxu1 %v8755_v12  ;;  %6491 = vmatpush3.bf16.msra.mxu0 %v8228_v0 }
 0x524   :  { %6492 = vmatprep.subr.bf16.mxu0 %v8756_v31 }
 0x526   :  { %5750 = vmatpush3.bf16.msra.mxu1 %v7060_v29 }
 0x527   :  { %6447 = vmatprep.subr.bf16.mxu1 %v8756_v31  ;;  %6494 = vmatpush3.bf16.msra.mxu0 %v8233_v15 }
 0x528   :  { %5825 = vmatprep.subr.bf16.mxu0 %v8755_v12 }
 0x529   :  { %5752 = vmatmul.mubr.bf16.vlgmr.msra.gmra.mrb[28].mxu1 %v8149_v9 }
 0x52a   :  { %6449 = vmatpush3.bf16.msra.mxu1 %v8094_v58  ;;  %5787 = vmatprep.mubr.msk.f32.mxu1 %vm7418_vm0, %v8755_v12 }
 0x52b   :  { %6450 = vmatprep.subr.bf16.mxu1 %v8756_v31 }
 0x52e   :  { %6452 = vmatpush3.bf16.msra.mxu1 %v8100_v59 }
 0x52f   :  { %6453 = vmatprep.subr.bf16.mxu1 %v8756_v31 }
 0x532   :  { %6455 = vmatpush3.bf16.msra.mxu1 %v8104_v60 }
 0x533   :  { %6456 = vmatprep.subr.bf16.mxu1 %v8756_v31 }
 0x536   :  { %6458 = vmatpush3.bf16.msra.mxu1 %v8108_v61 }
 0x537   :  { %6459 = vmatprep.subr.bf16.mxu1 %v8756_v31 }
 0x53a   :  { %6461 = vmatpush3.bf16.msra.mxu1 %v8112_v40 }
 0x53b   :  { %6462 = vmatprep.subr.bf16.mxu1 %v8756_v31 }
 0x53e   :  { %6464 = vmatpush3.bf16.msra.mxu1 %v8116_v35 }
 0x53f   :  { %6465 = vmatprep.subr.bf16.mxu1 %v8756_v31 }
 0x542   :  { %6467 = vmatpush3.bf16.msra.mxu1 %v8120_v46 }
 0x543   :  { %6468 = vmatprep.subr.bf16.mxu1 %v8756_v31 }
 0x546   :  { %6470 = vmatpush3.bf16.msra.mxu1 %v8124_v14 }
 0x547   :  { %3236 = vmatprep.subr.bf16.mxu1 %v7947_v34  ;;  %v8277_v34 = vld [vmem:[%s3074_s17] sm:$0x1] }
 0x549   :  { %5788 = vmatmul.mubr.f32.vlgmr.msra.gmra.mrb[32].mxu1 %v8189_v57 }
 0x54a   :  { %3237 = vmatpush1.bf16.msra.mxu1 %v7949_v38  ;;  %3268 = vmatprep.mubr.bf16.mxu1 %v8757_v42  ;;  %v8783_v38 = vld [vmem:[#allocation24_spill] sm:$0xff] }
 0x54b   :  { %3238 = vmatprep.subr.bf16.mxu1 %v7951_v41  ;;  %v8784_v41 = vld [vmem:[#allocation25_spill] sm:$0xff] }
 0x54e   :  { %3239 = vmatpush1.bf16.msra.mxu1 %v7955_v44  ;;  %v8785_v44 = vld [vmem:[#allocation26_spill] sm:$0xff] }
 0x54f   :  { %3240 = vmatprep.subr.bf16.mxu1 %v7958_v47  ;;  %v8786_v47 = vld [vmem:[#allocation30_spill] sm:$0xff] }
 0x552   :  { %3241 = vmatpush1.bf16.msra.mxu1 %v7961_v49  ;;  %v2716_v49 = vadd.f32 %v2715_v19, %v8786_v47 }
 0x553   :  { %3242 = vmatprep.subr.bf16.mxu1 %v7965_v51  ;;  %v8787_v51 = vld [vmem:[#allocation32_spill] sm:$0xff] }
 0x556   :  { %3243 = vmatpush1.bf16.msra.mxu1 %v7967_v52  ;;  %v2718_v52 = vadd.f32 %v2717_v56, %v8787_v51 }
 0x557   :  { %3244 = vmatprep.subr.bf16.mxu1 %v7973_v1 }
 0x55a   :  { %3245 = vmatpush1.bf16.msra.mxu1 %v7971_v28 }
 0x55b   :  { %3246 = vmatprep.subr.bf16.mxu1 %v7975_v18  ;;  %v8788_v18 = vld [vmem:[#allocation21_spill] sm:$0xff] }
 0x55e   :  { %3247 = vmatpush1.bf16.msra.mxu1 %v7979_v63 }
 0x55f   :  { %3248 = vmatprep.subr.bf16.mxu1 %v7982_v54 }
 0x562   :  { %3249 = vmatpush1.bf16.msra.mxu1 %v7985_v48 }
 0x563   :  { %3250 = vmatprep.subr.bf16.mxu1 %v7988_v24 }
 0x566   :  { %3251 = vmatpush1.bf16.msra.mxu1 %v7991_v43 }
 0x567   :  { %6496 = vmatprep.subr.bf16.mxu1 %v8000_v4 }
 0x569   :  { %3269 = vmatmul.mubr.bf16.vlgmr.msra.gmra.mrb[36].mxu1 %v8277_v34 }
 0x56a   :  { %6498 = vmatpush1.bf16.msra.mxu1 %v8004_v5  ;;  %3429 = vmatprep.mubr.f32.mxu1 %v8755_v12 }
 0x56b   :  { %6500 = vmatprep.subr.bf16.mxu1 %v8008_v6 }
 0x56e   :  { %6502 = vmatpush1.bf16.msra.mxu1 %v8011_v7 }
 0x56f   :  { %6504 = vmatprep.subr.bf16.mxu1 %v8014_v8 }
 0x572   :  { %6506 = vmatpush1.bf16.msra.mxu1 %v8017_v10 }
 0x573   :  { %6508 = vmatprep.subr.bf16.mxu1 %v8020_v11 }
 0x576   :  { %6510 = vmatpush1.bf16.msra.mxu1 %v8023_v17 }
 0x577   :  { %6512 = vmatprep.subr.bf16.mxu1 %v8026_v22 }
 0x57a   :  { %6514 = vmatpush1.bf16.msra.mxu1 %v8029_v23 }
 0x57b   :  { %6516 = vmatprep.subr.bf16.mxu1 %v8032_v26 }
 0x57e   :  { %6518 = vmatpush1.bf16.msra.mxu1 %v8035_v27 }
 0x57f   :  { %6520 = vmatprep.subr.bf16.mxu1 %v8038_v32 }
 0x582   :  { %6522 = vmatpush1.bf16.msra.mxu1 %v8783_v38 }
 0x583   :  { %6524 = vmatprep.subr.bf16.mxu1 %v8784_v41 }
 0x586   :  { %6526 = vmatpush1.bf16.msra.mxu1 %v8785_v44 }
 0x587   :  { %6551 = vmatprep.subr.bf16.mxu1 %v8756_v31 }
 0x5dc   :  { %v2499_v28 = vpop.f32.mrb[26].mxu1  ;;  %v2876_v1 = vpop.f32.mrb[32].mxu0 }
 0x5dd   :  { %v2500_v63 = vadd.f32 %v2499_v28, %v8788_v18  ;;  %v2877_v54 = vadd.f32 %v2876_v1, %v8771_v30  ;;  %v5734_v48 = vpop.f32.mrb[27].mxu1  ;;  %v2878_v24 = vpop.f32.mrb[33].mxu0 }
 0x5de   :  { %v2879_v43 = vadd.f32 %v2878_v24, %v8780_v25 }
 0x5df   :  { %v8304_v55 = vsel %vm836_vm1, %v2500_v63, -1e+30  ;;  %v2951_v45 = vadd.f32 %v2877_v54, %v2716_v49 }
 0x5e0   :  { %8790 = vst [vmem:[#allocation28_spill] sm:$0xff] %v8304_v55  ;;  %v2958_v50 = vadd.f32 %v2879_v43, %v2718_v52  ;;  %v2504_v36 = vsel %vm838_vm2, %v8304_v55, -inf }
 0x5e1   :  { %2505 = vmax.xlane.f32.xlu1 %v2504_v36  ;;  %v4909_v33 = vmul.f32 -1.442695, %v2951_v45 }
 0x5e2   :  { %v4910_v28 = vmul.f32 -1.442695, %v2958_v50 }
 0x5e3   :  { %7149 = vpow2.f32 %v4909_v33 }
 0x5e4   :  { %7151 = vpow2.f32 %v4910_v28  ;;  %v7061_v28 = vld [vmem:[#allocation6 + $0x8] ss:$12 sps:$4 sm:$0xff]  }
 0x5ed   :  { %v7150_v1 = vpop.eup %7149 }
 0x5ee   :  { %v2955_v18 = vadd.f32 1.0, %v7150_v1  ;;  %v7152_v48 = vpop.eup %7151 }
 0x5ef   :  { %v2962_v63 = vadd.f32 1.0, %v7152_v48  ;;  %v7065_v48 = vld [vmem:[#allocation6 + $0x68] ss:$12 sps:$4 sm:$0xff]  }
 0x5f0   :  { %7153 = vrcp.f32 %v2955_v18  ;;  %v7062_v18 = vld [vmem:[#allocation6 + $0x20] ss:$12 sps:$4 sm:$0xff]  }
 0x5f1   :  { %7155 = vrcp.f32 %v2962_v63  ;;  %v7066_v63 = vld [vmem:[#allocation6 + $0x80] ss:$12 sps:$4 sm:$0xff]  }
 0x5fa   :  { %v7154_v54 = vpop.eup %7153 }
 0x5fb   :  { %v7156_v45 = vpop.eup %7155 }
 0x5fc   :  { %v2756_v29 = vpop.f32.mrb[28].mxu1 }
 0x5fd   :  { %v5753_v19 = vpop.f32.mrb[29].mxu1  ;;  %v2757_v43 = vadd.f32 %v2756_v29, %v7772_v3  ;;  %v7064_v29 = vld [vmem:[#allocation6 + $0x50] ss:$12 sps:$4 sm:$0xff]  }
 0x5fe   :  { %v2759_v56 = vpop.f32.mrb[30].mxu1 }
 0x5ff   :  { %v5754_v2 = vpop.f32.mrb[31].mxu1  ;;  %v2968_v56 = vsub.f32 1.0, %v7156_v45 }
 0x600   :  { %v2970_v2 = vmul.f32 %v7156_v45, %v8189_v57  ;;  %v7063_v57 = vld [vmem:[#allocation6 + $0x38] ss:$12 sps:$4 sm:$0xff]   ;;  %v8371_v45 = vld [vmem:[#allocation6 + $0x1c] ss:$12 sps:$4 sm:$0xff]  }
 0x61c   :  { %v2947_v24 = vpop.f32.mrb[32].mxu1 }
 0x61d   :  { %v2948_v49 = vadd.f32 %v2947_v24, %v7770_v62  ;;  %v5789_v52 = vpop.f32.mrb[33].mxu1  ;;  %v7067_v24 = vld [vmem:[#allocation6 + $0x98] ss:$12 sps:$4 sm:$0xff]  }
 0x61f   :  { %v2965_v36 = vmul.f32 %v7154_v54, %v2948_v49  ;;  %v7068_v49 = vld [vmem:[#allocation6 + $0xb0] ss:$12 sps:$4 sm:$0xff]  }
 0x621   :  { %v2966_v19 = vadd.f32 %v2965_v36, %v2757_v43  ;;  %v8367_v36 = vld [vmem:[#allocation6 + $0x4] ss:$12 sps:$4 sm:$0xff]  }
 0x623   :  { %7157 = vtanh.f32 %v2966_v19  ;;  %v8369_v19 = vld [vmem:[#allocation6] ss:$12 sps:$4 sm:$0xff]  }
 0x62d   :  { %v7158_v50 = vpop.eup %7157 }
 0x62e   :  { %v2969_v33 = vmul.f32 %v7158_v50, %v2968_v56  ;;  %v8375_v56 = vld [vmem:[#allocation6 + $0x18] ss:$12 sps:$4 sm:$0xff]   ;;  %v8378_v50 = vld [vmem:[#allocation6 + $0x34] ss:$12 sps:$4 sm:$0xff]  }
 0x630   :  { %v8311_v1 = vadd.f32 %v2970_v2, %v2969_v33  ;;  %v8381_v33 = vld [vmem:[#allocation6 + $0x30] ss:$12 sps:$4 sm:$0xff]   ;;  %v8385_v2 = vld [vmem:[#allocation6 + $0x4c] ss:$12 sps:$4 sm:$0xff]  }
 0x632   :  { %5823 = vmatmul.mubr.f32.vlgmr.msra.gmra.mrb[34].mxu0 %v8311_v1  ;;  %3430 = vmatmul.mubr.f32.vlgmr.msra.gmra.mrb[34].mxu1 %v8311_v1 }
 0x633   :  { %5826 = vmatpush3.bf16.msra.mxu0 %v7061_v28  ;;  %5841 = vmatprep.mubr.msk.bf16.mxu0 %vm7418_vm0, %v8755_v12  ;;  %v8387_v28 = vld [vmem:[#allocation6 + $0x48] ss:$12 sps:$4 sm:$0xff]  }
 0x634   :  { %5827 = vmatprep.subr.bf16.mxu0 %v8755_v12  ;;  %6553 = vmatpush3.bf16.msra.mxu1 %v8196_v20 }
 0x635   :  { %6554 = vmatprep.subr.bf16.mxu1 %v8756_v31  ;;  %5912 = vmatprep.mubr.msk.f32.mxu1 %vm7418_vm0, %v8755_v12 }
 0x637   :  { %5828 = vmatpush3.bf16.msra.mxu0 %v7062_v18  ;;  %v8391_v18 = vld [vmem:[#allocation6 + $0x60] ss:$12 sps:$4 sm:$0xff]  }
 0x638   :  { %5829 = vmatprep.subr.bf16.mxu0 %v8755_v12  ;;  %6556 = vmatpush3.bf16.msra.mxu1 %v8203_v13 }
 0x639   :  { %6557 = vmatprep.subr.bf16.mxu1 %v8756_v31 }
 0x63b   :  { %5830 = vmatpush3.bf16.msra.mxu0 %v7063_v57  ;;  %v8393_v57 = vld [vmem:[#allocation6 + $0x64] ss:$12 sps:$4 sm:$0xff]  }
 0x63c   :  { %5831 = vmatprep.subr.bf16.mxu0 %v8755_v12  ;;  %6559 = vmatpush3.bf16.msra.mxu1 %v8208_v53  ;;  %v8350_v52 = vpop.f32.mrb[36].mxu1 }
 0x63d   :  { %6560 = vmatprep.subr.bf16.mxu1 %v8756_v31  ;;  %v8353_v54 = vpop.f32.mrb[37].mxu1 }
 0x63f   :  { %5832 = vmatpush3.bf16.msra.mxu0 %v7064_v29  ;;  %v8395_v29 = vld [vmem:[#allocation6 + $0x7c] ss:$12 sps:$4 sm:$0xff]  }
 0x640   :  { %5833 = vmatprep.subr.bf16.mxu0 %v8755_v12  ;;  %6562 = vmatpush3.bf16.msra.mxu1 %v8213_v37 }
 0x641   :  { %6563 = vmatprep.subr.bf16.mxu1 %v8756_v31 }
 0x643   :  { %5834 = vmatpush3.bf16.msra.mxu0 %v7065_v48  ;;  %v8399_v48 = vld [vmem:[#allocation6 + $0x78] ss:$12 sps:$4 sm:$0xff]  }
 0x644   :  { %5835 = vmatprep.subr.bf16.mxu0 %v8755_v12  ;;  %6565 = vmatpush3.bf16.msra.mxu1 %v8218_v39 }
 0x645   :  { %6566 = vmatprep.subr.bf16.mxu1 %v8756_v31 }
 0x647   :  { %5836 = vmatpush3.bf16.msra.mxu0 %v7066_v63  ;;  %v8402_v63 = vld [vmem:[#allocation6 + $0x94] ss:$12 sps:$4 sm:$0xff]  }
 0x648   :  { %5837 = vmatprep.subr.bf16.mxu0 %v8755_v12  ;;  %6568 = vmatpush3.bf16.msra.mxu1 %v8223_v16 }
 0x649   :  { %6569 = vmatprep.subr.bf16.mxu1 %v8756_v31 }
 0x64b   :  { %5838 = vmatpush3.bf16.msra.mxu0 %v7067_v24  ;;  %v8405_v24 = vld [vmem:[#allocation6 + $0x90] ss:$12 sps:$4 sm:$0xff]  }
 0x64c   :  { %5839 = vmatprep.subr.bf16.mxu0 %v8755_v12  ;;  %6571 = vmatpush3.bf16.msra.mxu1 %v8228_v0 }
 0x64d   :  { %6572 = vmatprep.subr.bf16.mxu1 %v8756_v31 }
 0x64f   :  { %5840 = vmatpush3.bf16.msra.mxu0 %v7068_v49  ;;  %v8408_v49 = vld [vmem:[#allocation6 + $0xac] ss:$12 sps:$4 sm:$0xff]  }
 0x650   :  { %6527 = vmatprep.subr.bf16.mxu0 %v8756_v31  ;;  %6574 = vmatpush3.bf16.msra.mxu1 %v8233_v15 }
 0x651   :  { %5915 = vmatprep.subr.bf16.mxu1 %v8755_v12 }
 0x652   :  { %5842 = vmatmul.mubr.bf16.vlgmr.msra.gmra.mrb[36].mxu0 %v8277_v34  ;;  %v3274_v34 = vpop.f32.mrb[38].mxu1 }
 0x653   :  { %6529 = vmatpush3.bf16.msra.mxu0 %v8094_v58  ;;  %5877 = vmatprep.mubr.msk.f32.mxu0 %vm7418_vm0, %v8755_v12  ;;  %v3275_v43 = vpop.f32.mrb[39].mxu1  ;;  %v8411_v34 = vld [vmem:[#allocation6 + $0xa8] ss:$12 sps:$4 sm:$0xff]  }
 0x654   :  { %6530 = vmatprep.subr.bf16.mxu0 %v8756_v31  ;;  %v8418_v43 = vld [vmem:[%s3629_s21] sm:$0x1] }
 0x657   :  { %6532 = vmatpush3.bf16.msra.mxu0 %v8100_v59 }
 0x658   :  { %6533 = vmatprep.subr.bf16.mxu0 %v8756_v31 }
 0x65b   :  { %6535 = vmatpush3.bf16.msra.mxu0 %v8104_v60 }
 0x65c   :  { %6536 = vmatprep.subr.bf16.mxu0 %v8756_v31 }
 0x65f   :  { %6538 = vmatpush3.bf16.msra.mxu0 %v8108_v61 }
 0x660   :  { %6539 = vmatprep.subr.bf16.mxu0 %v8756_v31 }
 0x663   :  { %6541 = vmatpush3.bf16.msra.mxu0 %v8112_v40 }
 0x664   :  { %6542 = vmatprep.subr.bf16.mxu0 %v8756_v31 }
 0x667   :  { %6544 = vmatpush3.bf16.msra.mxu0 %v8116_v35 }
 0x668   :  { %6545 = vmatprep.subr.bf16.mxu0 %v8756_v31 }
 0x66b   :  { %6547 = vmatpush3.bf16.msra.mxu0 %v8120_v46 }
 0x66c   :  { %6548 = vmatprep.subr.bf16.mxu0 %v8756_v31 }
 0x66f   :  { %6550 = vmatpush3.bf16.msra.mxu0 %v8124_v14 }
 0x670   :  { %3791 = vmatprep.subr.bf16.mxu0 %v8367_v36 }
 0x672   :  { %5878 = vmatmul.mubr.f32.vlgmr.msra.gmra.mrb[40].mxu0 %v8311_v1 }
 0x673   :  { %3823 = vmatprep.mubr.bf16.mxu0 %v8757_v42  ;;  %3792 = vmatpush1.bf16.msra.mxu0 %v8369_v19 }
 0x674   :  { %3793 = vmatprep.subr.bf16.mxu0 %v8371_v45 }
 0x677   :  { %3794 = vmatpush1.bf16.msra.mxu0 %v8375_v56 }
 0x678   :  { %3795 = vmatprep.subr.bf16.mxu0 %v8378_v50 }
 0x67b   :  { %3796 = vmatpush1.bf16.msra.mxu0 %v8381_v33 }
 0x67c   :  { %3797 = vmatprep.subr.bf16.mxu0 %v8385_v2 }
 0x67f   :  { %3798 = vmatpush1.bf16.msra.mxu0 %v8387_v28 }
 0x680   :  { %3799 = vmatprep.subr.bf16.mxu0 %v8393_v57 }
 0x683   :  { %3800 = vmatpush1.bf16.msra.mxu0 %v8391_v18 }
 0x684   :  { %3801 = vmatprep.subr.bf16.mxu0 %v8395_v29 }
 0x687   :  { %3802 = vmatpush1.bf16.msra.mxu0 %v8399_v48 }
 0x688   :  { %3803 = vmatprep.subr.bf16.mxu0 %v8402_v63 }
 0x68b   :  { %3804 = vmatpush1.bf16.msra.mxu0 %v8405_v24 }
 0x68c   :  { %3805 = vmatprep.subr.bf16.mxu0 %v8408_v49 }
 0x68f   :  { %3806 = vmatpush1.bf16.msra.mxu0 %v8411_v34 }
 0x690   :  { %6576 = vmatprep.subr.bf16.mxu0 %v8000_v4  ;;  %v3271_v4 = vadd.f32 %v8350_v52, %v8786_v47 }
 0x692   :  { %3824 = vmatmul.mubr.bf16.vlgmr.msra.gmra.mrb[44].mxu0 %v8418_v43 }
 0x693   :  { %6578 = vmatpush1.bf16.msra.mxu0 %v8004_v5  ;;  %3984 = vmatprep.mubr.f32.mxu0 %v8755_v12  ;;  %v3273_v5 = vadd.f32 %v8353_v54, %v8787_v51 }
 0x694   :  { %6580 = vmatprep.subr.bf16.mxu0 %v8008_v6 }
 0x697   :  { %6582 = vmatpush1.bf16.msra.mxu0 %v8011_v7 }
 0x698   :  { %6584 = vmatprep.subr.bf16.mxu0 %v8014_v8  ;;  %v8446_v8 = vld [vmem:[%s8688_s8] sm:$0x1]  ;;  %s4965_s8 = sld [smem:[#allocation5 + $0x7]] }
 0x699   :  { %8791 = vst [vmem:[#allocation29_spill] sm:$0xff] %v8446_v8 }
 0x69b   :  { %6586 = vmatpush1.bf16.msra.mxu0 %v8017_v10 }
 0x69c   :  { %6588 = vmatprep.subr.bf16.mxu0 %v8020_v11 }
 0x69e   :  { %s4184_s24 = scalar_lea.vmem %s8681_s1, %s4965_s8  ;;  %s7420_s1 = smov [#allocation13]  }
 0x69f   :  { %6590 = vmatpush1.bf16.msra.mxu0 %v8023_v17  ;;  %s4755_s5 = sshll.u32 %s7420_s1, 4  ;;  %s4756_s5 = int_to_ptr.vmem [resolvable:$true] %s4755_s5 }
 0x6a0   :  { %6592 = vmatprep.subr.bf16.mxu0 %v8026_v22  ;;  %s7354_s6 = scalar_lea.vmem %s4756_s5, 16  ;;  %s7358_s25 = scalar_lea.vmem %s4756_s5, 32 }
 0x6a1   :  { %p7355_p1 = scmp.ne.s32.totalorder %s4756_s5, %s7354_s6  ;;  %p7359_p2 = scmp.lt.s32.totalorder %s4756_s5, %s4756_s5 }
 0x6a2   :  { %p7360_p3 = scmp.lt.s32.totalorder %s7358_s25, %s7354_s6 }
 0x6a3   :  { %6594 = vmatpush1.bf16.msra.mxu0 %v8029_v23 }
 0x6a4   :  { %6596 = vmatprep.subr.bf16.mxu0 %v8032_v26  ;;  %p7361_p4 = por %p7360_p3, %p7359_p2 }
 0x6a6   :  { %p7362_p5 = pnand %p7361_p4, %p7355_p1 }
 0x6a7   :  { %6598 = vmatpush1.bf16.msra.mxu0 %v8035_v27 }
 0x6a8   :  { %6600 = vmatprep.subr.bf16.mxu0 %v8038_v32 }
 0x6ab   :  { %6602 = vmatpush1.bf16.msra.mxu0 %v8783_v38 }
 0x6ac   :  { %6604 = vmatprep.subr.bf16.mxu0 %v8784_v41 }
 0x6af   :  { %6606 = vmatpush1.bf16.msra.mxu0 %v8785_v44 }
 0x6b0   :  { %6631 = vmatprep.subr.bf16.mxu0 %v8756_v31 }
 0x705   :  { %v3054_v6 = vpop.f32.mrb[34].mxu0  ;;  %v3431_v7 = vpop.f32.mrb[34].mxu1 }
 0x706   :  { %v3055_v10 = vadd.f32 %v8446_v8, %v3054_v6  ;;  %v3432_v11 = vadd.f32 %v3431_v7, %v8771_v30  ;;  %v5824_v17 = vpop.f32.mrb[35].mxu0  ;;  %v3433_v22 = vpop.f32.mrb[35].mxu1 }
 0x707   :  { %v3434_v23 = vadd.f32 %v3433_v22, %v8780_v25 }
 0x708   :  { %v8453_v26 = vsel %vm836_vm1, %v3055_v10, -1e+30  ;;  %v3506_v27 = vadd.f32 %v3432_v11, %v3271_v4 }
 0x709   :  { %v3513_v32 = vadd.f32 %v3434_v23, %v3273_v5  ;;  %v3059_v52 = vsel %vm838_vm2, %v8453_v26, -inf }
 0x70a   :  { %3060 = vmax.xlane.f32.xlu0 %v3059_v52  ;;  %v4936_v6 = vmul.f32 -1.442695, %v3506_v27 }
 0x70b   :  { %v4937_v7 = vmul.f32 -1.442695, %v3513_v32 }
 0x70c   :  { %7159 = vpow2.f32 %v4936_v6 }
 0x70d   :  { %7161 = vpow2.f32 %v4937_v7  ;;  %v7093_v7 = vld [vmem:[#allocation6 + $0x8] ss:$12 sps:$4 sm:$0xff]  }
 0x716   :  { %v7160_v17 = vpop.eup %7159 }
 0x717   :  { %v3510_v22 = vadd.f32 1.0, %v7160_v17  ;;  %v7162_v9 = vpop.eup %7161 }
 0x718   :  { %v3517_v10 = vadd.f32 1.0, %v7162_v9  ;;  %v7095_v9 = vld [vmem:[#allocation6 + $0x38] ss:$12 sps:$4 sm:$0xff]  }
 0x719   :  { %7163 = vrcp.f32 %v3510_v22  ;;  %v7098_v22 = vld [vmem:[#allocation6 + $0x80] ss:$12 sps:$4 sm:$0xff]  }
 0x71a   :  { %7165 = vrcp.f32 %v3517_v10  ;;  %v7099_v10 = vld [vmem:[#allocation6 + $0x98] ss:$12 sps:$4 sm:$0xff]  }
 0x723   :  { %v7164_v11 = vpop.eup %7163 }
 0x725   :  { %v3311_v54 = vpop.f32.mrb[36].mxu0 }
 0x726   :  { %v5843_v55 = vpop.f32.mrb[37].mxu0  ;;  %v3312_v23 = vadd.f32 %v3311_v54, %v7772_v3  ;;  %v7097_v54 = vld [vmem:[#allocation6 + $0x68] ss:$12 sps:$4 sm:$0xff]  }
 0x727   :  { %v3314_v21 = vpop.f32.mrb[38].mxu0 }
 0x728   :  { %v5844_v8 = vpop.f32.mrb[39].mxu0 }
 0x729   :  { %v7166_v8 = vpop.eup %7165 }
 0x72a   :  { %v3523_v27 = vsub.f32 1.0, %v7166_v8  ;;  %v3525_v6 = vmul.f32 %v7166_v8, %v8311_v1  ;;  %v7096_v1 = vld [vmem:[#allocation6 + $0x50] ss:$12 sps:$4 sm:$0xff]  }
 0x745   :  { %v3502_v25 = vpop.f32.mrb[40].mxu0 }
 0x746   :  { %v3503_v4 = vadd.f32 %v3502_v25, %v7770_v62  ;;  %v5879_v5 = vpop.f32.mrb[41].mxu0  ;;  %v7094_v25 = vld [vmem:[#allocation6 + $0x20] ss:$12 sps:$4 sm:$0xff]  }
 0x748   :  { %v3520_v55 = vmul.f32 %v7164_v11, %v3503_v4  ;;  %v7100_v4 = vld [vmem:[#allocation6 + $0xb0] ss:$12 sps:$4 sm:$0xff]  }
 0x749   :  { %v8793_v11 = vld [vmem:[#allocation33_spill] sm:$0xff] }
 0x74a   :  { %v3521_v21 = vadd.f32 %v3520_v55, %v3312_v23 }
 0x74c   :  { %7167 = vtanh.f32 %v3521_v21 }
 0x756   :  { %v7168_v32 = vpop.eup %7167 }
 0x757   :  { %v3524_v52 = vmul.f32 %v7168_v32, %v3523_v27 }
 0x759   :  { %v8460_v17 = vadd.f32 %v3525_v6, %v3524_v52 }
 0x75b   :  { %5913 = vmatmul.mubr.f32.vlgmr.msra.gmra.mrb[40].mxu1 %v8460_v17  ;;  %3985 = vmatmul.mubr.f32.vlgmr.msra.gmra.mrb[42].mxu0 %v8460_v17 }
 0x75c   :  { %5916 = vmatpush3.bf16.msra.mxu1 %v7093_v7  ;;  %5931 = vmatprep.mubr.msk.bf16.mxu1 %vm7418_vm0, %v8755_v12 }
 0x75d   :  { %5917 = vmatprep.subr.bf16.mxu1 %v8755_v12  ;;  %6633 = vmatpush3.bf16.msra.mxu0 %v8196_v20 }
 0x75e   :  { %6634 = vmatprep.subr.bf16.mxu0 %v8756_v31  ;;  %6002 = vmatprep.mubr.msk.f32.mxu0 %vm7418_vm0, %v8755_v12 }
 0x760   :  { %5918 = vmatpush3.bf16.msra.mxu1 %v7094_v25 }
 0x761   :  { %5919 = vmatprep.subr.bf16.mxu1 %v8755_v12  ;;  %6636 = vmatpush3.bf16.msra.mxu0 %v8203_v13 }
 0x762   :  { %6637 = vmatprep.subr.bf16.mxu0 %v8756_v31 }
 0x764   :  { %5920 = vmatpush3.bf16.msra.mxu1 %v7095_v9 }
 0x765   :  { %5921 = vmatprep.subr.bf16.mxu1 %v8755_v12  ;;  %6639 = vmatpush3.bf16.msra.mxu0 %v8208_v53 }
 0x766   :  { %6640 = vmatprep.subr.bf16.mxu0 %v8756_v31 }
 0x768   :  { %5922 = vmatpush3.bf16.msra.mxu1 %v7096_v1 }
 0x769   :  { %5923 = vmatprep.subr.bf16.mxu1 %v8755_v12  ;;  %6642 = vmatpush3.bf16.msra.mxu0 %v8213_v37 }
 0x76a   :  { %6643 = vmatprep.subr.bf16.mxu0 %v8756_v31 }
 0x76c   :  { %5924 = vmatpush3.bf16.msra.mxu1 %v7097_v54 }
 0x76d   :  { %5925 = vmatprep.subr.bf16.mxu1 %v8755_v12  ;;  %6645 = vmatpush3.bf16.msra.mxu0 %v8218_v39 }
 0x76e   :  { %6646 = vmatprep.subr.bf16.mxu0 %v8756_v31 }
 0x770   :  { %5926 = vmatpush3.bf16.msra.mxu1 %v7098_v22 }
 0x771   :  { %5927 = vmatprep.subr.bf16.mxu1 %v8755_v12  ;;  %6648 = vmatpush3.bf16.msra.mxu0 %v8223_v16 }
 0x772   :  { %6649 = vmatprep.subr.bf16.mxu0 %v8756_v31 }
 0x774   :  { %5928 = vmatpush3.bf16.msra.mxu1 %v7099_v10 }
 0x775   :  { %5929 = vmatprep.subr.bf16.mxu1 %v8755_v12  ;;  %6651 = vmatpush3.bf16.msra.mxu0 %v8228_v0 }
 0x776   :  { %6652 = vmatprep.subr.bf16.mxu0 %v8756_v31 }
 0x778   :  { %5930 = vmatpush3.bf16.msra.mxu1 %v7100_v4 }
 0x779   :  { %6607 = vmatprep.subr.bf16.mxu1 %v8756_v31  ;;  %6654 = vmatpush3.bf16.msra.mxu0 %v8233_v15 }
 0x77a   :  { %6005 = vmatprep.subr.bf16.mxu0 %v8755_v12 }
 0x77b   :  { %5932 = vmatmul.mubr.bf16.vlgmr.msra.gmra.mrb[44].mxu1 %v8418_v43 }
 0x77c   :  { %6609 = vmatpush3.bf16.msra.mxu1 %v8094_v58  ;;  %5967 = vmatprep.mubr.msk.f32.mxu1 %vm7418_vm0, %v8755_v12  ;;  %v3825_v58 = vpop.f32.mrb[44].mxu0 }
 0x77d   :  { %6610 = vmatprep.subr.bf16.mxu1 %v8756_v31  ;;  %v3827_v43 = vpop.f32.mrb[45].mxu0 }
 0x77e   :  { %v3829_v5 = vpop.f32.mrb[46].mxu0 }
 0x780   :  { %6612 = vmatpush3.bf16.msra.mxu1 %v8100_v59  ;;  %v3830_v59 = vpop.f32.mrb[47].mxu0 }
 0x781   :  { %6613 = vmatprep.subr.bf16.mxu1 %v8756_v31 }
 0x784   :  { %6615 = vmatpush3.bf16.msra.mxu1 %v8104_v60  ;;  %v8531_v60 = vld [vmem:[%s4184_s24] sm:$0x1] }
 0x785   :  { %6616 = vmatprep.subr.bf16.mxu1 %v8756_v31 }
 0x788   :  { %6618 = vmatpush3.bf16.msra.mxu1 %v8108_v61  ;;  %v7256_v61 = vld [vmem:[#allocation9] ss:$12 sps:$4 sm:$0xff]  }
 0x789   :  { %6619 = vmatprep.subr.bf16.mxu1 %v8756_v31 }
 0x78c   :  { %6621 = vmatpush3.bf16.msra.mxu1 %v8112_v40  ;;  %v7257_v40 = vld [vmem:[#allocation9 + $0x1c] ss:$12 sps:$4 sm:$0xff]  }
 0x78d   :  { %6622 = vmatprep.subr.bf16.mxu1 %v8756_v31 }
 0x790   :  { %6624 = vmatpush3.bf16.msra.mxu1 %v8116_v35  ;;  %v7258_v35 = vld [vmem:[#allocation9 + $0x18] ss:$12 sps:$4 sm:$0xff]  }
 0x791   :  { %6625 = vmatprep.subr.bf16.mxu1 %v8756_v31 }
 0x794   :  { %6627 = vmatpush3.bf16.msra.mxu1 %v8120_v46  ;;  %v7259_v46 = vld [vmem:[#allocation9 + $0x34] ss:$12 sps:$4 sm:$0xff]  }
 0x795   :  { %6628 = vmatprep.subr.bf16.mxu1 %v8756_v31 }
 0x798   :  { %6630 = vmatpush3.bf16.msra.mxu1 %v8124_v14  ;;  %v7260_v14 = vld [vmem:[#allocation9 + $0x30] ss:$12 sps:$4 sm:$0xff]  }
 0x799   :  { %4346 = vmatprep.subr.bf16.mxu1 %v8367_v36  ;;  %v7261_v36 = vld [vmem:[#allocation9 + $0x4c] ss:$12 sps:$4 sm:$0xff]  }
 0x79b   :  { %5968 = vmatmul.mubr.f32.vlgmr.msra.gmra.mrb[42].mxu1 %v8460_v17 }
 0x79c   :  { %4347 = vmatpush1.bf16.msra.mxu1 %v8369_v19  ;;  %4378 = vmatprep.mubr.bf16.mxu1 %v8757_v42  ;;  %v7255_v42 = vld [vmem:[#allocation9 + $0x4] ss:$12 sps:$4 sm:$0xff]   ;;  %v7262_v19 = vld [vmem:[#allocation9 + $0x48] ss:$12 sps:$4 sm:$0xff]  }
 0x79d   :  { %4348 = vmatprep.subr.bf16.mxu1 %v8371_v45  ;;  %v7263_v45 = vld [vmem:[#allocation9 + $0x64] ss:$12 sps:$4 sm:$0xff]  }
 0x7a0   :  { %4349 = vmatpush1.bf16.msra.mxu1 %v8375_v56  ;;  %v7264_v56 = vld [vmem:[#allocation9 + $0x60] ss:$12 sps:$4 sm:$0xff]  }
 0x7a1   :  { %4350 = vmatprep.subr.bf16.mxu1 %v8378_v50  ;;  %v7265_v50 = vld [vmem:[#allocation9 + $0x7c] ss:$12 sps:$4 sm:$0xff]  }
 0x7a4   :  { %4351 = vmatpush1.bf16.msra.mxu1 %v8381_v33  ;;  %v7266_v33 = vld [vmem:[#allocation9 + $0x78] ss:$12 sps:$4 sm:$0xff]  }
 0x7a5   :  { %4352 = vmatprep.subr.bf16.mxu1 %v8385_v2  ;;  %v7267_v2 = vld [vmem:[#allocation9 + $0x94] ss:$12 sps:$4 sm:$0xff]  }
 0x7a8   :  { %4353 = vmatpush1.bf16.msra.mxu1 %v8387_v28  ;;  %v3826_v28 = vadd.f32 %v3825_v58, %v8786_v47 }
 0x7a9   :  { %4354 = vmatprep.subr.bf16.mxu1 %v8393_v57 }
 0x7ac   :  { %4355 = vmatpush1.bf16.msra.mxu1 %v8391_v18  ;;  %v3828_v18 = vadd.f32 %v3827_v43, %v8787_v51 }
 0x7ad   :  { %4356 = vmatprep.subr.bf16.mxu1 %v8395_v29 }
 0x7b0   :  { %4357 = vmatpush1.bf16.msra.mxu1 %v8399_v48  ;;  %v8792_v48 = vld [vmem:[#allocation29_spill] sm:$0xff] }
 0x7b1   :  { %4358 = vmatprep.subr.bf16.mxu1 %v8402_v63 }
 0x7b4   :  { %4359 = vmatpush1.bf16.msra.mxu1 %v8405_v24 }
 0x7b5   :  { %4360 = vmatprep.subr.bf16.mxu1 %v8408_v49 }
 0x7b8   :  { %4361 = vmatpush1.bf16.msra.mxu1 %v8411_v34 }
 0x7b9   :  { %6656 = vmatprep.subr.bf16.mxu1 %v7255_v42 }
 0x7bb   :  { %4379 = vmatmul.mubr.bf16.vlgmr.msra.gmra.mrb[48].mxu1 %v8531_v60 }
 0x7bc   :  { %6658 = vmatpush1.bf16.msra.mxu1 %v7256_v61  ;;  %4539 = vmatprep.mubr.f32.mxu1 %v8755_v12 }
 0x7bd   :  { %6660 = vmatprep.subr.bf16.mxu1 %v7257_v40 }
 0x7c0   :  { %6662 = vmatpush1.bf16.msra.mxu1 %v7258_v35 }
 0x7c1   :  { %6664 = vmatprep.subr.bf16.mxu1 %v7259_v46 }
 0x7c4   :  { %6666 = vmatpush1.bf16.msra.mxu1 %v7260_v14  ;;  %v7101_v14 = vld [vmem:[#allocation6 + $0x8] ss:$12 sps:$4 sm:$0xff]  }
 0x7c5   :  { %6668 = vmatprep.subr.bf16.mxu1 %v7261_v36 }
 0x7c8   :  { %6670 = vmatpush1.bf16.msra.mxu1 %v7262_v19  ;;  %v7102_v19 = vld [vmem:[#allocation6 + $0x20] ss:$12 sps:$4 sm:$0xff]  }
 0x7c9   :  { %6672 = vmatprep.subr.bf16.mxu1 %v7263_v45  ;;  %v7104_v45 = vld [vmem:[#allocation6 + $0x50] ss:$12 sps:$4 sm:$0xff]  }
 0x7cc   :  { %6674 = vmatpush1.bf16.msra.mxu1 %v7264_v56  ;;  %v7270_v56 = vld [vmem:[#allocation9 + $0x38] ss:$12 sps:$4 sm:$0xff]  }
 0x7cd   :  { %6676 = vmatprep.subr.bf16.mxu1 %v7265_v50 }
 0x7d0   :  { %6678 = vmatpush1.bf16.msra.mxu1 %v7266_v33 }
 0x7d1   :  { %6680 = vmatprep.subr.bf16.mxu1 %v7267_v2  ;;  %v7272_v2 = vld [vmem:[#allocation9 + $0x68] ss:$12 sps:$4 sm:$0xff]  }
 0x7d4   :  { %6682 = vmatpush1.bf16.msra.mxu1 %v8783_v38 }
 0x7d5   :  { %6684 = vmatprep.subr.bf16.mxu1 %v8784_v41 }
 0x7d8   :  { %6686 = vmatpush1.bf16.msra.mxu1 %v8785_v44 }
 0x7d9   :  { %6711 = vmatprep.subr.bf16.mxu1 %v8756_v31 }
 0x82e   :  { %v3609_v57 = vpop.f32.mrb[40].mxu1  ;;  %v3986_v29 = vpop.f32.mrb[42].mxu0 }
 0x82f   :  { %v3610_v63 = vadd.f32 %v8792_v48, %v3609_v57  ;;  %v3987_v24 = vadd.f32 %v3986_v29, %v8771_v30  ;;  %v5914_v49 = vpop.f32.mrb[41].mxu1  ;;  %v3988_v34 = vpop.f32.mrb[43].mxu0  ;;  %v8795_v29 = vld [vmem:[#allocation22_spill] sm:$0xff] }
 0x830   :  { %v3989_v38 = vadd.f32 %v3988_v34, %v8793_v11  ;;  %v8595_v57 = vpop.xlane.xlu0 %840  ;;  %v8601_v49 = vpop.xlane.xlu1 %1950 }
 0x831   :  { %v8546_v41 = vsel %vm836_vm1, %v3610_v63, -1e+30  ;;  %v4061_v44 = vadd.f32 %v3987_v24, %v3826_v28  ;;  %v7274_v28 = vld [vmem:[#allocation9 + $0x98] ss:$12 sps:$4 sm:$0xff]   ;;  %v842_v63 = vsub.f32 %v8795_v29, %v8595_v57 }
 0x832   :  { %v4068_v55 = vadd.f32 %v3989_v38, %v3828_v18  ;;  %v3614_v21 = vsel %vm838_vm2, %v8546_v41, -inf  ;;  %v7275_v18 = vld [vmem:[#allocation9 + $0xb0] ss:$12 sps:$4 sm:$0xff]   ;;  %v8796_v38 = vld [vmem:[#allocation27_spill] sm:$0xff] }
 0x833   :  { %3615 = vmax.xlane.f32.xlu1 %v3614_v21  ;;  %v4963_v52 = vmul.f32 -1.442695, %v4061_v44  ;;  %v843_v34 = vmul.f32 1.442695, %v842_v63  ;;  %v1952_v44 = vsub.f32 %v8796_v38, %v8601_v49 }
 0x834   :  { %v4964_v7 = vmul.f32 -1.442695, %v4068_v55  ;;  %v8599_v24 = vpop.xlane.xlu0 %1395 }
 0x835   :  { %7169 = vpow2.f32 %v4963_v52 }
 0x836   :  { %7171 = vpow2.f32 %v4964_v7 }
 0x838   :  { %v8605_v55 = vpop.xlane.xlu0 %3060 }
 0x839   :  { %v3062_v21 = vsub.f32 %v8453_v26, %v8605_v55 }
 0x83f   :  { %v7170_v25 = vpop.eup %7169 }
 0x840   :  { %v4065_v9 = vadd.f32 1.0, %v7170_v25  ;;  %v7172_v1 = vpop.eup %7171 }
 0x841   :  { %v4072_v54 = vadd.f32 1.0, %v7172_v1 }
 0x842   :  { %7173 = vrcp.f32 %v4065_v9 }
 0x843   :  { %7175 = vrcp.f32 %v4072_v54 }
 0x84c   :  { %v7174_v58 = vpop.eup %7173 }
 0x84d   :  { %v7176_v42 = vpop.eup %7175 }
 0x84e   :  { %v3866_v8 = vpop.f32.mrb[44].mxu1  ;;  %v4078_v61 = vsub.f32 1.0, %v7176_v42  ;;  %v4080_v46 = vmul.f32 %v7176_v42, %v8460_v17  ;;  %v7103_v17 = vld [vmem:[#allocation6 + $0x38] ss:$12 sps:$4 sm:$0xff]  }
 0x84f   :  { %v5933_v27 = vpop.f32.mrb[45].mxu1  ;;  %v3867_v43 = vadd.f32 %v3866_v8, %v7772_v3  ;;  %v3063_v8 = vmul.f32 1.442695, %v3062_v21 }
 0x850   :  { %v3869_v32 = vpop.f32.mrb[46].mxu1 }
 0x851   :  { %v5934_v6 = vpop.f32.mrb[47].mxu1 }
 0x86e   :  { %v4057_v22 = vpop.f32.mrb[42].mxu1 }
 0x86f   :  { %v4058_v10 = vadd.f32 %v4057_v22, %v7770_v62  ;;  %v5969_v4 = vpop.f32.mrb[43].mxu1 }
 0x871   :  { %v4075_v5 = vmul.f32 %v7174_v58, %v4058_v10 }
 0x873   :  { %v4076_v59 = vadd.f32 %v4075_v5, %v3867_v43 }
 0x875   :  { %7177 = vtanh.f32 %v4076_v59 }
 0x876   :  { %7179 = vpow2.f32 %v843_v34 }
 0x87f   :  { %v7178_v40 = vpop.eup %7177 }
 0x880   :  { %v4079_v35 = vmul.f32 %v7178_v40, %v4078_v61 }
 0x882   :  { %v8553_v36 = vadd.f32 %v4080_v46, %v4079_v35 }
 0x884   :  { %6003 = vmatmul.mubr.f32.vlgmr.msra.gmra.mrb[48].mxu0 %v8553_v36  ;;  %4540 = vmatmul.mubr.f32.vlgmr.msra.gmra.mrb[52].mxu1 %v8553_v36 }
 0x885   :  { %6006 = vmatpush3.bf16.msra.mxu0 %v7101_v14  ;;  %6021 = vmatprep.mubr.msk.bf16.mxu0 %vm7418_vm0, %v8755_v12 }
 0x886   :  { %6007 = vmatprep.subr.bf16.mxu0 %v8755_v12  ;;  %6713 = vmatpush3.bf16.msra.mxu1 %v8196_v20  ;;  %v7105_v20 = vld [vmem:[#allocation6 + $0x68] ss:$12 sps:$4 sm:$0xff]  }
 0x887   :  { %6714 = vmatprep.subr.bf16.mxu1 %v8756_v31  ;;  %6092 = vmatprep.mubr.msk.f32.mxu1 %vm7418_vm0, %v8755_v12 }
 0x889   :  { %6008 = vmatpush3.bf16.msra.mxu0 %v7102_v19 }
 0x88a   :  { %6009 = vmatprep.subr.bf16.mxu0 %v8755_v12  ;;  %6716 = vmatpush3.bf16.msra.mxu1 %v8203_v13  ;;  %v7106_v13 = vld [vmem:[#allocation6 + $0x80] ss:$12 sps:$4 sm:$0xff]  }
 0x88b   :  { %6717 = vmatprep.subr.bf16.mxu1 %v8756_v31 }
 0x88d   :  { %6010 = vmatpush3.bf16.msra.mxu0 %v7103_v17 }
 0x88e   :  { %6011 = vmatprep.subr.bf16.mxu0 %v8755_v12  ;;  %6719 = vmatpush3.bf16.msra.mxu1 %v8208_v53  ;;  %v7107_v53 = vld [vmem:[#allocation6 + $0x98] ss:$12 sps:$4 sm:$0xff]  }
 0x88f   :  { %6720 = vmatprep.subr.bf16.mxu1 %v8756_v31 }
 0x891   :  { %6012 = vmatpush3.bf16.msra.mxu0 %v7104_v45 }
 0x892   :  { %6013 = vmatprep.subr.bf16.mxu0 %v8755_v12  ;;  %6722 = vmatpush3.bf16.msra.mxu1 %v8213_v37  ;;  %v7108_v37 = vld [vmem:[#allocation6 + $0xb0] ss:$12 sps:$4 sm:$0xff]  }
 0x893   :  { %6723 = vmatprep.subr.bf16.mxu1 %v8756_v31 }
 0x895   :  { %6014 = vmatpush3.bf16.msra.mxu0 %v7105_v20 }
 0x896   :  { %6015 = vmatprep.subr.bf16.mxu0 %v8755_v12  ;;  %6725 = vmatpush3.bf16.msra.mxu1 %v8218_v39  ;;  %v7268_v39 = vld [vmem:[#allocation9 + $0x8] ss:$12 sps:$4 sm:$0xff]  }
 0x897   :  { %6726 = vmatprep.subr.bf16.mxu1 %v8756_v31 }
 0x899   :  { %6016 = vmatpush3.bf16.msra.mxu0 %v7106_v13 }
 0x89a   :  { %6017 = vmatprep.subr.bf16.mxu0 %v8755_v12  ;;  %6728 = vmatpush3.bf16.msra.mxu1 %v8223_v16  ;;  %v7269_v16 = vld [vmem:[#allocation9 + $0x20] ss:$12 sps:$4 sm:$0xff]  }
 0x89b   :  { %6729 = vmatprep.subr.bf16.mxu1 %v8756_v31 }
 0x89d   :  { %6018 = vmatpush3.bf16.msra.mxu0 %v7107_v53 }
 0x89e   :  { %6019 = vmatprep.subr.bf16.mxu0 %v8755_v12  ;;  %6731 = vmatpush3.bf16.msra.mxu1 %v8228_v0  ;;  %v4380_v0 = vpop.f32.mrb[48].mxu1 }
 0x89f   :  { %6732 = vmatprep.subr.bf16.mxu1 %v8756_v31  ;;  %v4382_v50 = vpop.f32.mrb[49].mxu1  ;;  %v4381_v27 = vadd.f32 %v4380_v0, %v8786_v47 }
 0x8a0   :  { %v4383_v32 = vadd.f32 %v4382_v50, %v8787_v51  ;;  %v7180_v51 = vpop.eup %7179 }
 0x8a1   :  { %6020 = vmatpush3.bf16.msra.mxu0 %v7108_v37  ;;  %v845_v58 = vsel %vm838_vm2, %v7180_v51, 0.0 }
 0x8a2   :  { %6687 = vmatprep.subr.bf16.mxu0 %v8756_v31  ;;  %6734 = vmatpush3.bf16.msra.mxu1 %v8233_v15  ;;  %v4384_v15 = vpop.f32.mrb[50].mxu1 }
 0x8a3   :  { %v4385_v33 = vpop.f32.mrb[51].mxu1 }
 0x8a4   :  { %6022 = vmatmul.mubr.bf16.vlgmr.msra.gmra.mrb[52].mxu0 %v8531_v60  ;;  %v7271_v60 = vld [vmem:[#allocation9 + $0x50] ss:$12 sps:$4 sm:$0xff]  }
 0x8a5   :  { %6689 = vmatpush3.bf16.msra.mxu0 %v7268_v39  ;;  %6057 = vmatprep.mubr.msk.f32.mxu0 %vm7418_vm0, %v8755_v12  ;;  %v7273_v12 = vld [vmem:[#allocation9 + $0x80] ss:$12 sps:$4 sm:$0xff]  }
 0x8a6   :  { %6690 = vmatprep.subr.bf16.mxu0 %v8756_v31 }
 0x8a9   :  { %6692 = vmatpush3.bf16.msra.mxu0 %v7269_v16 }
 0x8aa   :  { %6693 = vmatprep.subr.bf16.mxu0 %v8756_v31 }
 0x8ad   :  { %6695 = vmatpush3.bf16.msra.mxu0 %v7270_v56 }
 0x8ae   :  { %6696 = vmatprep.subr.bf16.mxu0 %v8756_v31 }
 0x8b1   :  { %6698 = vmatpush3.bf16.msra.mxu0 %v7271_v60 }
 0x8b2   :  { %6699 = vmatprep.subr.bf16.mxu0 %v8756_v31 }
 0x8b5   :  { %6701 = vmatpush3.bf16.msra.mxu0 %v7272_v2 }
 0x8b6   :  { %6702 = vmatprep.subr.bf16.mxu0 %v8756_v31 }
 0x8b9   :  { %6704 = vmatpush3.bf16.msra.mxu0 %v7273_v12 }
 0x8ba   :  { %6705 = vmatprep.subr.bf16.mxu0 %v8756_v31 }
 0x8bd   :  { %6707 = vmatpush3.bf16.msra.mxu0 %v7274_v28 }
 0x8be   :  { %6708 = vmatprep.subr.bf16.mxu0 %v8756_v31  ;;  %v1953_v31 = vmul.f32 1.442695, %v1952_v44 }
 0x8c0   :  { %7181 = vpow2.f32 %v1953_v31 }
 0x8c1   :  { %6710 = vmatpush3.bf16.msra.mxu0 %v7275_v18  ;;  %7183 = vpow2.f32 %v3063_v8 }
 0x8c4   :  { %6058 = vmatmul.mubr.f32.vlgmr.msra.gmra.mrb[50].mxu0 %v8553_v36 }
 0x8ca   :  { %v7182_v43 = vpop.eup %7181 }
 0x8cb   :  { %v7184_v5 = vpop.eup %7183 }
 0x957   :  { %v4164_v52 = vpop.f32.mrb[48].mxu0  ;;  %v4541_v6 = vpop.f32.mrb[52].mxu1 }
 0x958   :  { %v4165_v7 = vadd.f32 %v8792_v48, %v4164_v52  ;;  %v4542_v25 = vadd.f32 %v4541_v6, %v8771_v30  ;;  %v6004_v9 = vpop.f32.mrb[49].mxu0  ;;  %v4543_v1 = vpop.f32.mrb[53].mxu1  ;;  %v1955_v30 = vsel %vm838_vm2, %v7182_v43, 0.0 }
 0x959   :  { %v4544_v54 = vadd.f32 %v4543_v1, %v8793_v11  ;;  %v3065_v11 = vsel %vm838_vm2, %v7184_v5, 0.0 }
 0x95a   :  { %v8616_v22 = vsel %vm836_vm1, %v4165_v7, -1e+30  ;;  %v4616_v10 = vadd.f32 %v4542_v25, %v4381_v27 }
 0x95b   :  { %v4623_v4 = vadd.f32 %v4544_v54, %v4383_v32  ;;  %v4169_v47 = vsel %vm838_vm2, %v8616_v22, -inf  ;;  %v8797_v54 = vld [vmem:[#allocation23_spill] sm:$0xff] }
 0x95c   :  { %4170 = vmax.xlane.f32.xlu0 %v4169_v47  ;;  %v4990_v40 = vmul.f32 -1.442695, %v4616_v10  ;;  %v1397_v10 = vsub.f32 %v8797_v54, %v8599_v24  ;;  %v8798_v47 = vld [vmem:[#allocation28_spill] sm:$0xff] }
 0x95d   :  { %v4991_v46 = vmul.f32 -1.442695, %v4623_v4 }
 0x95e   :  { %7185 = vpow2.f32 %v4990_v40  ;;  %v1398_v4 = vmul.f32 1.442695, %v1397_v10 }
 0x95f   :  { %7187 = vpow2.f32 %v4991_v46 }
 0x960   :  { %846 = vadd.xlane.f32.xlu0 %v845_v58 }
 0x964   :  { %1956 = vadd.xlane.f32.xlu0 %v1955_v30 }
 0x968   :  { %3066 = vadd.xlane.f32.xlu0 %v3065_v11  ;;  %v7186_v14 = vpop.eup %7185 }
 0x969   :  { %v4620_v19 = vadd.f32 1.0, %v7186_v14  ;;  %v7188_v17 = vpop.eup %7187 }
 0x96a   :  { %v4627_v45 = vadd.f32 1.0, %v7188_v17 }
 0x96b   :  { %7189 = vrcp.f32 %v4620_v19 }
 0x96c   :  { %7191 = vrcp.f32 %v4627_v45 }
 0x975   :  { %v7190_v37 = vpop.eup %7189 }
 0x976   :  { %v7192_v56 = vpop.eup %7191 }
 0x977   :  { %v4421_v59 = vpop.f32.mrb[52].mxu0  ;;  %v4633_v50 = vsub.f32 1.0, %v7192_v56  ;;  %v4635_v60 = vmul.f32 %v7192_v56, %v8553_v36 }
 0x978   :  { %v6023_v42 = vpop.f32.mrb[53].mxu0  ;;  %v4422_v39 = vadd.f32 %v4421_v59, %v7772_v3 }
 0x979   :  { %v4424_v61 = vpop.f32.mrb[54].mxu0 }
 0x97a   :  { %v6024_v35 = vpop.f32.mrb[55].mxu0 }
 0x997   :  { %v4612_v20 = vpop.f32.mrb[50].mxu0 }
 0x998   :  { %v4613_v13 = vadd.f32 %v4612_v20, %v7770_v62  ;;  %v6059_v53 = vpop.f32.mrb[51].mxu0 }
 0x99a   :  { %v4630_v16 = vmul.f32 %v7190_v37, %v4613_v13 }
 0x99c   :  { %v4631_v0 = vadd.f32 %v4630_v16, %v4422_v39 }
 0x99e   :  { %7193 = vtanh.f32 %v4631_v0 }
 0x9a8   :  { %v7194_v15 = vpop.eup %7193 }
 0x9a9   :  { %v4634_v33 = vmul.f32 %v7194_v15, %v4633_v50 }
 0x9ab   :  { %v4636_v2 = vadd.f32 %v4635_v60, %v4634_v33 }
 0x9ad   :  { %6093 = vmatmul.mubr.f32.vlgmr.msra.gmra.mrb[54].mxu1 %v4636_v2  ;;  %4738 = vst [vmem:[#allocation13] sm:$0x1] %v4636_v2 }
 0x9e9   :  { %v4171_v12 = vpop.xlane.xlu0 %4170 }
 0x9ea   :  { %v4172_v62 = vsub.f32 %v8616_v22, %v4171_v12 }
 0x9ec   :  { %v4173_v28 = vmul.f32 1.442695, %v4172_v62 }
 0x9ed   :  { %v847_v18 = vpop.xlane.xlu0 %846 }
 0x9ee   :  { %7195 = vpow2.f32 %v4173_v28 }
 0x9ef   :  { %7197 = vlog2.f32 %v847_v18 }
 0x9f1   :  { %v1957_v3 = vpop.xlane.xlu0 %1956 }
 0x9f2   :  { %7199 = vlog2.f32 %v1957_v3 }
 0x9f5   :  { %v3067_v63 = vpop.xlane.xlu0 %3066 }
 0x9f6   :  { %7201 = vlog2.f32 %v3067_v63 }
 0x9f7   :  { %7203 = vpow2.f32 %v1398_v4 }
 0x9f8   :  { %v7196_v34 = vpop.eup %7195 }
 0x9f9   :  { %v7198_v44 = vpop.eup %7197  ;;  %v4175_v31 = vsel %vm838_vm2, %v7196_v34, 0.0 }
 0x9fa   :  { %v849_v21 = vmul.f32 0.6931472, %v7198_v44  ;;  %4176 = vadd.xlane.f32.xlu0 %v4175_v31 }
 0x9fc   :  { %v7200_v36 = vpop.eup %7199  ;;  %v850_v8 = vadd.f32 %v849_v21, %v8595_v57  ;;  %v2506_v57 = vpop.xlane.xlu1 %2505 }
 0x9fd   :  { %v1959_v27 = vmul.f32 0.6931472, %v7200_v36 }
 0x9fe   :  { %v851_v32 = vsub.f32 %v8795_v29, %v850_v8  ;;  %v2507_v29 = vsub.f32 %v8798_v47, %v2506_v57 }
 0x9ff   :  { %v1960_v52 = vadd.f32 %v1959_v27, %v8601_v49 }
 0xa00   :  { %v7202_v6 = vpop.eup %7201  ;;  %852 = vst [vmem:[#allocation12] sm:$0x1] %v851_v32  ;;  %v3616_v51 = vpop.xlane.xlu1 %3615  ;;  %v2508_v49 = vmul.f32 1.442695, %v2507_v29 }
 0xa01   :  { %v1961_v7 = vsub.f32 %v8796_v38, %v1960_v52  ;;  %v3069_v25 = vmul.f32 0.6931472, %v7202_v6  ;;  %v3617_v58 = vsub.f32 %v8546_v41, %v3616_v51  ;;  %v7204_v11 = vpop.eup %7203 }
 0xa02   :  { %7205 = vpow2.f32 %v2508_v49  ;;  %v1400_v42 = vsel %vm838_vm2, %v7204_v11, 0.0 }
 0xa03   :  { %1962 = vst [vmem:[#allocation12 + $0x2] sm:$0x1] %v1961_v7  ;;  %v3070_v9 = vadd.f32 %v3069_v25, %v8605_v55  ;;  %v3618_v38 = vmul.f32 1.442695, %v3617_v58 }
 0xa05   :  { %v3071_v1 = vsub.f32 %v8453_v26, %v3070_v9  ;;  %7207 = vpow2.f32 %v3618_v38 }
 0xa07   :  { %3072 = vst [vmem:[#allocation12 + $0x4] sm:$0x1] %v3071_v1 }
 0xa0c   :  { %v7206_v61 = vpop.eup %7205 }
 0xa0d   :  { %v2510_v40 = vsel %vm838_vm2, %v7206_v61, 0.0 }
 0xa80   :  { %v4719_v43 = vpop.f32.mrb[54].mxu1 }
 0xa81   :  { %v4720_v55 = vadd.f32 %v8792_v48, %v4719_v43  ;;  %v6094_v30 = vpop.f32.mrb[55].mxu1  ;;  %v7208_v48 = vpop.eup %7207 }
 0xa82   :  { %v3620_v35 = vsel %vm838_vm2, %v7208_v48, 0.0 }
 0xa83   :  { %v8641_v26 = vsel %vm836_vm1, %v4720_v55, -1e+30 }
 0xa84   :  { %v4724_v5 = vsel %vm838_vm2, %v8641_v26, -inf }
 0xa85   :  { %4725 = vmax.xlane.f32.xlu1 %v4724_v5 }
 0xa87   :  { %v4177_v59 = vpop.xlane.xlu0 %4176 }
 0xa88   :  { %7209 = vlog2.f32 %v4177_v59 }
 0xa89   :  { %1401 = vadd.xlane.f32.xlu1 %v1400_v42 }
 0xa8d   :  { %2511 = vadd.xlane.f32.xlu1 %v2510_v40 }
 0xa91   :  { %3621 = vadd.xlane.f32.xlu1 %v3620_v35 }
 0xa92   :  { %v7210_v23 = vpop.eup %7209 }
 0xa93   :  { %v4179_v46 = vmul.f32 0.6931472, %v7210_v23 }
 0xa95   :  { %v4180_v14 = vadd.f32 %v4179_v46, %v4171_v12 }
 0xa97   :  { %v4181_v19 = vsub.f32 %v8616_v22, %v4180_v14 }
 0xa99   :  { %4182 = vst [vmem:[#allocation12 + $0x6] sm:$0x1] %v4181_v19 }
 0xb12   :  { %v4726_v17 = vpop.xlane.xlu1 %4725 }
 0xb13   :  { %v4727_v45 = vsub.f32 %v8641_v26, %v4726_v17 }
 0xb15   :  { %v4728_v20 = vmul.f32 1.442695, %v4727_v45 }
 0xb16   :  { %v1402_v13 = vpop.xlane.xlu1 %1401 }
 0xb17   :  { %7211 = vpow2.f32 %v4728_v20 }
 0xb18   :  { %7213 = vlog2.f32 %v1402_v13 }
 0xb1a   :  { %v2512_v53 = vpop.xlane.xlu1 %2511 }
 0xb1b   :  { %7215 = vlog2.f32 %v2512_v53 }
 0xb1e   :  { %v3622_v37 = vpop.xlane.xlu1 %3621 }
 0xb1f   :  { %7217 = vlog2.f32 %v3622_v37 }
 0xb21   :  { %v7212_v39 = vpop.eup %7211 }
 0xb22   :  { %v7214_v16 = vpop.eup %7213  ;;  %v4730_v0 = vsel %vm838_vm2, %v7212_v39, 0.0 }
 0xb23   :  { %v1404_v56 = vmul.f32 0.6931472, %v7214_v16  ;;  %4731 = vadd.xlane.f32.xlu1 %v4730_v0 }
 0xb25   :  { %v7216_v50 = vpop.eup %7215  ;;  %v1405_v22 = vadd.f32 %v1404_v56, %v8599_v24 }
 0xb26   :  { %v2514_v15 = vmul.f32 0.6931472, %v7216_v50 }
 0xb27   :  { %v1406_v33 = vsub.f32 %v8797_v54, %v1405_v22 }
 0xb28   :  { %v2515_v60 = vadd.f32 %v2514_v15, %v2506_v57 }
 0xb29   :  { %v7218_v2 = vpop.eup %7217  ;;  %1407 = vst [vmem:[#allocation12 + $0x1] sm:$0x1] %v1406_v33 }
 0xb2a   :  { %v2516_v12 = vsub.f32 %v8798_v47, %v2515_v60  ;;  %v3624_v62 = vmul.f32 0.6931472, %v7218_v2 }
 0xb2c   :  { %2517 = vst [vmem:[#allocation12 + $0x3] sm:$0x1] %v2516_v12  ;;  %v3625_v28 = vadd.f32 %v3624_v62, %v3616_v51 }
 0xb2e   :  { %v3626_v18 = vsub.f32 %v8546_v41, %v3625_v28 }
 0xb30   :  { %3627 = vst [vmem:[#allocation12 + $0x5] sm:$0x1] %v3626_v18 }
 0xb31   :  { %7365 = shalt.err (!%p7362_p5)
}
 0xb32   :  { %s7366_s28 = scalar_lea.hbm %s8690_s10, 16 }
 0xb33   :  { %p7367_p6 = scmp.ne.s32.totalorder %s8690_s10, %s7366_s28  ;;  %p7370_p7 = scmp.lt.u32.totalorder %s7366_s28, %s8690_s10 }
 0xb35   :  { %p7372_p8 = pnand %p7370_p7, %p7367_p6 }
 0xb37   :  { %7375 = shalt.err (!%p7372_p8)
}
 0xb38   :  { %4758 = dma.vmem_to_hbm [thread:$0]  %s4756_s5, 16, %s8690_s10, [#allocation14]  }
 0xb39   :  { %s7421_s30 = smov [#allocation12]  }
 0xb3a   :  { %s4745_s7 = sshll.u32 %s7421_s30, 4  ;;  %s4746_s7 = int_to_ptr.vmem [resolvable:$true] %s4745_s7 }
 0xb3b   :  { %s7376_s14 = scalar_lea.vmem %s4746_s7, 128  ;;  %p7381_p10 = scmp.lt.s32.totalorder %s4746_s7, %s4746_s7 }
 0xb3c   :  { %p7377_p9 = scmp.ne.s32.totalorder %s4746_s7, %s7376_s14  ;;  %p7382_p11 = scmp.lt.s32.totalorder %s7376_s14, %s7376_s14 }
 0xb3e   :  { %p7383_p12 = por %p7382_p11, %p7381_p10 }
 0xb40   :  { %p7384_p13 = pnand %p7383_p12, %p7377_p9 }
 0xbb0   :  { %v4732_v41 = vpop.xlane.xlu1 %4731 }
 0xbb1   :  { %7219 = vlog2.f32 %v4732_v41 }
 0xbbb   :  { %v7220_v24 = vpop.eup %7219 }
 0xbbc   :  { %v4734_v3 = vmul.f32 0.6931472, %v7220_v24 }
 0xbbe   :  { %v4735_v63 = vadd.f32 %v4734_v3, %v4726_v17 }
 0xbc0   :  { %v4736_v34 = vsub.f32 %v8641_v26, %v4735_v63 }
 0xbc2   :  { %4737 = vst [vmem:[#allocation12 + $0x7] sm:$0x1] %v4736_v34 }
 0xbc3   :  { %7387 = shalt.err (!%p7384_p13)
}
 0xbc4   :  { %s7388_s16 = scalar_lea.hbm %s8689_s9, 128 }
 0xbc5   :  { %p7389_p0 = scmp.ne.s32.totalorder %s8689_s9, %s7388_s16  ;;  %p7392_p1 = scmp.lt.u32.totalorder %s7388_s16, %s8689_s9 }
 0xbc7   :  { %p7394_p2 = pnand %p7392_p1, %p7389_p0 }
 0xbc9   :  { %7397 = shalt.err (!%p7394_p2)
}
 0xbca   :  { %4748 = dma.vmem_to_hbm [thread:$0]  %s4746_s7, 128, %s8689_s9, [#allocation8]  }
 0xbcb   :  { %7404 = dma.done.wait [#allocation8], 128  }
 0xbcc   :  { %7405 = vsyncadd [#allocation8], 4294967168 }
 0xbcd   :  { %7406 = dma.done.wait [#allocation14], 16  }
 0xbce   :  { %7407 = vsyncadd [#allocation14], 4294967280 }
 0xbcf   :  { %4765 = vsyncpa [#allocation7], 1 }
 0xbd0   :  { %4766 = vsyncpa [#allocation10], 1 }
 0xbd1   :  { %4767 = vsyncpa [#allocation8], 1 }
 0xbd2   :  { %4768 = vsyncpa [#allocation14], 1 }

</bundles_post_ra>
